<compile_context>
chip_gen: v5e
topology: v5e:2x2
jax: 0.10.0
libtpu: 0.0.40
codegen_flags: <defaults>
</compile_context>

<pallas_src>
import jax
import jax.numpy as jnp
from jax.experimental import pallas as pl
from jax.experimental.pallas import tpu as pltpu

_BN_EPS = 1e-5
_LEAKY_SLOPE = 0.2
_VMEM_LIMIT = 32 * 1024 * 1024


def _leaky(y):
    return jnp.where(y > 0, y, _LEAKY_SLOPE * y)


# ----------------------------------------------------------------------------
# Pallas kernels (all epilogues fused into the matmul kernel)
# ----------------------------------------------------------------------------
def _conv_leaky_kernel(p_ref, w_ref, o_ref):
    """conv-as-matmul + LeakyReLU(0.2).  Pure map over M tiles."""
    y = jnp.dot(p_ref[...], w_ref[...], preferred_element_type=jnp.float32)
    o_ref[...] = _leaky(y).astype(o_ref.dtype)


def _conv_bn_leaky_kernel(p_ref, w_ref, g_ref, b_ref, o_ref):
    """conv-as-matmul + BatchNorm (batch stats, two-pass var) + LeakyReLU(0.2)."""
    y = jnp.dot(p_ref[...], w_ref[...], preferred_element_type=jnp.float32)
    mean = jnp.mean(y, axis=0, keepdims=True)
    var = jnp.mean(jnp.square(y - mean), axis=0, keepdims=True)   # two-pass, no cancellation
    inv = jax.lax.rsqrt(var + _BN_EPS)
    scale = g_ref[...] * inv
    shift = b_ref[...] - mean * scale
    o_ref[...] = _leaky(y * scale + shift).astype(o_ref.dtype)


def _conv_bn_leaky_head_kernel(p_ref, w_ref, g_ref, b_ref, w7_ref, grp_ref, o_ref):
    """conv5 + BN + LeakyReLU + conv7(2x2,s4) + Sigmoid, fully fused head.

    conv5 output has N*2*2 rows (sample-major); conv7 on the 2x2 map is a
    per-sample dot with the 2x2xC kernel, done as elementwise mul with the
    row-arranged conv7 weights, a (N, N*4) group-sum matmul and a lane reduce.
    """
    y = jnp.dot(p_ref[...], w_ref[...], preferred_element_type=jnp.float32)
    mean = jnp.mean(y, axis=0, keepdims=True)
    var = jnp.mean(jnp.square(y - mean), axis=0, keepdims=True)
    inv = jax.lax.rsqrt(var + _BN_EPS)
    scale = g_ref[...] * inv
    shift = b_ref[...] - mean * scale
    a = _leaky(y * scale + shift)                                   # (N*4, C) f32
    prod = a * w7_ref[...]                                          # conv7 taps, per row
    per_sample = jnp.dot(grp_ref[...], prod,
                         preferred_element_type=jnp.float32)        # (N, C)
    logits = jnp.sum(per_sample, axis=1, keepdims=True)             # (N, 1)
    o_ref[...] = jax.nn.sigmoid(logits).astype(o_ref.dtype)


# ----------------------------------------------------------------------------
# pallas_call wrappers
# ----------------------------------------------------------------------------
def conv_leaky(patches, w, *, tile_m=512):
    M, K = patches.shape
    cout = w.shape[1]
    tm = tile_m if (M % tile_m == 0 and M >= tile_m) else M
    return pl.pallas_call(
        _conv_leaky_kernel,
        out_shape=jax.ShapeDtypeStruct((M, cout), jnp.bfloat16),
        grid=(M // tm,),
        in_specs=[pl.BlockSpec((tm, K), lambda i: (i, 0)),
                  pl.BlockSpec((K, cout), lambda i: (0, 0))],
        out_specs=pl.BlockSpec((tm, cout), lambda i: (i, 0)),
        compiler_params=pltpu.CompilerParams(
            dimension_semantics=("parallel",),
            vmem_limit_bytes=_VMEM_LIMIT),
    )(patches, w)


def conv_bn_leaky(patches, w, gamma, beta):
    # Whole batch in one block: BN statistics need all M rows (M <= 512 here).
    M, K = patches.shape
    cout = w.shape[1]
    return pl.pallas_call(
        _conv_bn_leaky_kernel,
        out_shape=jax.ShapeDtypeStruct((M, cout), jnp.bfloat16),
        grid=(1,),
        in_specs=[pl.BlockSpec((M, K), lambda i: (0, 0)),
                  pl.BlockSpec((K, cout), lambda i: (0, 0)),
                  pl.BlockSpec((1, cout), lambda i: (0, 0)),
                  pl.BlockSpec((1, cout), lambda i: (0, 0))],
        out_specs=pl.BlockSpec((M, cout), lambda i: (0, 0)),
        compiler_params=pltpu.CompilerParams(
            dimension_semantics=("arbitrary",),
            vmem_limit_bytes=_VMEM_LIMIT),
    )(patches, w, gamma, beta)


def conv_bn_leaky_head(patches, w, gamma, beta, w7_rows, group):
    M, K = patches.shape
    cout = w.shape[1]
    nb = group.shape[0]
    return pl.pallas_call(
        _conv_bn_leaky_head_kernel,
        out_shape=jax.ShapeDtypeStruct((nb, 1), jnp.float32),
        grid=(1,),
        in_specs=[pl.BlockSpec((M, K), lambda i: (0, 0)),
                  pl.BlockSpec((K, cout), lambda i: (0, 0)),
                  pl.BlockSpec((1, cout), lambda i: (0, 0)),
                  pl.BlockSpec((1, cout), lambda i: (0, 0)),
                  pl.BlockSpec((M, cout), lambda i: (0, 0)),
                  pl.BlockSpec((nb, M), lambda i: (0, 0))],
        out_specs=pl.BlockSpec((nb, 1), lambda i: (0, 0)),
        compiler_params=pltpu.CompilerParams(
            dimension_semantics=("arbitrary",),
            vmem_limit_bytes=_VMEM_LIMIT),
    )(patches, w, gamma, beta, w7_rows, group)


# ----------------------------------------------------------------------------
# XLA-side glue: im2col (bf16) + weight flattening
# ----------------------------------------------------------------------------
def im2col(x, k, s, p):
    """x: NHWC -> (N*OH*OW, k*k*C) patches in (kh, kw, C) column order."""
    N, H, W, C = x.shape
    OH = (H + 2 * p - k) // s + 1
    OW = (W + 2 * p - k) // s + 1
    xp = jnp.pad(x, ((0, 0), (p, p), (p, p), (0, 0)))
    cols = []
    for kh in range(k):
        for kw in range(k):
            cols.append(
                xp[:, kh: kh + s * (OH - 1) + 1: s,
                      kw: kw + s * (OW - 1) + 1: s, :])
    patches = jnp.stack(cols, axis=3)                   # (N, OH, OW, k*k, C)
    return patches.reshape(N * OH * OW, k * k * C), OH, OW


def _flatten_w(w_pt):
    """PyTorch (Cout, Cin, kh, kw) -> (kh*kw*Cin, Cout), cast to bf16 for the MXU."""
    cout, cin, kh, kw = w_pt.shape
    return jnp.transpose(w_pt, (2, 3, 1, 0)).reshape(kh * kw * cin, cout).astype(jnp.bfloat16)


# ----------------------------------------------------------------------------
# Discriminator forward
# ----------------------------------------------------------------------------
def discriminator_forward(x_nchw, params):
    N = x_nchw.shape[0]
    C = params["w1"].shape[0]                            # features * 8
    gamma = params["bn_gamma"].reshape(1, C).astype(jnp.float32)
    beta = params["bn_beta"].reshape(1, C).astype(jnp.float32)

    x = jnp.transpose(x_nchw, (0, 2, 3, 1)).astype(jnp.bfloat16)   # NCHW -> NHWC, bf16

    # conv1 + LeakyReLU (tiled over M, parallel)
    p, OH, OW = im2col(x, 4, 2, 1)
    a = conv_leaky(p, _flatten_w(params["w1"]))
    x = a.reshape(N, OH, OW, C)

    # conv2..conv4 + shared BatchNorm (training-mode batch stats) + LeakyReLU
    for name in ("w2", "w3", "w4"):
        p, OH, OW = im2col(x, 4, 2, 1)
        a = conv_bn_leaky(p, _flatten_w(params[name]), gamma, beta)
        x = a.reshape(N, OH, OW, C)

    # conv5 + BN + LeakyReLU + conv7 + Sigmoid, all fused in the head kernel
    p, OH, OW = im2col(x, 4, 2, 1)                       # OH == OW == 2
    w7_rows = jnp.transpose(params["w7"][0], (1, 2, 0)).reshape(OH * OW, C)
    w7_rows = jnp.tile(w7_rows, (N, 1)).astype(jnp.float32)          # (N*4, C)
    group = jnp.repeat(jnp.eye(N, dtype=jnp.float32), OH * OW, axis=1)  # (N, N*4)
    out = conv_bn_leaky_head(p, _flatten_w(params["w5"]), gamma, beta, w7_rows, group)
    return out.reshape(N, 1, 1, 1)


def init_params(channel, features, key):
    f8 = features * 8
    keys = jax.random.split(key, 6)

    def w(k, shape):
        return jax.random.normal(k, shape, dtype=jnp.float32) * 0.05

    return {
        "w1": w(keys[0], (f8, channel, 4, 4)),
        "w2": w(keys[1], (f8, f8, 4, 4)),
        "w3": w(keys[2], (f8, f8, 4, 4)),
        "w4": w(keys[3], (f8, f8, 4, 4)),
        "w5": w(keys[4], (f8, f8, 4, 4)),
        "w7": w(keys[5], (1, f8, 2, 2)),
        "bn_gamma": jnp.ones((f8,), jnp.float32),   # shared BatchNorm affine (init values)
        "bn_beta": jnp.zeros((f8,), jnp.float32),
    }


if __name__ == "__main__":
    channel, features = 3, 4           # features*8 = 32 conv channels
    batch, spatial = 2, 64             # 64 -> 32 -> 16 -> 8 -> 4 -> 2 -> 1 (conv7)

    key = jax.random.PRNGKey(0)
    k_x, k_p = jax.random.split(key)
    x = jax.random.normal(k_x, (batch, channel, spatial, spatial), dtype=jnp.float32)
    params = init_params(channel, features, k_p)

    fwd = jax.jit(discriminator_forward)
    out = fwd(x, params)
    jax.block_until_ready(out)
    assert out.shape == (batch, 1, 1, 1)
    assert bool(jnp.all((out >= 0.0) & (out <= 1.0)))
    print("KERNEL_OK")
</pallas_src>

<mosaic_0001>
module attributes {stable_mosaic.version = 11 : i64} {
  func.func @_conv_leaky_kernel(%arg0: i32, %arg1: memref<512x48xbf16, #tpu.memory_space<vmem>>, %arg2: memref<48x32xbf16, #tpu.memory_space<vmem>>, %arg3: memref<512x32xbf16, #tpu.memory_space<vmem>>) attributes {dimension_semantics = [#tpu.dimension_semantics<parallel>], iteration_bounds = array<i64: 4>, scalar_prefetch = 0 : i64, scratch_operands = 0 : i64, tpu.core_type = #tpu.core_type<tc>, window_params = [{transform_indices = @transform_0, window_bounds = array<i64: 512, 48>}, {pipeline_mode = #tpu.pipeline_mode<synchronous>, transform_indices = @transform_1, window_bounds = array<i64: 48, 32>}, {transform_indices = @transform_2, window_bounds = array<i64: 512, 32>}]} {
    %c0 = arith.constant 0 : index
    %c0_0 = arith.constant 0 : index
    %0 = vector.load %arg1[%c0, %c0_0] : memref<512x48xbf16, #tpu.memory_space<vmem>>, vector<512x48xbf16>
    %c0_1 = arith.constant 0 : index
    %c0_2 = arith.constant 0 : index
    %1 = vector.load %arg2[%c0_1, %c0_2] : memref<48x32xbf16, #tpu.memory_space<vmem>>, vector<48x32xbf16>
    %cst = arith.constant dense<0.000000e+00> : vector<512x32xf32>
    %2 = tpu.matmul %0, %1, %cst {dimension_numbers = #tpu.dot_dimension_numbers<[1], [0], [0], [1], [0, 0, 1, 1], [], []>} : vector<512x48xbf16>, vector<48x32xbf16>, vector<512x32xf32> -> vector<512x32xf32>
    %cst_3 = arith.constant 0.000000e+00 : f32
    %3 = vector.broadcast %cst_3 : f32 to vector<512x32xf32>
    %4 = arith.cmpf ogt, %2, %3 : vector<512x32xf32>
    %cst_4 = arith.constant 2.000000e-01 : f32
    %5 = vector.broadcast %cst_4 : f32 to vector<512x32xf32>
    %6 = arith.mulf %5, %2 : vector<512x32xf32>
    %7 = arith.select %4, %2, %6 : vector<512x32xi1>, vector<512x32xf32>
    %8 = arith.truncf %7 : vector<512x32xf32> to vector<512x32xbf16>
    %c0_5 = arith.constant 0 : index
    %c0_6 = arith.constant 0 : index
    %9 = vector.load %arg3[%c0_5, %c0_6] : memref<512x32xbf16, #tpu.memory_space<vmem>>, vector<512x32xbf16>
    tpu.vector_store %arg3[%c0_5, %c0_6], %8 {strides = array<i32>} : memref<512x32xbf16, #tpu.memory_space<vmem>>, vector<512x32xbf16>,
    return
  }
  func.func @transform_0(%arg0: i32) -> (i32, i32) {
    %c0_i32 = arith.constant 0 : i32
    %c0_i32_0 = arith.constant 0 : i32
    return %arg0, %c0_i32 : i32, i32
  }
  func.func @transform_1(%arg0: i32) -> (i32, i32) {
    %c0_i32 = arith.constant 0 : i32
    %c0_i32_0 = arith.constant 0 : i32
    %c0_i32_1 = arith.constant 0 : i32
    return %c0_i32, %c0_i32_0 : i32, i32
  }
  func.func @transform_2(%arg0: i32) -> (i32, i32) {
    %c0_i32 = arith.constant 0 : i32
    %c0_i32_0 = arith.constant 0 : i32
    return %arg0, %c0_i32 : i32, i32
  }
}

module attributes {stable_mosaic.version = 11 : i64} {
  func.func @_conv_bn_leaky_kernel(%arg0: i32, %arg1: memref<512x512xbf16, #tpu.memory_space<vmem>>, %arg2: memref<512x32xbf16, #tpu.memory_space<vmem>>, %arg3: memref<1x32xf32, #tpu.memory_space<vmem>>, %arg4: memref<1x32xf32, #tpu.memory_space<vmem>>, %arg5: memref<512x32xbf16, #tpu.memory_space<vmem>>) attributes {dimension_semantics = [#tpu.dimension_semantics<arbitrary>], iteration_bounds = array<i64: 1>, scalar_prefetch = 0 : i64, scratch_operands = 0 : i64, tpu.core_type = #tpu.core_type<tc>, window_params = [{pipeline_mode = #tpu.pipeline_mode<synchronous>, transform_indices = @transform_0, window_bounds = array<i64: 512, 512>}, {pipeline_mode = #tpu.pipeline_mode<synchronous>, transform_indices = @transform_1, window_bounds = array<i64: 512, 32>}, {pipeline_mode = #tpu.pipeline_mode<synchronous>, transform_indices = @transform_2, window_bounds = array<i64: 1, 32>}, {pipeline_mode = #tpu.pipeline_mode<synchronous>, transform_indices = @transform_3, window_bounds = array<i64: 1, 32>}, {pipeline_mode = #tpu.pipeline_mode<synchronous>, transform_indices = @transform_4, window_bounds = array<i64: 512, 32>}]} {
    %c0 = arith.constant 0 : index
    %c0_0 = arith.constant 0 : index
    %0 = vector.load %arg1[%c0, %c0_0] : memref<512x512xbf16, #tpu.memory_space<vmem>>, vector<512x512xbf16>
    %c0_1 = arith.constant 0 : index
    %c0_2 = arith.constant 0 : index
    %1 = vector.load %arg2[%c0_1, %c0_2] : memref<512x32xbf16, #tpu.memory_space<vmem>>, vector<512x32xbf16>
    %cst = arith.constant dense<0.000000e+00> : vector<512x32xf32>
    %2 = tpu.matmul %0, %1, %cst {dimension_numbers = #tpu.dot_dimension_numbers<[1], [0], [0], [1], [0, 0, 1, 1], [], []>} : vector<512x512xbf16>, vector<512x32xbf16>, vector<512x32xf32> -> vector<512x32xf32>
    %cst_3 = arith.constant dense<0.000000e+00> : vector<32xf32>
    %3 = vector.multi_reduction <add>, %2, %cst_3 [0] : vector<512x32xf32> to vector<32xf32>
    %4 = vector.shape_cast %3 : vector<32xf32> to vector<1x32xf32>
    %cst_4 = arith.constant 5.120000e+02 : f32
    %5 = vector.broadcast %cst_4 : f32 to vector<1x32xf32>
    %6 = arith.divf %4, %5 : vector<1x32xf32>
    %7 = vector.broadcast %6 : vector<1x32xf32> to vector<512x32xf32>
    %8 = arith.subf %2, %7 : vector<512x32xf32>
    %9 = arith.mulf %8, %8 : vector<512x32xf32>
    %cst_5 = arith.constant dense<0.000000e+00> : vector<32xf32>
    %10 = vector.multi_reduction <add>, %9, %cst_5 [0] : vector<512x32xf32> to vector<32xf32>
    %11 = vector.shape_cast %10 : vector<32xf32> to vector<1x32xf32>
    %cst_6 = arith.constant 5.120000e+02 : f32
    %12 = vector.broadcast %cst_6 : f32 to vector<1x32xf32>
    %13 = arith.divf %11, %12 : vector<1x32xf32>
    %cst_7 = arith.constant 9.99999974E-6 : f32
    %14 = vector.broadcast %cst_7 : f32 to vector<1x32xf32>
    %15 = arith.addf %13, %14 : vector<1x32xf32>
    %16 = math.rsqrt %15 : vector<1x32xf32>
    %c0_8 = arith.constant 0 : index
    %c0_9 = arith.constant 0 : index
    %17 = vector.load %arg3[%c0_8, %c0_9] : memref<1x32xf32, #tpu.memory_space<vmem>>, vector<1x32xf32>
    %18 = arith.mulf %17, %16 : vector<1x32xf32>
    %c0_10 = arith.constant 0 : index
    %c0_11 = arith.constant 0 : index
    %19 = vector.load %arg4[%c0_10, %c0_11] : memref<1x32xf32, #tpu.memory_space<vmem>>, vector<1x32xf32>
    %20 = arith.mulf %6, %18 : vector<1x32xf32>
    %21 = arith.subf %19, %20 : vector<1x32xf32>
    %22 = vector.broadcast %18 : vector<1x32xf32> to vector<512x32xf32>
    %23 = arith.mulf %2, %22 : vector<512x32xf32>
    %24 = vector.broadcast %21 : vector<1x32xf32> to vector<512x32xf32>
    %25 = arith.addf %23, %24 : vector<512x32xf32>
    %cst_12 = arith.constant 0.000000e+00 : f32
    %26 = vector.broadcast %cst_12 : f32 to vector<512x32xf32>
    %27 = arith.cmpf ogt, %25, %26 : vector<512x32xf32>
    %cst_13 = arith.constant 2.000000e-01 : f32
    %28 = vector.broadcast %cst_13 : f32 to vector<512x32xf32>
    %29 = arith.mulf %28, %25 : vector<512x32xf32>
    %30 = arith.select %27, %25, %29 : vector<512x32xi1>, vector<512x32xf32>
    %31 = arith.truncf %30 : vector<512x32xf32> to vector<512x32xbf16>
    %c0_14 = arith.constant 0 : index
    %c0_15 = arith.constant 0 : index
    %32 = vector.load %arg5[%c0_14, %c0_15] : memref<512x32xbf16, #tpu.memory_space<vmem>>, vector<512x32xbf16>
    tpu.vector_store %arg5[%c0_14, %c0_15], %31 {strides = array<i32>} : memref<512x32xbf16, #tpu.memory_space<vmem>>, vector<512x32xbf16>,
    return
  }
  func.func @transform_0(%arg0: i32) -> (i32, i32) {
    %c0_i32 = arith.constant 0 : i32
    %c0_i32_0 = arith.constant 0 : i32
    %c0_i32_1 = arith.constant 0 : i32
    return %c0_i32, %c0_i32_0 : i32, i32
  }
  func.func @transform_1(%arg0: i32) -> (i32, i32) {
    %c0_i32 = arith.constant 0 : i32
    %c0_i32_0 = arith.constant 0 : i32
    %c0_i32_1 = arith.constant 0 : i32
    return %c0_i32, %c0_i32_0 : i32, i32
  }
  func.func @transform_2(%arg0: i32) -> (i32, i32) {
    %c0_i32 = arith.constant 0 : i32
    %c0_i32_0 = arith.constant 0 : i32
    %c0_i32_1 = arith.constant 0 : i32
    return %c0_i32, %c0_i32_0 : i32, i32
  }
  func.func @transform_3(%arg0: i32) -> (i32, i32) {
    %c0_i32 = arith.constant 0 : i32
    %c0_i32_0 = arith.constant 0 : i32
    %c0_i32_1 = arith.constant 0 : i32
    return %c0_i32, %c0_i32_0 : i32, i32
  }
  func.func @transform_4(%arg0: i32) -> (i32, i32) {
    %c0_i32 = arith.constant 0 : i32
    %c0_i32_0 = arith.constant 0 : i32
    %c0_i32_1 = arith.constant 0 : i32
    return %c0_i32, %c0_i32_0 : i32, i32
  }
}

module attributes {stable_mosaic.version = 11 : i64} {
  func.func @_conv_bn_leaky_kernel(%arg0: i32, %arg1: memref<128x512xbf16, #tpu.memory_space<vmem>>, %arg2: memref<512x32xbf16, #tpu.memory_space<vmem>>, %arg3: memref<1x32xf32, #tpu.memory_space<vmem>>, %arg4: memref<1x32xf32, #tpu.memory_space<vmem>>, %arg5: memref<128x32xbf16, #tpu.memory_space<vmem>>) attributes {dimension_semantics = [#tpu.dimension_semantics<arbitrary>], iteration_bounds = array<i64: 1>, scalar_prefetch = 0 : i64, scratch_operands = 0 : i64, tpu.core_type = #tpu.core_type<tc>, window_params = [{pipeline_mode = #tpu.pipeline_mode<synchronous>, transform_indices = @transform_0, window_bounds = array<i64: 128, 512>}, {pipeline_mode = #tpu.pipeline_mode<synchronous>, transform_indices = @transform_1, window_bounds = array<i64: 512, 32>}, {pipeline_mode = #tpu.pipeline_mode<synchronous>, transform_indices = @transform_2, window_bounds = array<i64: 1, 32>}, {pipeline_mode = #tpu.pipeline_mode<synchronous>, transform_indices = @transform_3, window_bounds = array<i64: 1, 32>}, {pipeline_mode = #tpu.pipeline_mode<synchronous>, transform_indices = @transform_4, window_bounds = array<i64: 128, 32>}]} {
    %c0 = arith.constant 0 : index
    %c0_0 = arith.constant 0 : index
    %0 = vector.load %arg1[%c0, %c0_0] : memref<128x512xbf16, #tpu.memory_space<vmem>>, vector<128x512xbf16>
    %c0_1 = arith.constant 0 : index
    %c0_2 = arith.constant 0 : index
    %1 = vector.load %arg2[%c0_1, %c0_2] : memref<512x32xbf16, #tpu.memory_space<vmem>>, vector<512x32xbf16>
    %cst = arith.constant dense<0.000000e+00> : vector<128x32xf32>
    %2 = tpu.matmul %0, %1, %cst {dimension_numbers = #tpu.dot_dimension_numbers<[1], [0], [0], [1], [0, 0, 1, 1], [], []>} : vector<128x512xbf16>, vector<512x32xbf16>, vector<128x32xf32> -> vector<128x32xf32>
    %cst_3 = arith.constant dense<0.000000e+00> : vector<32xf32>
    %3 = vector.multi_reduction <add>, %2, %cst_3 [0] : vector<128x32xf32> to vector<32xf32>
    %4 = vector.shape_cast %3 : vector<32xf32> to vector<1x32xf32>
    %cst_4 = arith.constant 1.280000e+02 : f32
    %5 = vector.broadcast %cst_4 : f32 to vector<1x32xf32>
    %6 = arith.divf %4, %5 : vector<1x32xf32>
    %7 = vector.broadcast %6 : vector<1x32xf32> to vector<128x32xf32>
    %8 = arith.subf %2, %7 : vector<128x32xf32>
    %9 = arith.mulf %8, %8 : vector<128x32xf32>
    %cst_5 = arith.constant dense<0.000000e+00> : vector<32xf32>
    %10 = vector.multi_reduction <add>, %9, %cst_5 [0] : vector<128x32xf32> to vector<32xf32>
    %11 = vector.shape_cast %10 : vector<32xf32> to vector<1x32xf32>
    %cst_6 = arith.constant 1.280000e+02 : f32
    %12 = vector.broadcast %cst_6 : f32 to vector<1x32xf32>
    %13 = arith.divf %11, %12 : vector<1x32xf32>
    %cst_7 = arith.constant 9.99999974E-6 : f32
    %14 = vector.broadcast %cst_7 : f32 to vector<1x32xf32>
    %15 = arith.addf %13, %14 : vector<1x32xf32>
    %16 = math.rsqrt %15 : vector<1x32xf32>
    %c0_8 = arith.constant 0 : index
    %c0_9 = arith.constant 0 : index
    %17 = vector.load %arg3[%c0_8, %c0_9] : memref<1x32xf32, #tpu.memory_space<vmem>>, vector<1x32xf32>
    %18 = arith.mulf %17, %16 : vector<1x32xf32>
    %c0_10 = arith.constant 0 : index
    %c0_11 = arith.constant 0 : index
    %19 = vector.load %arg4[%c0_10, %c0_11] : memref<1x32xf32, #tpu.memory_space<vmem>>, vector<1x32xf32>
    %20 = arith.mulf %6, %18 : vector<1x32xf32>
    %21 = arith.subf %19, %20 : vector<1x32xf32>
    %22 = vector.broadcast %18 : vector<1x32xf32> to vector<128x32xf32>
    %23 = arith.mulf %2, %22 : vector<128x32xf32>
    %24 = vector.broadcast %21 : vector<1x32xf32> to vector<128x32xf32>
    %25 = arith.addf %23, %24 : vector<128x32xf32>
    %cst_12 = arith.constant 0.000000e+00 : f32
    %26 = vector.broadcast %cst_12 : f32 to vector<128x32xf32>
    %27 = arith.cmpf ogt, %25, %26 : vector<128x32xf32>
    %cst_13 = arith.constant 2.000000e-01 : f32
    %28 = vector.broadcast %cst_13 : f32 to vector<128x32xf32>
    %29 = arith.mulf %28, %25 : vector<128x32xf32>
    %30 = arith.select %27, %25, %29 : vector<128x32xi1>, vector<128x32xf32>
    %31 = arith.truncf %30 : vector<128x32xf32> to vector<128x32xbf16>
    %c0_14 = arith.constant 0 : index
    %c0_15 = arith.constant 0 : index
    %32 = vector.load %arg5[%c0_14, %c0_15] : memref<128x32xbf16, #tpu.memory_space<vmem>>, vector<128x32xbf16>
    tpu.vector_store %arg5[%c0_14, %c0_15], %31 {strides = array<i32>} : memref<128x32xbf16, #tpu.memory_space<vmem>>, vector<128x32xbf16>,
    return
  }
  func.func @transform_0(%arg0: i32) -> (i32, i32) {
    %c0_i32 = arith.constant 0 : i32
    %c0_i32_0 = arith.constant 0 : i32
    %c0_i32_1 = arith.constant 0 : i32
    return %c0_i32, %c0_i32_0 : i32, i32
  }
  func.func @transform_1(%arg0: i32) -> (i32, i32) {
    %c0_i32 = arith.constant 0 : i32
    %c0_i32_0 = arith.constant 0 : i32
    %c0_i32_1 = arith.constant 0 : i32
    return %c0_i32, %c0_i32_0 : i32, i32
  }
  func.func @transform_2(%arg0: i32) -> (i32, i32) {
    %c0_i32 = arith.constant 0 : i32
    %c0_i32_0 = arith.constant 0 : i32
    %c0_i32_1 = arith.constant 0 : i32
    return %c0_i32, %c0_i32_0 : i32, i32
  }
  func.func @transform_3(%arg0: i32) -> (i32, i32) {
    %c0_i32 = arith.constant 0 : i32
    %c0_i32_0 = arith.constant 0 : i32
    %c0_i32_1 = arith.constant 0 : i32
    return %c0_i32, %c0_i32_0 : i32, i32
  }
  func.func @transform_4(%arg0: i32) -> (i32, i32) {
    %c0_i32 = arith.constant 0 : i32
    %c0_i32_0 = arith.constant 0 : i32
    %c0_i32_1 = arith.constant 0 : i32
    return %c0_i32, %c0_i32_0 : i32, i32
  }
}

module attributes {stable_mosaic.version = 11 : i64} {
  func.func @_conv_bn_leaky_kernel(%arg0: i32, %arg1: memref<32x512xbf16, #tpu.memory_space<vmem>>, %arg2: memref<512x32xbf16, #tpu.memory_space<vmem>>, %arg3: memref<1x32xf32, #tpu.memory_space<vmem>>, %arg4: memref<1x32xf32, #tpu.memory_space<vmem>>, %arg5: memref<32x32xbf16, #tpu.memory_space<vmem>>) attributes {dimension_semantics = [#tpu.dimension_semantics<arbitrary>], iteration_bounds = array<i64: 1>, scalar_prefetch = 0 : i64, scratch_operands = 0 : i64, tpu.core_type = #tpu.core_type<tc>, window_params = [{pipeline_mode = #tpu.pipeline_mode<synchronous>, transform_indices = @transform_0, window_bounds = array<i64: 32, 512>}, {pipeline_mode = #tpu.pipeline_mode<synchronous>, transform_indices = @transform_1, window_bounds = array<i64: 512, 32>}, {pipeline_mode = #tpu.pipeline_mode<synchronous>, transform_indices = @transform_2, window_bounds = array<i64: 1, 32>}, {pipeline_mode = #tpu.pipeline_mode<synchronous>, transform_indices = @transform_3, window_bounds = array<i64: 1, 32>}, {pipeline_mode = #tpu.pipeline_mode<synchronous>, transform_indices = @transform_4, window_bounds = array<i64: 32, 32>}]} {
    %c0 = arith.constant 0 : index
    %c0_0 = arith.constant 0 : index
    %0 = vector.load %arg1[%c0, %c0_0] : memref<32x512xbf16, #tpu.memory_space<vmem>>, vector<32x512xbf16>
    %c0_1 = arith.constant 0 : index
    %c0_2 = arith.constant 0 : index
    %1 = vector.load %arg2[%c0_1, %c0_2] : memref<512x32xbf16, #tpu.memory_space<vmem>>, vector<512x32xbf16>
    %cst = arith.constant dense<0.000000e+00> : vector<32x32xf32>
    %2 = tpu.matmul %0, %1, %cst {dimension_numbers = #tpu.dot_dimension_numbers<[1], [0], [0], [1], [0, 0, 1, 1], [], []>} : vector<32x512xbf16>, vector<512x32xbf16>, vector<32x32xf32> -> vector<32x32xf32>
    %cst_3 = arith.constant dense<0.000000e+00> : vector<32xf32>
    %3 = vector.multi_reduction <add>, %2, %cst_3 [0] : vector<32x32xf32> to vector<32xf32>
    %4 = vector.shape_cast %3 : vector<32xf32> to vector<1x32xf32>
    %cst_4 = arith.constant 3.200000e+01 : f32
    %5 = vector.broadcast %cst_4 : f32 to vector<1x32xf32>
    %6 = arith.divf %4, %5 : vector<1x32xf32>
    %7 = vector.broadcast %6 : vector<1x32xf32> to vector<32x32xf32>
    %8 = arith.subf %2, %7 : vector<32x32xf32>
    %9 = arith.mulf %8, %8 : vector<32x32xf32>
    %cst_5 = arith.constant dense<0.000000e+00> : vector<32xf32>
    %10 = vector.multi_reduction <add>, %9, %cst_5 [0] : vector<32x32xf32> to vector<32xf32>
    %11 = vector.shape_cast %10 : vector<32xf32> to vector<1x32xf32>
    %cst_6 = arith.constant 3.200000e+01 : f32
    %12 = vector.broadcast %cst_6 : f32 to vector<1x32xf32>
    %13 = arith.divf %11, %12 : vector<1x32xf32>
    %cst_7 = arith.constant 9.99999974E-6 : f32
    %14 = vector.broadcast %cst_7 : f32 to vector<1x32xf32>
    %15 = arith.addf %13, %14 : vector<1x32xf32>
    %16 = math.rsqrt %15 : vector<1x32xf32>
    %c0_8 = arith.constant 0 : index
    %c0_9 = arith.constant 0 : index
    %17 = vector.load %arg3[%c0_8, %c0_9] : memref<1x32xf32, #tpu.memory_space<vmem>>, vector<1x32xf32>
    %18 = arith.mulf %17, %16 : vector<1x32xf32>
    %c0_10 = arith.constant 0 : index
    %c0_11 = arith.constant 0 : index
    %19 = vector.load %arg4[%c0_10, %c0_11] : memref<1x32xf32, #tpu.memory_space<vmem>>, vector<1x32xf32>
    %20 = arith.mulf %6, %18 : vector<1x32xf32>
    %21 = arith.subf %19, %20 : vector<1x32xf32>
    %22 = vector.broadcast %18 : vector<1x32xf32> to vector<32x32xf32>
    %23 = arith.mulf %2, %22 : vector<32x32xf32>
    %24 = vector.broadcast %21 : vector<1x32xf32> to vector<32x32xf32>
    %25 = arith.addf %23, %24 : vector<32x32xf32>
    %cst_12 = arith.constant 0.000000e+00 : f32
    %26 = vector.broadcast %cst_12 : f32 to vector<32x32xf32>
    %27 = arith.cmpf ogt, %25, %26 : vector<32x32xf32>
    %cst_13 = arith.constant 2.000000e-01 : f32
    %28 = vector.broadcast %cst_13 : f32 to vector<32x32xf32>
    %29 = arith.mulf %28, %25 : vector<32x32xf32>
    %30 = arith.select %27, %25, %29 : vector<32x32xi1>, vector<32x32xf32>
    %31 = arith.truncf %30 : vector<32x32xf32> to vector<32x32xbf16>
    %c0_14 = arith.constant 0 : index
    %c0_15 = arith.constant 0 : index
    %32 = vector.load %arg5[%c0_14, %c0_15] : memref<32x32xbf16, #tpu.memory_space<vmem>>, vector<32x32xbf16>
    tpu.vector_store %arg5[%c0_14, %c0_15], %31 {strides = array<i32>} : memref<32x32xbf16, #tpu.memory_space<vmem>>, vector<32x32xbf16>,
    return
  }
  func.func @transform_0(%arg0: i32) -> (i32, i32) {
    %c0_i32 = arith.constant 0 : i32
    %c0_i32_0 = arith.constant 0 : i32
    %c0_i32_1 = arith.constant 0 : i32
    return %c0_i32, %c0_i32_0 : i32, i32
  }
  func.func @transform_1(%arg0: i32) -> (i32, i32) {
    %c0_i32 = arith.constant 0 : i32
    %c0_i32_0 = arith.constant 0 : i32
    %c0_i32_1 = arith.constant 0 : i32
    return %c0_i32, %c0_i32_0 : i32, i32
  }
  func.func @transform_2(%arg0: i32) -> (i32, i32) {
    %c0_i32 = arith.constant 0 : i32
    %c0_i32_0 = arith.constant 0 : i32
    %c0_i32_1 = arith.constant 0 : i32
    return %c0_i32, %c0_i32_0 : i32, i32
  }
  func.func @transform_3(%arg0: i32) -> (i32, i32) {
    %c0_i32 = arith.constant 0 : i32
    %c0_i32_0 = arith.constant 0 : i32
    %c0_i32_1 = arith.constant 0 : i32
    return %c0_i32, %c0_i32_0 : i32, i32
  }
  func.func @transform_4(%arg0: i32) -> (i32, i32) {
    %c0_i32 = arith.constant 0 : i32
    %c0_i32_0 = arith.constant 0 : i32
    %c0_i32_1 = arith.constant 0 : i32
    return %c0_i32, %c0_i32_0 : i32, i32
  }
}

module attributes {stable_mosaic.version = 11 : i64} {
  func.func @_conv_bn_leaky_head_kernel(%arg0: i32, %arg1: memref<8x512xbf16, #tpu.memory_space<vmem>>, %arg2: memref<512x32xbf16, #tpu.memory_space<vmem>>, %arg3: memref<1x32xf32, #tpu.memory_space<vmem>>, %arg4: memref<1x32xf32, #tpu.memory_space<vmem>>, %arg5: memref<8x32xf32, #tpu.memory_space<vmem>>, %arg6: memref<2x8xf32, #tpu.memory_space<vmem>>, %arg7: memref<2x1xf32, #tpu.memory_space<vmem>>) attributes {dimension_semantics = [#tpu.dimension_semantics<arbitrary>], iteration_bounds = array<i64: 1>, scalar_prefetch = 0 : i64, scratch_operands = 0 : i64, tpu.core_type = #tpu.core_type<tc>, window_params = [{pipeline_mode = #tpu.pipeline_mode<synchronous>, transform_indices = @transform_0, window_bounds = array<i64: 8, 512>}, {pipeline_mode = #tpu.pipeline_mode<synchronous>, transform_indices = @transform_1, window_bounds = array<i64: 512, 32>}, {pipeline_mode = #tpu.pipeline_mode<synchronous>, transform_indices = @transform_2, window_bounds = array<i64: 1, 32>}, {pipeline_mode = #tpu.pipeline_mode<synchronous>, transform_indices = @transform_3, window_bounds = array<i64: 1, 32>}, {pipeline_mode = #tpu.pipeline_mode<synchronous>, transform_indices = @transform_4, window_bounds = array<i64: 8, 32>}, {pipeline_mode = #tpu.pipeline_mode<synchronous>, transform_indices = @transform_5, window_bounds = array<i64: 2, 8>}, {pipeline_mode = #tpu.pipeline_mode<synchronous>, transform_indices = @transform_6, window_bounds = array<i64: 2, 1>}]} {
    %c0 = arith.constant 0 : index
    %c0_0 = arith.constant 0 : index
    %0 = vector.load %arg1[%c0, %c0_0] : memref<8x512xbf16, #tpu.memory_space<vmem>>, vector<8x512xbf16>
    %c0_1 = arith.constant 0 : index
    %c0_2 = arith.constant 0 : index
    %1 = vector.load %arg2[%c0_1, %c0_2] : memref<512x32xbf16, #tpu.memory_space<vmem>>, vector<512x32xbf16>
    %cst = arith.constant dense<0.000000e+00> : vector<8x32xf32>
    %2 = tpu.matmul %0, %1, %cst {dimension_numbers = #tpu.dot_dimension_numbers<[1], [0], [0], [1], [0, 0, 1, 1], [], []>} : vector<8x512xbf16>, vector<512x32xbf16>, vector<8x32xf32> -> vector<8x32xf32>
    %cst_3 = arith.constant dense<0.000000e+00> : vector<32xf32>
    %3 = vector.multi_reduction <add>, %2, %cst_3 [0] : vector<8x32xf32> to vector<32xf32>
    %4 = vector.shape_cast %3 : vector<32xf32> to vector<1x32xf32>
    %cst_4 = arith.constant 8.000000e+00 : f32
    %5 = vector.broadcast %cst_4 : f32 to vector<1x32xf32>
    %6 = arith.divf %4, %5 : vector<1x32xf32>
    %7 = vector.broadcast %6 : vector<1x32xf32> to vector<8x32xf32>
    %8 = arith.subf %2, %7 : vector<8x32xf32>
    %9 = arith.mulf %8, %8 : vector<8x32xf32>
    %cst_5 = arith.constant dense<0.000000e+00> : vector<32xf32>
    %10 = vector.multi_reduction <add>, %9, %cst_5 [0] : vector<8x32xf32> to vector<32xf32>
    %11 = vector.shape_cast %10 : vector<32xf32> to vector<1x32xf32>
    %cst_6 = arith.constant 8.000000e+00 : f32
    %12 = vector.broadcast %cst_6 : f32 to vector<1x32xf32>
    %13 = arith.divf %11, %12 : vector<1x32xf32>
    %cst_7 = arith.constant 9.99999974E-6 : f32
    %14 = vector.broadcast %cst_7 : f32 to vector<1x32xf32>
    %15 = arith.addf %13, %14 : vector<1x32xf32>
    %16 = math.rsqrt %15 : vector<1x32xf32>
    %c0_8 = arith.constant 0 : index
    %c0_9 = arith.constant 0 : index
    %17 = vector.load %arg3[%c0_8, %c0_9] : memref<1x32xf32, #tpu.memory_space<vmem>>, vector<1x32xf32>
    %18 = arith.mulf %17, %16 : vector<1x32xf32>
    %c0_10 = arith.constant 0 : index
    %c0_11 = arith.constant 0 : index
    %19 = vector.load %arg4[%c0_10, %c0_11] : memref<1x32xf32, #tpu.memory_space<vmem>>, vector<1x32xf32>
    %20 = arith.mulf %6, %18 : vector<1x32xf32>
    %21 = arith.subf %19, %20 : vector<1x32xf32>
    %22 = vector.broadcast %18 : vector<1x32xf32> to vector<8x32xf32>
    %23 = arith.mulf %2, %22 : vector<8x32xf32>
    %24 = vector.broadcast %21 : vector<1x32xf32> to vector<8x32xf32>
    %25 = arith.addf %23, %24 : vector<8x32xf32>
    %cst_12 = arith.constant 0.000000e+00 : f32
    %26 = vector.broadcast %cst_12 : f32 to vector<8x32xf32>
    %27 = arith.cmpf ogt, %25, %26 : vector<8x32xf32>
    %cst_13 = arith.constant 2.000000e-01 : f32
    %28 = vector.broadcast %cst_13 : f32 to vector<8x32xf32>
    %29 = arith.mulf %28, %25 : vector<8x32xf32>
    %30 = arith.select %27, %25, %29 : vector<8x32xi1>, vector<8x32xf32>
    %c0_14 = arith.constant 0 : index
    %c0_15 = arith.constant 0 : index
    %31 = vector.load %arg5[%c0_14, %c0_15] : memref<8x32xf32, #tpu.memory_space<vmem>>, vector<8x32xf32>
    %32 = arith.mulf %30, %31 : vector<8x32xf32>
    %c0_16 = arith.constant 0 : index
    %c0_17 = arith.constant 0 : index
    %33 = vector.load %arg6[%c0_16, %c0_17] : memref<2x8xf32, #tpu.memory_space<vmem>>, vector<2x8xf32>
    %cst_18 = arith.constant dense<0.000000e+00> : vector<2x32xf32>
    %34 = tpu.matmul %33, %32, %cst_18 {dimension_numbers = #tpu.dot_dimension_numbers<[1], [0], [0], [1], [0, 0, 1, 1], [], []>} : vector<2x8xf32>, vector<8x32xf32>, vector<2x32xf32> -> vector<2x32xf32>
    %cst_19 = arith.constant dense<0.000000e+00> : vector<2xf32>
    %35 = vector.multi_reduction <add>, %34, %cst_19 [1] : vector<2x32xf32> to vector<2xf32>
    %36 = vector.shape_cast %35 : vector<2xf32> to vector<2x1xf32>
    %37 = arith.negf %36 : vector<2x1xf32>
    %38 = math.exp %37 : vector<2x1xf32>
    %cst_20 = arith.constant 1.000000e+00 : f32
    %39 = vector.broadcast %cst_20 : f32 to vector<2x1xf32>
    %40 = arith.addf %39, %38 : vector<2x1xf32>
    %41 = arith.divf %39, %40 : vector<2x1xf32>
    %c0_21 = arith.constant 0 : index
    %c0_22 = arith.constant 0 : index
    %42 = vector.load %arg7[%c0_21, %c0_22] : memref<2x1xf32, #tpu.memory_space<vmem>>, vector<2x1xf32>
    tpu.vector_store %arg7[%c0_21, %c0_22], %41 {strides = array<i32>} : memref<2x1xf32, #tpu.memory_space<vmem>>, vector<2x1xf32>,
    return
  }
  func.func @transform_0(%arg0: i32) -> (i32, i32) {
    %c0_i32 = arith.constant 0 : i32
    %c0_i32_0 = arith.constant 0 : i32
    %c0_i32_1 = arith.constant 0 : i32
    return %c0_i32, %c0_i32_0 : i32, i32
  }
  func.func @transform_1(%arg0: i32) -> (i32, i32) {
    %c0_i32 = arith.constant 0 : i32
    %c0_i32_0 = arith.constant 0 : i32
    %c0_i32_1 = arith.constant 0 : i32
    return %c0_i32, %c0_i32_0 : i32, i32
  }
  func.func @transform_2(%arg0: i32) -> (i32, i32) {
    %c0_i32 = arith.constant 0 : i32
    %c0_i32_0 = arith.constant 0 : i32
    %c0_i32_1 = arith.constant 0 : i32
    return %c0_i32, %c0_i32_0 : i32, i32
  }
  func.func @transform_3(%arg0: i32) -> (i32, i32) {
    %c0_i32 = arith.constant 0 : i32
    %c0_i32_0 = arith.constant 0 : i32
    %c0_i32_1 = arith.constant 0 : i32
    return %c0_i32, %c0_i32_0 : i32, i32
  }
  func.func @transform_4(%arg0: i32) -> (i32, i32) {
    %c0_i32 = arith.constant 0 : i32
    %c0_i32_0 = arith.constant 0 : i32
    %c0_i32_1 = arith.constant 0 : i32
    return %c0_i32, %c0_i32_0 : i32, i32
  }
  func.func @transform_5(%arg0: i32) -> (i32, i32) {
    %c0_i32 = arith.constant 0 : i32
    %c0_i32_0 = arith.constant 0 : i32
    %c0_i32_1 = arith.constant 0 : i32
    return %c0_i32, %c0_i32_0 : i32, i32
  }
  func.func @transform_6(%arg0: i32) -> (i32, i32) {
    %c0_i32 = arith.constant 0 : i32
    %c0_i32_0 = arith.constant 0 : i32
    %c0_i32_1 = arith.constant 0 : i32
    return %c0_i32, %c0_i32_0 : i32, i32
  }
}

</mosaic_0001>

<bundles_post_ra>
// kernel: discriminator_forward.5
= control target key start
LH: loop header
LB: loop body
LE: loop exit
PB: predicated region body
PF: predicated region fallthrough
CT: control target
= control target key end

     0   :  { %s1297_s9 = smov 0   ;;  %s1526_s0 = inlined_call_operand.vmem [shape: bf16[2048,48], index: 0, kind: input, shape index: {}]   ;;  %s1527_s1 = inlined_call_operand.vmem [shape: bf16[48,32], index: 1, kind: input, shape index: {}]   ;;  %s1528_s2 = inlined_call_operand.vmem [shape: bf16[2048,32], index: 2, kind: output, shape index: {}]  }
   0x1 LB: > { %s1039_s10 = sadd.s32 4294967295, %s1280_s9   ;;  %p1043_p0 = scmp.ge.s32.totalorder %s1280_s9, 1  ;;  %s1280_s9 = sphi %s1297_s9, %s12_s9  }
   0x2   : > { %p113_p1 = scmp.lt.s32.totalorder %s1280_s9, 5 }
   0x4   : > { %p114_p2 = pnand %p1043_p0, %p113_p1 }
   0x5   : > { %s1044_s13 = sshll.u32 (!%p114_p2), %s1039_s10, 6 }
   0x6   : > { %117 = sbr.rel (%p114_p2) target bundleno = 283 (0x11b), region = 28  ;;  %p136_p3 = scmp.lt.s32.totalorder (!%p114_p2), %s1044_s13, 255 }
   0xb   : > { %v1256_v0 = vld [vmem:[%s1527_s1 + $0x10] sm:$0xff]  ;;  %v1255_v1 = vld [vmem:[%s1527_s1 + $0x8] sm:$0xff]  ;;  %s1530_s13 = smov (!%p136_p3, %s1044_s13), 255  ;;  %v1254_v2 = vld [vmem:[%s1527_s1] sm:$0xff]  ;;  %vm396_vm0 = vcmask 392192   ;;  %vm918_vm3 = vcmask 257024  }
   0xc   : > { %498 = vmatpush.bf16.msra.mxu0 %v1256_v0  ;;  %1257 = vmatpush.bf16.msra.mxu1 %v1256_v0  ;;  %s1045_s16 = sshll.u32 %s1530_s13, 2 }
   0xd   : > { %1258 = vmatpush.bf16.msra.mxu2 %v1256_v0  ;;  %1259 = vmatpush.bf16.msra.mxu3 %v1256_v0  ;;  %s1322_s21 = scalar_lea.vmem %s1526_s0, %s1045_s16  ;;  %s1393_s24 = scalar_lea.vmem %s1528_s2, %s1045_s16 }
   0xe   : > { %v1222_v3 = vld [vmem:[%s1322_s21] sm:$0xff]  ;;  %v1223_v7 = vld [vmem:[%s1322_s21 + $0x8] sm:$0xff]  ;;  %v1224_v11 = vld [vmem:[%s1322_s21 + $0x10] sm:$0xff] }
   0xf   : > { %v1230_v4 = vld [vmem:[%s1322_s21 + $0x40] sm:$0xff]  ;;  %v1231_v8 = vld [vmem:[%s1322_s21 + $0x48] sm:$0xff]  ;;  %v1232_v12 = vld [vmem:[%s1322_s21 + $0x50] sm:$0xff] }
  0x10   : > { %499 = vmatpush.bf16.msra.mxu0 %v1255_v1  ;;  %1260 = vmatpush.bf16.msra.mxu1 %v1255_v1  ;;  %v1238_v5 = vld [vmem:[%s1322_s21 + $0x80] sm:$0xff]  ;;  %v1239_v9 = vld [vmem:[%s1322_s21 + $0x88] sm:$0xff]  ;;  %v1240_v13 = vld [vmem:[%s1322_s21 + $0x90] sm:$0xff] }
  0x11   : > { %1261 = vmatpush.bf16.msra.mxu2 %v1255_v1  ;;  %1262 = vmatpush.bf16.msra.mxu3 %v1255_v1  ;;  %v1246_v6 = vld [vmem:[%s1322_s21 + $0xc0] sm:$0xff]  ;;  %v1247_v10 = vld [vmem:[%s1322_s21 + $0xc8] sm:$0xff]  ;;  %v1248_v14 = vld [vmem:[%s1322_s21 + $0xd0] sm:$0xff] }
  0x12   : > { %v1225_v15 = vld [vmem:[%s1322_s21 + $0x18] sm:$0xff]  ;;  %v1226_v19 = vld [vmem:[%s1322_s21 + $0x20] sm:$0xff]  ;;  %v1227_v23 = vld [vmem:[%s1322_s21 + $0x28] sm:$0xff] }
  0x13   : > { %v1233_v16 = vld [vmem:[%s1322_s21 + $0x58] sm:$0xff]  ;;  %v1234_v20 = vld [vmem:[%s1322_s21 + $0x60] sm:$0xff]  ;;  %v1235_v24 = vld [vmem:[%s1322_s21 + $0x68] sm:$0xff] }
  0x14   : > { %500 = vmatpush.bf16.msra.mxu0 %v1254_v2  ;;  %1263 = vmatpush.bf16.msra.mxu1 %v1254_v2  ;;  %v1241_v17 = vld [vmem:[%s1322_s21 + $0x98] sm:$0xff]  ;;  %v1242_v21 = vld [vmem:[%s1322_s21 + $0xa0] sm:$0xff]  ;;  %v1243_v25 = vld [vmem:[%s1322_s21 + $0xa8] sm:$0xff] }
  0x15   : > { %1264 = vmatpush.bf16.msra.mxu2 %v1254_v2  ;;  %1265 = vmatpush.bf16.msra.mxu3 %v1254_v2  ;;  %v1249_v18 = vld [vmem:[%s1322_s21 + $0xd8] sm:$0xff]  ;;  %v1250_v22 = vld [vmem:[%s1322_s21 + $0xe0] sm:$0xff]  ;;  %v1251_v26 = vld [vmem:[%s1322_s21 + $0xe8] sm:$0xff] }
  0x16   : > { %v1228_v27 = vld [vmem:[%s1322_s21 + $0x30] sm:$0xff]  ;;  %v1229_v31 = vld [vmem:[%s1322_s21 + $0x38] sm:$0xff] }
  0x17   : > { %1188 = vmatmul.msk.bf16.vlgmr.msra.gmra.mxu0 %vm396_vm0, %v1222_v3  ;;  %1196 = vmatmul.msk.bf16.vlgmr.msra.gmra.mxu1 %vm396_vm0, %v1230_v4  ;;  %v1236_v28 = vld [vmem:[%s1322_s21 + $0x70] sm:$0xff]  ;;  %v1237_v32 = vld [vmem:[%s1322_s21 + $0x78] sm:$0xff] }
  0x18   : > { %1204 = vmatmul.msk.bf16.vlgmr.msra.gmra.mxu2 %vm396_vm0, %v1238_v5  ;;  %1212 = vmatmul.msk.bf16.vlgmr.msra.gmra.mxu3 %vm396_vm0, %v1246_v6  ;;  %v1244_v29 = vld [vmem:[%s1322_s21 + $0xb0] sm:$0xff]  ;;  %v1245_v33 = vld [vmem:[%s1322_s21 + $0xb8] sm:$0xff] }
  0x19   : > { %v1252_v30 = vld [vmem:[%s1322_s21 + $0xf0] sm:$0xff]  ;;  %v1253_v34 = vld [vmem:[%s1322_s21 + $0xf8] sm:$0xff] }
  0x27   : > { %1189 = vmatmul.msk.bf16.gmra.mxu0 %vm396_vm0, %v1223_v7  ;;  %1197 = vmatmul.msk.bf16.gmra.mxu1 %vm396_vm0, %v1231_v8 }
  0x28   : > { %1205 = vmatmul.msk.bf16.gmra.mxu2 %vm396_vm0, %v1239_v9  ;;  %1213 = vmatmul.msk.bf16.gmra.mxu3 %vm396_vm0, %v1247_v10 }
  0x37   : > { %1190 = vmatmul.msk.bf16.gmra.mxu0 %vm396_vm0, %v1224_v11  ;;  %1198 = vmatmul.msk.bf16.gmra.mxu1 %vm396_vm0, %v1232_v12 }
  0x38   : > { %1206 = vmatmul.msk.bf16.gmra.mxu2 %vm396_vm0, %v1240_v13  ;;  %1214 = vmatmul.msk.bf16.gmra.mxu3 %vm396_vm0, %v1248_v14 }
  0x47   : > { %1191 = vmatmul.msk.bf16.gmra.mxu0 %vm396_vm0, %v1225_v15  ;;  %1199 = vmatmul.msk.bf16.gmra.mxu1 %vm396_vm0, %v1233_v16 }
  0x48   : > { %1207 = vmatmul.msk.bf16.gmra.mxu2 %vm396_vm0, %v1241_v17  ;;  %1215 = vmatmul.msk.bf16.gmra.mxu3 %vm396_vm0, %v1249_v18 }
  0x57   : > { %1192 = vmatmul.msk.bf16.gmra.mxu0 %vm396_vm0, %v1226_v19  ;;  %1200 = vmatmul.msk.bf16.gmra.mxu1 %vm396_vm0, %v1234_v20 }
  0x58   : > { %1208 = vmatmul.msk.bf16.gmra.mxu2 %vm396_vm0, %v1242_v21  ;;  %1216 = vmatmul.msk.bf16.gmra.mxu3 %vm396_vm0, %v1250_v22 }
  0x67   : > { %1193 = vmatmul.msk.bf16.gmra.mxu0 %vm396_vm0, %v1227_v23  ;;  %1201 = vmatmul.msk.bf16.gmra.mxu1 %vm396_vm0, %v1235_v24 }
  0x68   : > { %1209 = vmatmul.msk.bf16.gmra.mxu2 %vm396_vm0, %v1243_v25  ;;  %1217 = vmatmul.msk.bf16.gmra.mxu3 %vm396_vm0, %v1251_v26 }
  0x77   : > { %1194 = vmatmul.msk.bf16.gmra.mxu0 %vm396_vm0, %v1228_v27  ;;  %1202 = vmatmul.msk.bf16.gmra.mxu1 %vm396_vm0, %v1236_v28 }
  0x78   : > { %1210 = vmatmul.msk.bf16.gmra.mxu2 %vm396_vm0, %v1244_v29  ;;  %1218 = vmatmul.msk.bf16.gmra.mxu3 %vm396_vm0, %v1252_v30 }
  0x87   : > { %1195 = vmatmul.msk.bf16.gmra.mxu0 %vm396_vm0, %v1229_v31  ;;  %1203 = vmatmul.msk.bf16.gmra.mxu1 %vm396_vm0, %v1237_v32 }
  0x88   : > { %1211 = vmatmul.msk.bf16.gmra.mxu2 %vm396_vm0, %v1245_v33  ;;  %1219 = vmatmul.msk.bf16.gmra.mxu3 %vm396_vm0, %v1253_v34 }
  0x94   : > { %v502_v35 = vpop.f32.mrf.mxu0  ;;  %v542_v36 = vpop.f32.mrf.mxu1 }
  0x95   : > { %vm662_vm1 = vcmp.gt.f32.partialorder %v502_v35, 0.0  ;;  %v726_v37 = vmul.f32 0.2, %v502_v35  ;;  %vm678_vm2 = vcmp.gt.f32.partialorder %v542_v36, 0.0  ;;  %v742_v38 = vmul.f32 0.2, %v542_v36 }
  0x97   : > { %v790_v39 = vsel %vm662_vm1, %v502_v35, %v726_v37  ;;  %v806_v40 = vsel %vm678_vm2, %v542_v36, %v742_v38 }
  0x98   : > { %v854_v41 = vpack.c.bf16 %v790_v39, %v790_v39  ;;  %v870_v42 = vpack.c.bf16 %v806_v40, %v806_v40 }
  0x9a   : > { %919 = vst.msk [vmem:[%s1393_s24] sm:$0xf] %vm918_vm3, %v854_v41 }
  0x9b   : > { %935 = vst.msk [vmem:[%s1393_s24 + $0x40] sm:$0xf] %vm918_vm3, %v870_v42  ;;  %v582_v43 = vpop.f32.mrf.mxu2  ;;  %v622_v44 = vpop.f32.mrf.mxu3 }
  0x9c   : > { %vm694_vm4 = vcmp.gt.f32.partialorder %v582_v43, 0.0  ;;  %v758_v45 = vmul.f32 0.2, %v582_v43  ;;  %vm710_vm5 = vcmp.gt.f32.partialorder %v622_v44, 0.0  ;;  %v774_v46 = vmul.f32 0.2, %v622_v44  ;;  %v504_v47 = vpop.f32.mrf.mxu0  ;;  %v544_v48 = vpop.f32.mrf.mxu1 }
  0x9d   : > { %vm663_vm6 = vcmp.gt.f32.partialorder %v504_v47, 0.0  ;;  %v727_v49 = vmul.f32 0.2, %v504_v47  ;;  %vm679_vm7 = vcmp.gt.f32.partialorder %v544_v48, 0.0  ;;  %v743_v50 = vmul.f32 0.2, %v544_v48 }
  0x9e   : > { %v822_v51 = vsel %vm694_vm4, %v582_v43, %v758_v45  ;;  %v838_v52 = vsel %vm710_vm5, %v622_v44, %v774_v46 }
  0x9f   : > { %v886_v53 = vpack.c.bf16 %v822_v51, %v822_v51  ;;  %v902_v54 = vpack.c.bf16 %v838_v52, %v838_v52  ;;  %v791_v55 = vsel %vm663_vm6, %v504_v47, %v727_v49  ;;  %v807_v56 = vsel %vm679_vm7, %v544_v48, %v743_v50 }
  0xa0   : > { %v855_v57 = vpack.c.bf16 %v791_v55, %v791_v55  ;;  %v871_v58 = vpack.c.bf16 %v807_v56, %v807_v56 }
  0xa1   : > { %951 = vst.msk [vmem:[%s1393_s24 + $0x80] sm:$0xf] %vm918_vm3, %v886_v53 }
  0xa2   : > { %967 = vst.msk [vmem:[%s1393_s24 + $0xc0] sm:$0xf] %vm918_vm3, %v902_v54 }
  0xa3   : > { %920 = vst.msk [vmem:[%s1393_s24 + $0x4] sm:$0xf] %vm918_vm3, %v855_v57  ;;  %v584_v59 = vpop.f32.mrf.mxu2  ;;  %v624_v60 = vpop.f32.mrf.mxu3 }
  0xa4   : > { %936 = vst.msk [vmem:[%s1393_s24 + $0x44] sm:$0xf] %vm918_vm3, %v871_v58  ;;  %vm695_vm8 = vcmp.gt.f32.partialorder %v584_v59, 0.0  ;;  %v759_v61 = vmul.f32 0.2, %v584_v59  ;;  %vm711_vm9 = vcmp.gt.f32.partialorder %v624_v60, 0.0  ;;  %v507_v62 = vpop.f32.mrf.mxu0  ;;  %v547_v63 = vpop.f32.mrf.mxu1 }
  0xa5   : > { %v775_v0 = vmul.f32 0.2, %v624_v60  ;;  %vm664_vm10 = vcmp.gt.f32.partialorder %v507_v62, 0.0  ;;  %v728_v1 = vmul.f32 0.2, %v507_v62  ;;  %vm680_vm11 = vcmp.gt.f32.partialorder %v547_v63, 0.0 }
  0xa6   : > { %v823_v2 = vsel %vm695_vm8, %v584_v59, %v759_v61  ;;  %v744_v3 = vmul.f32 0.2, %v547_v63 }
  0xa7   : > { %v887_v4 = vpack.c.bf16 %v823_v2, %v823_v2  ;;  %v839_v5 = vsel %vm711_vm9, %v624_v60, %v775_v0  ;;  %v792_v6 = vsel %vm664_vm10, %v507_v62, %v728_v1 }
  0xa8   : > { %v903_v7 = vpack.c.bf16 %v839_v5, %v839_v5  ;;  %v856_v8 = vpack.c.bf16 %v792_v6, %v792_v6  ;;  %v808_v9 = vsel %vm680_vm11, %v547_v63, %v744_v3 }
  0xa9   : > { %952 = vst.msk [vmem:[%s1393_s24 + $0x84] sm:$0xf] %vm918_vm3, %v887_v4  ;;  %v872_v10 = vpack.c.bf16 %v808_v9, %v808_v9 }
  0xaa   : > { %968 = vst.msk [vmem:[%s1393_s24 + $0xc4] sm:$0xf] %vm918_vm3, %v903_v7 }
  0xab   : > { %921 = vst.msk [vmem:[%s1393_s24 + $0x8] sm:$0xf] %vm918_vm3, %v856_v8  ;;  %v587_v11 = vpop.f32.mrf.mxu2  ;;  %v627_v12 = vpop.f32.mrf.mxu3 }
  0xac   : > { %937 = vst.msk [vmem:[%s1393_s24 + $0x48] sm:$0xf] %vm918_vm3, %v872_v10  ;;  %vm696_vm12 = vcmp.gt.f32.partialorder %v587_v11, 0.0  ;;  %v760_v13 = vmul.f32 0.2, %v587_v11  ;;  %vm712_vm13 = vcmp.gt.f32.partialorder %v627_v12, 0.0  ;;  %v509_v14 = vpop.f32.mrf.mxu0  ;;  %v549_v15 = vpop.f32.mrf.mxu1 }
  0xad   : > { %v776_v16 = vmul.f32 0.2, %v627_v12  ;;  %vm665_vm14 = vcmp.gt.f32.partialorder %v509_v14, 0.0  ;;  %v729_v17 = vmul.f32 0.2, %v509_v14  ;;  %vm681_vm15 = vcmp.gt.f32.partialorder %v549_v15, 0.0 }
  0xae   : > { %v824_v18 = vsel %vm696_vm12, %v587_v11, %v760_v13  ;;  %v745_v19 = vmul.f32 0.2, %v549_v15 }
  0xaf   : > { %v888_v20 = vpack.c.bf16 %v824_v18, %v824_v18  ;;  %v840_v21 = vsel %vm712_vm13, %v627_v12, %v776_v16  ;;  %v793_v22 = vsel %vm665_vm14, %v509_v14, %v729_v17 }
  0xb0   : > { %v904_v23 = vpack.c.bf16 %v840_v21, %v840_v21  ;;  %v857_v24 = vpack.c.bf16 %v793_v22, %v793_v22  ;;  %v809_v25 = vsel %vm681_vm15, %v549_v15, %v745_v19 }
  0xb1   : > { %953 = vst.msk [vmem:[%s1393_s24 + $0x88] sm:$0xf] %vm918_vm3, %v888_v20  ;;  %v873_v26 = vpack.c.bf16 %v809_v25, %v809_v25 }
  0xb2   : > { %969 = vst.msk [vmem:[%s1393_s24 + $0xc8] sm:$0xf] %vm918_vm3, %v904_v23 }
  0xb3   : > { %922 = vst.msk [vmem:[%s1393_s24 + $0xc] sm:$0xf] %vm918_vm3, %v857_v24  ;;  %v589_v27 = vpop.f32.mrf.mxu2  ;;  %v629_v28 = vpop.f32.mrf.mxu3 }
  0xb4   : > { %938 = vst.msk [vmem:[%s1393_s24 + $0x4c] sm:$0xf] %vm918_vm3, %v873_v26  ;;  %vm697_vm0 = vcmp.gt.f32.partialorder %v589_v27, 0.0  ;;  %v761_v29 = vmul.f32 0.2, %v589_v27  ;;  %vm713_vm1 = vcmp.gt.f32.partialorder %v629_v28, 0.0  ;;  %v512_v30 = vpop.f32.mrf.mxu0  ;;  %v552_v31 = vpop.f32.mrf.mxu1 }
  0xb5   : > { %v777_v32 = vmul.f32 0.2, %v629_v28  ;;  %vm666_vm2 = vcmp.gt.f32.partialorder %v512_v30, 0.0  ;;  %v730_v33 = vmul.f32 0.2, %v512_v30  ;;  %vm682_vm4 = vcmp.gt.f32.partialorder %v552_v31, 0.0 }
  0xb6   : > { %v825_v34 = vsel %vm697_vm0, %v589_v27, %v761_v29  ;;  %v746_v35 = vmul.f32 0.2, %v552_v31 }
  0xb7   : > { %v889_v36 = vpack.c.bf16 %v825_v34, %v825_v34  ;;  %v841_v37 = vsel %vm713_vm1, %v629_v28, %v777_v32  ;;  %v794_v38 = vsel %vm666_vm2, %v512_v30, %v730_v33 }
  0xb8   : > { %v905_v39 = vpack.c.bf16 %v841_v37, %v841_v37  ;;  %v858_v40 = vpack.c.bf16 %v794_v38, %v794_v38  ;;  %v810_v41 = vsel %vm682_vm4, %v552_v31, %v746_v35 }
  0xb9   : > { %954 = vst.msk [vmem:[%s1393_s24 + $0x8c] sm:$0xf] %vm918_vm3, %v889_v36  ;;  %v874_v42 = vpack.c.bf16 %v810_v41, %v810_v41 }
  0xba   : > { %970 = vst.msk [vmem:[%s1393_s24 + $0xcc] sm:$0xf] %vm918_vm3, %v905_v39 }
  0xbb   : > { %923 = vst.msk [vmem:[%s1393_s24 + $0x10] sm:$0xf] %vm918_vm3, %v858_v40  ;;  %v592_v43 = vpop.f32.mrf.mxu2  ;;  %v632_v44 = vpop.f32.mrf.mxu3 }
  0xbc   : > { %939 = vst.msk [vmem:[%s1393_s24 + $0x50] sm:$0xf] %vm918_vm3, %v874_v42  ;;  %vm698_vm5 = vcmp.gt.f32.partialorder %v592_v43, 0.0  ;;  %v762_v45 = vmul.f32 0.2, %v592_v43  ;;  %vm714_vm6 = vcmp.gt.f32.partialorder %v632_v44, 0.0  ;;  %v514_v46 = vpop.f32.mrf.mxu0  ;;  %v554_v47 = vpop.f32.mrf.mxu1 }
  0xbd   : > { %v778_v48 = vmul.f32 0.2, %v632_v44  ;;  %vm667_vm7 = vcmp.gt.f32.partialorder %v514_v46, 0.0  ;;  %v731_v49 = vmul.f32 0.2, %v514_v46  ;;  %vm683_vm8 = vcmp.gt.f32.partialorder %v554_v47, 0.0 }
  0xbe   : > { %v826_v50 = vsel %vm698_vm5, %v592_v43, %v762_v45  ;;  %v747_v51 = vmul.f32 0.2, %v554_v47 }
  0xbf   : > { %v890_v52 = vpack.c.bf16 %v826_v50, %v826_v50  ;;  %v842_v53 = vsel %vm714_vm6, %v632_v44, %v778_v48  ;;  %v795_v54 = vsel %vm667_vm7, %v514_v46, %v731_v49 }
  0xc0   : > { %v906_v55 = vpack.c.bf16 %v842_v53, %v842_v53  ;;  %v859_v56 = vpack.c.bf16 %v795_v54, %v795_v54  ;;  %v811_v57 = vsel %vm683_vm8, %v554_v47, %v747_v51 }
  0xc1   : > { %955 = vst.msk [vmem:[%s1393_s24 + $0x90] sm:$0xf] %vm918_vm3, %v890_v52  ;;  %v875_v58 = vpack.c.bf16 %v811_v57, %v811_v57 }
  0xc2   : > { %971 = vst.msk [vmem:[%s1393_s24 + $0xd0] sm:$0xf] %vm918_vm3, %v906_v55 }
  0xc3   : > { %924 = vst.msk [vmem:[%s1393_s24 + $0x14] sm:$0xf] %vm918_vm3, %v859_v56  ;;  %v594_v59 = vpop.f32.mrf.mxu2  ;;  %v634_v60 = vpop.f32.mrf.mxu3 }
  0xc4   : > { %940 = vst.msk [vmem:[%s1393_s24 + $0x54] sm:$0xf] %vm918_vm3, %v875_v58  ;;  %vm699_vm9 = vcmp.gt.f32.partialorder %v594_v59, 0.0  ;;  %v763_v61 = vmul.f32 0.2, %v594_v59  ;;  %vm715_vm10 = vcmp.gt.f32.partialorder %v634_v60, 0.0  ;;  %v517_v62 = vpop.f32.mrf.mxu0  ;;  %v557_v63 = vpop.f32.mrf.mxu1 }
  0xc5   : > { %v779_v0 = vmul.f32 0.2, %v634_v60  ;;  %vm668_vm11 = vcmp.gt.f32.partialorder %v517_v62, 0.0  ;;  %v732_v1 = vmul.f32 0.2, %v517_v62  ;;  %vm684_vm12 = vcmp.gt.f32.partialorder %v557_v63, 0.0 }
  0xc6   : > { %v827_v2 = vsel %vm699_vm9, %v594_v59, %v763_v61  ;;  %v748_v3 = vmul.f32 0.2, %v557_v63 }
  0xc7   : > { %v891_v4 = vpack.c.bf16 %v827_v2, %v827_v2  ;;  %v843_v5 = vsel %vm715_vm10, %v634_v60, %v779_v0  ;;  %v796_v6 = vsel %vm668_vm11, %v517_v62, %v732_v1 }
  0xc8   : > { %v907_v7 = vpack.c.bf16 %v843_v5, %v843_v5  ;;  %v860_v8 = vpack.c.bf16 %v796_v6, %v796_v6  ;;  %v812_v9 = vsel %vm684_vm12, %v557_v63, %v748_v3 }
  0xc9   : > { %956 = vst.msk [vmem:[%s1393_s24 + $0x94] sm:$0xf] %vm918_vm3, %v891_v4  ;;  %v876_v10 = vpack.c.bf16 %v812_v9, %v812_v9 }
  0xca   : > { %972 = vst.msk [vmem:[%s1393_s24 + $0xd4] sm:$0xf] %vm918_vm3, %v907_v7 }
  0xcb   : > { %925 = vst.msk [vmem:[%s1393_s24 + $0x18] sm:$0xf] %vm918_vm3, %v860_v8  ;;  %v597_v11 = vpop.f32.mrf.mxu2  ;;  %v637_v12 = vpop.f32.mrf.mxu3 }
  0xcc   : > { %941 = vst.msk [vmem:[%s1393_s24 + $0x58] sm:$0xf] %vm918_vm3, %v876_v10  ;;  %vm700_vm13 = vcmp.gt.f32.partialorder %v597_v11, 0.0  ;;  %v764_v13 = vmul.f32 0.2, %v597_v11  ;;  %vm716_vm14 = vcmp.gt.f32.partialorder %v637_v12, 0.0  ;;  %v519_v14 = vpop.f32.mrf.mxu0  ;;  %v559_v15 = vpop.f32.mrf.mxu1 }
  0xcd   : > { %v780_v16 = vmul.f32 0.2, %v637_v12  ;;  %vm669_vm15 = vcmp.gt.f32.partialorder %v519_v14, 0.0  ;;  %v733_v17 = vmul.f32 0.2, %v519_v14  ;;  %vm685_vm0 = vcmp.gt.f32.partialorder %v559_v15, 0.0 }
  0xce   : > { %v828_v18 = vsel %vm700_vm13, %v597_v11, %v764_v13  ;;  %v749_v19 = vmul.f32 0.2, %v559_v15 }
  0xcf   : > { %v892_v20 = vpack.c.bf16 %v828_v18, %v828_v18  ;;  %v844_v21 = vsel %vm716_vm14, %v637_v12, %v780_v16  ;;  %v797_v22 = vsel %vm669_vm15, %v519_v14, %v733_v17 }
  0xd0   : > { %v908_v23 = vpack.c.bf16 %v844_v21, %v844_v21  ;;  %v861_v24 = vpack.c.bf16 %v797_v22, %v797_v22  ;;  %v813_v25 = vsel %vm685_vm0, %v559_v15, %v749_v19 }
  0xd1   : > { %957 = vst.msk [vmem:[%s1393_s24 + $0x98] sm:$0xf] %vm918_vm3, %v892_v20  ;;  %v877_v26 = vpack.c.bf16 %v813_v25, %v813_v25 }
  0xd2   : > { %973 = vst.msk [vmem:[%s1393_s24 + $0xd8] sm:$0xf] %vm918_vm3, %v908_v23 }
  0xd3   : > { %926 = vst.msk [vmem:[%s1393_s24 + $0x1c] sm:$0xf] %vm918_vm3, %v861_v24  ;;  %v599_v27 = vpop.f32.mrf.mxu2  ;;  %v639_v28 = vpop.f32.mrf.mxu3 }
  0xd4   : > { %942 = vst.msk [vmem:[%s1393_s24 + $0x5c] sm:$0xf] %vm918_vm3, %v877_v26  ;;  %vm701_vm1 = vcmp.gt.f32.partialorder %v599_v27, 0.0  ;;  %v765_v29 = vmul.f32 0.2, %v599_v27  ;;  %vm717_vm2 = vcmp.gt.f32.partialorder %v639_v28, 0.0  ;;  %v522_v30 = vpop.f32.mrf.mxu0  ;;  %v562_v31 = vpop.f32.mrf.mxu1 }
  0xd5   : > { %v781_v32 = vmul.f32 0.2, %v639_v28  ;;  %vm670_vm4 = vcmp.gt.f32.partialorder %v522_v30, 0.0  ;;  %v734_v33 = vmul.f32 0.2, %v522_v30  ;;  %vm686_vm5 = vcmp.gt.f32.partialorder %v562_v31, 0.0 }
  0xd6   : > { %v829_v34 = vsel %vm701_vm1, %v599_v27, %v765_v29  ;;  %v750_v35 = vmul.f32 0.2, %v562_v31 }
  0xd7   : > { %v893_v36 = vpack.c.bf16 %v829_v34, %v829_v34  ;;  %v845_v37 = vsel %vm717_vm2, %v639_v28, %v781_v32  ;;  %v798_v38 = vsel %vm670_vm4, %v522_v30, %v734_v33 }
  0xd8   : > { %v909_v39 = vpack.c.bf16 %v845_v37, %v845_v37  ;;  %v862_v40 = vpack.c.bf16 %v798_v38, %v798_v38  ;;  %v814_v41 = vsel %vm686_vm5, %v562_v31, %v750_v35 }
  0xd9   : > { %958 = vst.msk [vmem:[%s1393_s24 + $0x9c] sm:$0xf] %vm918_vm3, %v893_v36  ;;  %v878_v42 = vpack.c.bf16 %v814_v41, %v814_v41 }
  0xda   : > { %974 = vst.msk [vmem:[%s1393_s24 + $0xdc] sm:$0xf] %vm918_vm3, %v909_v39 }
  0xdb   : > { %927 = vst.msk [vmem:[%s1393_s24 + $0x20] sm:$0xf] %vm918_vm3, %v862_v40  ;;  %v602_v43 = vpop.f32.mrf.mxu2  ;;  %v642_v44 = vpop.f32.mrf.mxu3 }
  0xdc   : > { %943 = vst.msk [vmem:[%s1393_s24 + $0x60] sm:$0xf] %vm918_vm3, %v878_v42  ;;  %vm702_vm6 = vcmp.gt.f32.partialorder %v602_v43, 0.0  ;;  %v766_v45 = vmul.f32 0.2, %v602_v43  ;;  %vm718_vm7 = vcmp.gt.f32.partialorder %v642_v44, 0.0  ;;  %v524_v46 = vpop.f32.mrf.mxu0  ;;  %v564_v47 = vpop.f32.mrf.mxu1 }
  0xdd   : > { %v782_v48 = vmul.f32 0.2, %v642_v44  ;;  %vm671_vm8 = vcmp.gt.f32.partialorder %v524_v46, 0.0  ;;  %v735_v49 = vmul.f32 0.2, %v524_v46  ;;  %vm687_vm9 = vcmp.gt.f32.partialorder %v564_v47, 0.0 }
  0xde   : > { %v830_v50 = vsel %vm702_vm6, %v602_v43, %v766_v45  ;;  %v751_v51 = vmul.f32 0.2, %v564_v47 }
  0xdf   : > { %v894_v52 = vpack.c.bf16 %v830_v50, %v830_v50  ;;  %v846_v53 = vsel %vm718_vm7, %v642_v44, %v782_v48  ;;  %v799_v54 = vsel %vm671_vm8, %v524_v46, %v735_v49 }
  0xe0   : > { %v910_v55 = vpack.c.bf16 %v846_v53, %v846_v53  ;;  %v863_v56 = vpack.c.bf16 %v799_v54, %v799_v54  ;;  %v815_v57 = vsel %vm687_vm9, %v564_v47, %v751_v51 }
  0xe1   : > { %959 = vst.msk [vmem:[%s1393_s24 + $0xa0] sm:$0xf] %vm918_vm3, %v894_v52  ;;  %v879_v58 = vpack.c.bf16 %v815_v57, %v815_v57 }
  0xe2   : > { %975 = vst.msk [vmem:[%s1393_s24 + $0xe0] sm:$0xf] %vm918_vm3, %v910_v55 }
  0xe3   : > { %928 = vst.msk [vmem:[%s1393_s24 + $0x24] sm:$0xf] %vm918_vm3, %v863_v56  ;;  %v604_v59 = vpop.f32.mrf.mxu2  ;;  %v644_v60 = vpop.f32.mrf.mxu3 }
  0xe4   : > { %944 = vst.msk [vmem:[%s1393_s24 + $0x64] sm:$0xf] %vm918_vm3, %v879_v58  ;;  %vm703_vm10 = vcmp.gt.f32.partialorder %v604_v59, 0.0  ;;  %v767_v61 = vmul.f32 0.2, %v604_v59  ;;  %vm719_vm11 = vcmp.gt.f32.partialorder %v644_v60, 0.0  ;;  %v527_v62 = vpop.f32.mrf.mxu0  ;;  %v567_v63 = vpop.f32.mrf.mxu1 }
  0xe5   : > { %v783_v0 = vmul.f32 0.2, %v644_v60  ;;  %vm672_vm12 = vcmp.gt.f32.partialorder %v527_v62, 0.0  ;;  %v736_v1 = vmul.f32 0.2, %v527_v62  ;;  %vm688_vm13 = vcmp.gt.f32.partialorder %v567_v63, 0.0 }
  0xe6   : > { %v831_v2 = vsel %vm703_vm10, %v604_v59, %v767_v61  ;;  %v752_v3 = vmul.f32 0.2, %v567_v63 }
  0xe7   : > { %v895_v4 = vpack.c.bf16 %v831_v2, %v831_v2  ;;  %v847_v5 = vsel %vm719_vm11, %v644_v60, %v783_v0  ;;  %v800_v6 = vsel %vm672_vm12, %v527_v62, %v736_v1 }
  0xe8   : > { %v911_v7 = vpack.c.bf16 %v847_v5, %v847_v5  ;;  %v864_v8 = vpack.c.bf16 %v800_v6, %v800_v6  ;;  %v816_v9 = vsel %vm688_vm13, %v567_v63, %v752_v3 }
  0xe9   : > { %960 = vst.msk [vmem:[%s1393_s24 + $0xa4] sm:$0xf] %vm918_vm3, %v895_v4  ;;  %v880_v10 = vpack.c.bf16 %v816_v9, %v816_v9 }
  0xea   : > { %976 = vst.msk [vmem:[%s1393_s24 + $0xe4] sm:$0xf] %vm918_vm3, %v911_v7 }
  0xeb   : > { %929 = vst.msk [vmem:[%s1393_s24 + $0x28] sm:$0xf] %vm918_vm3, %v864_v8  ;;  %v607_v11 = vpop.f32.mrf.mxu2  ;;  %v647_v12 = vpop.f32.mrf.mxu3 }
  0xec   : > { %945 = vst.msk [vmem:[%s1393_s24 + $0x68] sm:$0xf] %vm918_vm3, %v880_v10  ;;  %vm704_vm14 = vcmp.gt.f32.partialorder %v607_v11, 0.0  ;;  %v768_v13 = vmul.f32 0.2, %v607_v11  ;;  %vm720_vm15 = vcmp.gt.f32.partialorder %v647_v12, 0.0  ;;  %v529_v14 = vpop.f32.mrf.mxu0  ;;  %v569_v15 = vpop.f32.mrf.mxu1 }
  0xed   : > { %v784_v16 = vmul.f32 0.2, %v647_v12  ;;  %vm673_vm0 = vcmp.gt.f32.partialorder %v529_v14, 0.0  ;;  %v737_v17 = vmul.f32 0.2, %v529_v14  ;;  %vm689_vm1 = vcmp.gt.f32.partialorder %v569_v15, 0.0 }
  0xee   : > { %v832_v18 = vsel %vm704_vm14, %v607_v11, %v768_v13  ;;  %v753_v19 = vmul.f32 0.2, %v569_v15 }
  0xef   : > { %v896_v20 = vpack.c.bf16 %v832_v18, %v832_v18  ;;  %v848_v21 = vsel %vm720_vm15, %v647_v12, %v784_v16  ;;  %v801_v22 = vsel %vm673_vm0, %v529_v14, %v737_v17 }
  0xf0   : > { %v912_v23 = vpack.c.bf16 %v848_v21, %v848_v21  ;;  %v865_v24 = vpack.c.bf16 %v801_v22, %v801_v22  ;;  %v817_v25 = vsel %vm689_vm1, %v569_v15, %v753_v19 }
  0xf1   : > { %961 = vst.msk [vmem:[%s1393_s24 + $0xa8] sm:$0xf] %vm918_vm3, %v896_v20  ;;  %v881_v26 = vpack.c.bf16 %v817_v25, %v817_v25 }
  0xf2   : > { %977 = vst.msk [vmem:[%s1393_s24 + $0xe8] sm:$0xf] %vm918_vm3, %v912_v23 }
  0xf3   : > { %930 = vst.msk [vmem:[%s1393_s24 + $0x2c] sm:$0xf] %vm918_vm3, %v865_v24  ;;  %v609_v27 = vpop.f32.mrf.mxu2  ;;  %v649_v28 = vpop.f32.mrf.mxu3 }
  0xf4   : > { %946 = vst.msk [vmem:[%s1393_s24 + $0x6c] sm:$0xf] %vm918_vm3, %v881_v26  ;;  %vm705_vm2 = vcmp.gt.f32.partialorder %v609_v27, 0.0  ;;  %v769_v29 = vmul.f32 0.2, %v609_v27  ;;  %vm721_vm4 = vcmp.gt.f32.partialorder %v649_v28, 0.0  ;;  %v532_v30 = vpop.f32.mrf.mxu0  ;;  %v572_v31 = vpop.f32.mrf.mxu1 }
  0xf5   : > { %v785_v32 = vmul.f32 0.2, %v649_v28  ;;  %vm674_vm5 = vcmp.gt.f32.partialorder %v532_v30, 0.0  ;;  %v738_v33 = vmul.f32 0.2, %v532_v30  ;;  %vm690_vm6 = vcmp.gt.f32.partialorder %v572_v31, 0.0 }
  0xf6   : > { %v833_v34 = vsel %vm705_vm2, %v609_v27, %v769_v29  ;;  %v754_v35 = vmul.f32 0.2, %v572_v31 }
  0xf7   : > { %v897_v36 = vpack.c.bf16 %v833_v34, %v833_v34  ;;  %v849_v37 = vsel %vm721_vm4, %v649_v28, %v785_v32  ;;  %v802_v38 = vsel %vm674_vm5, %v532_v30, %v738_v33 }
  0xf8   : > { %v913_v39 = vpack.c.bf16 %v849_v37, %v849_v37  ;;  %v866_v40 = vpack.c.bf16 %v802_v38, %v802_v38  ;;  %v818_v41 = vsel %vm690_vm6, %v572_v31, %v754_v35 }
  0xf9   : > { %962 = vst.msk [vmem:[%s1393_s24 + $0xac] sm:$0xf] %vm918_vm3, %v897_v36  ;;  %v882_v42 = vpack.c.bf16 %v818_v41, %v818_v41 }
  0xfa   : > { %978 = vst.msk [vmem:[%s1393_s24 + $0xec] sm:$0xf] %vm918_vm3, %v913_v39 }
  0xfb   : > { %931 = vst.msk [vmem:[%s1393_s24 + $0x30] sm:$0xf] %vm918_vm3, %v866_v40  ;;  %v612_v43 = vpop.f32.mrf.mxu2  ;;  %v652_v44 = vpop.f32.mrf.mxu3 }
  0xfc   : > { %947 = vst.msk [vmem:[%s1393_s24 + $0x70] sm:$0xf] %vm918_vm3, %v882_v42  ;;  %vm706_vm7 = vcmp.gt.f32.partialorder %v612_v43, 0.0  ;;  %v770_v45 = vmul.f32 0.2, %v612_v43  ;;  %vm722_vm8 = vcmp.gt.f32.partialorder %v652_v44, 0.0  ;;  %v534_v46 = vpop.f32.mrf.mxu0  ;;  %v574_v47 = vpop.f32.mrf.mxu1 }
  0xfd   : > { %v786_v48 = vmul.f32 0.2, %v652_v44  ;;  %vm675_vm9 = vcmp.gt.f32.partialorder %v534_v46, 0.0  ;;  %v739_v49 = vmul.f32 0.2, %v534_v46  ;;  %vm691_vm10 = vcmp.gt.f32.partialorder %v574_v47, 0.0 }
  0xfe   : > { %v834_v50 = vsel %vm706_vm7, %v612_v43, %v770_v45  ;;  %v755_v51 = vmul.f32 0.2, %v574_v47 }
  0xff   : > { %v898_v52 = vpack.c.bf16 %v834_v50, %v834_v50  ;;  %v850_v53 = vsel %vm722_vm8, %v652_v44, %v786_v48  ;;  %v803_v54 = vsel %vm675_vm9, %v534_v46, %v739_v49 }
 0x100   : > { %v914_v55 = vpack.c.bf16 %v850_v53, %v850_v53  ;;  %v867_v56 = vpack.c.bf16 %v803_v54, %v803_v54  ;;  %v819_v57 = vsel %vm691_vm10, %v574_v47, %v755_v51 }
 0x101   : > { %963 = vst.msk [vmem:[%s1393_s24 + $0xb0] sm:$0xf] %vm918_vm3, %v898_v52  ;;  %v883_v58 = vpack.c.bf16 %v819_v57, %v819_v57 }
 0x102   : > { %979 = vst.msk [vmem:[%s1393_s24 + $0xf0] sm:$0xf] %vm918_vm3, %v914_v55 }
 0x103   : > { %932 = vst.msk [vmem:[%s1393_s24 + $0x34] sm:$0xf] %vm918_vm3, %v867_v56  ;;  %v614_v59 = vpop.f32.mrf.mxu2  ;;  %v654_v60 = vpop.f32.mrf.mxu3 }
 0x104   : > { %948 = vst.msk [vmem:[%s1393_s24 + $0x74] sm:$0xf] %vm918_vm3, %v883_v58  ;;  %vm707_vm11 = vcmp.gt.f32.partialorder %v614_v59, 0.0  ;;  %v771_v61 = vmul.f32 0.2, %v614_v59  ;;  %vm723_vm12 = vcmp.gt.f32.partialorder %v654_v60, 0.0  ;;  %v537_v62 = vpop.f32.mrf.mxu0  ;;  %v577_v63 = vpop.f32.mrf.mxu1 }
 0x105   : > { %v787_v0 = vmul.f32 0.2, %v654_v60  ;;  %vm676_vm13 = vcmp.gt.f32.partialorder %v537_v62, 0.0  ;;  %v740_v1 = vmul.f32 0.2, %v537_v62  ;;  %vm692_vm14 = vcmp.gt.f32.partialorder %v577_v63, 0.0 }
 0x106   : > { %v835_v2 = vsel %vm707_vm11, %v614_v59, %v771_v61  ;;  %v756_v3 = vmul.f32 0.2, %v577_v63 }
 0x107   : > { %v899_v4 = vpack.c.bf16 %v835_v2, %v835_v2  ;;  %v851_v5 = vsel %vm723_vm12, %v654_v60, %v787_v0  ;;  %v804_v6 = vsel %vm676_vm13, %v537_v62, %v740_v1 }
 0x108   : > { %v915_v7 = vpack.c.bf16 %v851_v5, %v851_v5  ;;  %v868_v8 = vpack.c.bf16 %v804_v6, %v804_v6  ;;  %v820_v9 = vsel %vm692_vm14, %v577_v63, %v756_v3 }
 0x109   : > { %964 = vst.msk [vmem:[%s1393_s24 + $0xb4] sm:$0xf] %vm918_vm3, %v899_v4  ;;  %v884_v10 = vpack.c.bf16 %v820_v9, %v820_v9 }
 0x10a   : > { %980 = vst.msk [vmem:[%s1393_s24 + $0xf4] sm:$0xf] %vm918_vm3, %v915_v7 }
 0x10b   : > { %933 = vst.msk [vmem:[%s1393_s24 + $0x38] sm:$0xf] %vm918_vm3, %v868_v8  ;;  %v617_v11 = vpop.f32.mrf.mxu2  ;;  %v657_v12 = vpop.f32.mrf.mxu3 }
 0x10c   : > { %949 = vst.msk [vmem:[%s1393_s24 + $0x78] sm:$0xf] %vm918_vm3, %v884_v10  ;;  %vm708_vm15 = vcmp.gt.f32.partialorder %v617_v11, 0.0  ;;  %v772_v13 = vmul.f32 0.2, %v617_v11  ;;  %vm724_vm0 = vcmp.gt.f32.partialorder %v657_v12, 0.0  ;;  %v539_v14 = vpop.f32.mrf.mxu0  ;;  %v579_v15 = vpop.f32.mrf.mxu1 }
 0x10d   : > { %v788_v16 = vmul.f32 0.2, %v657_v12  ;;  %vm677_vm1 = vcmp.gt.f32.partialorder %v539_v14, 0.0  ;;  %v741_v17 = vmul.f32 0.2, %v539_v14  ;;  %vm693_vm2 = vcmp.gt.f32.partialorder %v579_v15, 0.0 }
 0x10e   : > { %v836_v18 = vsel %vm708_vm15, %v617_v11, %v772_v13  ;;  %v757_v19 = vmul.f32 0.2, %v579_v15 }
 0x10f   : > { %v900_v20 = vpack.c.bf16 %v836_v18, %v836_v18  ;;  %v852_v21 = vsel %vm724_vm0, %v657_v12, %v788_v16  ;;  %v805_v22 = vsel %vm677_vm1, %v539_v14, %v741_v17 }
 0x110   : > { %v916_v23 = vpack.c.bf16 %v852_v21, %v852_v21  ;;  %v869_v24 = vpack.c.bf16 %v805_v22, %v805_v22  ;;  %v821_v25 = vsel %vm693_vm2, %v579_v15, %v757_v19 }
 0x111   : > { %965 = vst.msk [vmem:[%s1393_s24 + $0xb8] sm:$0xf] %vm918_vm3, %v900_v20  ;;  %v885_v26 = vpack.c.bf16 %v821_v25, %v821_v25 }
 0x112   : > { %981 = vst.msk [vmem:[%s1393_s24 + $0xf8] sm:$0xf] %vm918_vm3, %v916_v23 }
 0x113   : > { %934 = vst.msk [vmem:[%s1393_s24 + $0x3c] sm:$0xf] %vm918_vm3, %v869_v24  ;;  %v619_v27 = vpop.f32.mrf.mxu2  ;;  %v659_v28 = vpop.f32.mrf.mxu3 }
 0x114   : > { %950 = vst.msk [vmem:[%s1393_s24 + $0x7c] sm:$0xf] %vm918_vm3, %v885_v26  ;;  %vm709_vm4 = vcmp.gt.f32.partialorder %v619_v27, 0.0  ;;  %v773_v29 = vmul.f32 0.2, %v619_v27  ;;  %vm725_vm5 = vcmp.gt.f32.partialorder %v659_v28, 0.0 }
 0x115   : > { %v789_v30 = vmul.f32 0.2, %v659_v28 }
 0x116   : > { %v837_v31 = vsel %vm709_vm4, %v619_v27, %v773_v29 }
 0x117   : > { %v901_v32 = vpack.c.bf16 %v837_v31, %v837_v31  ;;  %v853_v33 = vsel %vm725_vm5, %v659_v28, %v789_v30 }
 0x118   : > { %v917_v34 = vpack.c.bf16 %v853_v33, %v853_v33 }
 0x119   : > { %966 = vst.msk [vmem:[%s1393_s24 + $0xbc] sm:$0xf] %vm918_vm3, %v901_v32 }
 0x11a   : > { %982 = vst.msk [vmem:[%s1393_s24 + $0xfc] sm:$0xf] %vm918_vm3, %v917_v34 }
 0x11b PF: > { %s12_s9 = sadd.s32 1, %s1280_s9  }
 0x11c   : > { %p9_p4 = scmp.ge.s32.totalorder %s12_s9, 6  }
 0x11e   :  { %11 = sbr.rel (!%p9_p4) target bundleno = 1 (0x1), region = 58 }

// kernel: discriminator_forward.6
= control target key start
LH: loop header
LB: loop body
LE: loop exit
PB: predicated region body
PF: predicated region fallthrough
CT: control target
= control target key end

     0   :  { %vm1717_vm0 = vcmask 261120   ;;  %vm2527_vm15 = vcmask 257024   ;;  %s5904_s1 = inlined_call_operand.vmem [shape: bf16[512,32], index: 1, kind: input, shape index: {}]   ;;  %s5905_s0 = inlined_call_operand.vmem [shape: bf16[512,512], index: 0, kind: input, shape index: {}]   ;;  %s5906_s2 = inlined_call_operand.vmem [shape: f32[1,32], index: 2, kind: input, shape index: {}]   ;;  %s5907_s3 = inlined_call_operand.vmem [shape: f32[1,32], index: 3, kind: input, shape index: {}]   ;;  %s5908_s4 = inlined_call_operand.vmem [shape: bf16[512,32], index: 4, kind: output, shape index: {}]  }
   0x1   :  { %v3371_v0 = vld [vmem:[%s5904_s1 + $0x38] sm:$0xff]  ;;  %v3370_v4 = vld [vmem:[%s5904_s1 + $0x30] sm:$0xff]  ;;  %v3369_v8 = vld [vmem:[%s5904_s1 + $0x28] sm:$0xff] }
   0x2   :  { %v3379_v1 = vld [vmem:[%s5904_s1 + $0x78] sm:$0xff]  ;;  %1041 = vmatpush.bf16.msra.mxu0 %v3371_v0  ;;  %v3378_v5 = vld [vmem:[%s5904_s1 + $0x70] sm:$0xff]  ;;  %v3377_v9 = vld [vmem:[%s5904_s1 + $0x68] sm:$0xff] }
   0x3   :  { %v3387_v2 = vld [vmem:[%s5904_s1 + $0xb8] sm:$0xff]  ;;  %1210 = vmatpush.bf16.msra.mxu1 %v3379_v1  ;;  %v3386_v6 = vld [vmem:[%s5904_s1 + $0xb0] sm:$0xff]  ;;  %v3385_v10 = vld [vmem:[%s5904_s1 + $0xa8] sm:$0xff] }
   0x4   :  { %v3395_v3 = vld [vmem:[%s5904_s1 + $0xf8] sm:$0xff]  ;;  %1379 = vmatpush.bf16.msra.mxu2 %v3387_v2  ;;  %v3394_v7 = vld [vmem:[%s5904_s1 + $0xf0] sm:$0xff]  ;;  %v3393_v11 = vld [vmem:[%s5904_s1 + $0xe8] sm:$0xff] }
   0x5   :  { %1548 = vmatpush.bf16.msra.mxu3 %v3395_v3  ;;  %v3368_v12 = vld [vmem:[%s5904_s1 + $0x20] sm:$0xff]  ;;  %v3367_v16 = vld [vmem:[%s5904_s1 + $0x18] sm:$0xff]  ;;  %v3366_v20 = vld [vmem:[%s5904_s1 + $0x10] sm:$0xff] }
   0x6   :  { %1042 = vmatpush.bf16.msra.mxu0 %v3370_v4  ;;  %v3376_v13 = vld [vmem:[%s5904_s1 + $0x60] sm:$0xff]  ;;  %v3375_v17 = vld [vmem:[%s5904_s1 + $0x58] sm:$0xff]  ;;  %v3374_v21 = vld [vmem:[%s5904_s1 + $0x50] sm:$0xff] }
   0x7   :  { %1211 = vmatpush.bf16.msra.mxu1 %v3378_v5  ;;  %v3384_v14 = vld [vmem:[%s5904_s1 + $0xa0] sm:$0xff]  ;;  %v3383_v18 = vld [vmem:[%s5904_s1 + $0x98] sm:$0xff]  ;;  %v3382_v22 = vld [vmem:[%s5904_s1 + $0x90] sm:$0xff] }
   0x8   :  { %1380 = vmatpush.bf16.msra.mxu2 %v3386_v6  ;;  %v3392_v15 = vld [vmem:[%s5904_s1 + $0xe0] sm:$0xff]  ;;  %v3391_v19 = vld [vmem:[%s5904_s1 + $0xd8] sm:$0xff]  ;;  %v3390_v23 = vld [vmem:[%s5904_s1 + $0xd0] sm:$0xff] }
   0x9   :  { %1549 = vmatpush.bf16.msra.mxu3 %v3394_v7  ;;  %v3365_v24 = vld [vmem:[%s5904_s1 + $0x8] sm:$0xff]  ;;  %v3364_v28 = vld [vmem:[%s5904_s1] sm:$0xff]  ;;  %v3238_v33 = vld [vmem:[%s5905_s0 + $0xc] sm:$0xf0] }
   0xa   :  { %1043 = vmatpush.bf16.msra.mxu0 %v3369_v8  ;;  %v3373_v25 = vld [vmem:[%s5904_s1 + $0x48] sm:$0xff]  ;;  %v3372_v29 = vld [vmem:[%s5904_s1 + $0x40] sm:$0xff]  ;;  %v2600_v35 = vld [vmem:[%s5905_s0 + $0x10] sm:$0xf0] }
   0xb   :  { %1212 = vmatpush.bf16.msra.mxu1 %v3377_v9  ;;  %v3381_v26 = vld [vmem:[%s5904_s1 + $0x88] sm:$0xff]  ;;  %v3380_v30 = vld [vmem:[%s5904_s1 + $0x80] sm:$0xff]  ;;  %v3239_v37 = vld [vmem:[%s5905_s0 + $0x14] sm:$0xf0] }
   0xc   :  { %1381 = vmatpush.bf16.msra.mxu2 %v3385_v10  ;;  %v3389_v27 = vld [vmem:[%s5904_s1 + $0xc8] sm:$0xff]  ;;  %v3388_v31 = vld [vmem:[%s5904_s1 + $0xc0] sm:$0xff]  ;;  %v2608_v39 = vld [vmem:[%s5905_s0 + $0x18] sm:$0xf0] }
   0xd   :  { %1550 = vmatpush.bf16.msra.mxu3 %v3393_v11  ;;  %v2598_v32 = vld [vmem:[%s5905_s0] sm:$0xf]  ;;  %v3236_v34 = vld [vmem:[%s5905_s0 + $0x4] sm:$0xf]  ;;  %v2606_v36 = vld [vmem:[%s5905_s0 + $0x8] sm:$0xf] }
   0xe   :  { %1044 = vmatpush.bf16.msra.mxu0 %v3368_v12  ;;  %v3237_v38 = vld [vmem:[%s5905_s0 + $0xc] sm:$0xf]  ;;  %v2599_v40 = vor.u32 %v3238_v33, %v2598_v32  ;;  %v2603_v41 = vor.u32 %v3236_v34, %v2600_v35  ;;  %v2607_v42 = vor.u32 %v3239_v37, %v2606_v36  ;;  %v2614_v44 = vld [vmem:[%s5905_s0 + $0x20] sm:$0xf]  ;;  %v3242_v45 = vld [vmem:[%s5905_s0 + $0x2c] sm:$0xf0] }
   0xf   :  { %1213 = vmatpush.bf16.msra.mxu1 %v3376_v13  ;;  %v2611_v43 = vor.u32 %v3237_v38, %v2608_v39  ;;  %v3240_v46 = vld [vmem:[%s5905_s0 + $0x24] sm:$0xf]  ;;  %v2616_v47 = vld [vmem:[%s5905_s0 + $0x30] sm:$0xf0]  ;;  %v2622_v48 = vld [vmem:[%s5905_s0 + $0x28] sm:$0xf]  ;;  %v2615_v52 = vor.u32 %v3242_v45, %v2614_v44 }
  0x10   :  { %1382 = vmatpush.bf16.msra.mxu2 %v3384_v14  ;;  %v3243_v49 = vld [vmem:[%s5905_s0 + $0x34] sm:$0xf0]  ;;  %v3241_v50 = vld [vmem:[%s5905_s0 + $0x2c] sm:$0xf]  ;;  %v2624_v51 = vld [vmem:[%s5905_s0 + $0x38] sm:$0xf0]  ;;  %v2619_v53 = vor.u32 %v3240_v46, %v2616_v47 }
  0x11   :  { %1551 = vmatpush.bf16.msra.mxu3 %v3392_v15  ;;  %v2623_v54 = vor.u32 %v3243_v49, %v2622_v48  ;;  %v2627_v55 = vor.u32 %v3241_v50, %v2624_v51  ;;  %v2630_v56 = vld [vmem:[%s5905_s0 + $0x40] sm:$0xf]  ;;  %v3246_v57 = vld [vmem:[%s5905_s0 + $0x4c] sm:$0xf0]  ;;  %v3244_v58 = vld [vmem:[%s5905_s0 + $0x44] sm:$0xf] }
  0x12   :  { %1045 = vmatpush.bf16.msra.mxu0 %v3367_v16  ;;  %v2632_v59 = vld [vmem:[%s5905_s0 + $0x50] sm:$0xf0]  ;;  %v2638_v60 = vld [vmem:[%s5905_s0 + $0x48] sm:$0xf]  ;;  %v3247_v61 = vld [vmem:[%s5905_s0 + $0x54] sm:$0xf0]  ;;  %v2631_v0 = vor.u32 %v3246_v57, %v2630_v56 }
  0x13   :  { %1214 = vmatpush.bf16.msra.mxu1 %v3375_v17  ;;  %v3245_v62 = vld [vmem:[%s5905_s0 + $0x4c] sm:$0xf]  ;;  %v2640_v63 = vld [vmem:[%s5905_s0 + $0x58] sm:$0xf0]  ;;  %v2635_v1 = vor.u32 %v3244_v58, %v2632_v59  ;;  %v2639_v2 = vor.u32 %v3247_v61, %v2638_v60  ;;  %v2646_v4 = vld [vmem:[%s5905_s0 + $0x60] sm:$0xf] }
  0x14   :  { %1383 = vmatpush.bf16.msra.mxu2 %v3383_v18  ;;  %v2643_v3 = vor.u32 %v3245_v62, %v2640_v63  ;;  %v3250_v5 = vld [vmem:[%s5905_s0 + $0x6c] sm:$0xf0]  ;;  %v3248_v6 = vld [vmem:[%s5905_s0 + $0x64] sm:$0xf]  ;;  %v2648_v7 = vld [vmem:[%s5905_s0 + $0x70] sm:$0xf0] }
  0x15   :  { %1552 = vmatpush.bf16.msra.mxu3 %v3391_v19  ;;  %v2654_v8 = vld [vmem:[%s5905_s0 + $0x68] sm:$0xf]  ;;  %v3251_v9 = vld [vmem:[%s5905_s0 + $0x74] sm:$0xf0]  ;;  %v3249_v10 = vld [vmem:[%s5905_s0 + $0x6c] sm:$0xf]  ;;  %v2647_v12 = vor.u32 %v3250_v5, %v2646_v4  ;;  %v2651_v13 = vor.u32 %v3248_v6, %v2648_v7 }
  0x16   :  { %1046 = vmatpush.bf16.msra.mxu0 %v3366_v20  ;;  %v2656_v11 = vld [vmem:[%s5905_s0 + $0x78] sm:$0xf0]  ;;  %v2655_v14 = vor.u32 %v3251_v9, %v2654_v8  ;;  %v2662_v16 = vld [vmem:[%s5905_s0 + $0x80] sm:$0xf]  ;;  %v3254_v17 = vld [vmem:[%s5905_s0 + $0x8c] sm:$0xf0] }
  0x17   :  { %1215 = vmatpush.bf16.msra.mxu1 %v3374_v21  ;;  %v2659_v15 = vor.u32 %v3249_v10, %v2656_v11  ;;  %v3252_v18 = vld [vmem:[%s5905_s0 + $0x84] sm:$0xf]  ;;  %v2664_v19 = vld [vmem:[%s5905_s0 + $0x90] sm:$0xf0]  ;;  %v2670_v20 = vld [vmem:[%s5905_s0 + $0x88] sm:$0xf] }
  0x18   :  { %1384 = vmatpush.bf16.msra.mxu2 %v3382_v22  ;;  %v3255_v21 = vld [vmem:[%s5905_s0 + $0x94] sm:$0xf0]  ;;  %v3253_v22 = vld [vmem:[%s5905_s0 + $0x8c] sm:$0xf]  ;;  %v2686_v32 = vld [vmem:[%s5905_s0 + $0xa8] sm:$0xf] }
  0x19   :  { %1553 = vmatpush.bf16.msra.mxu3 %v3390_v23  ;;  %v2672_v23 = vld [vmem:[%s5905_s0 + $0x98] sm:$0xf0]  ;;  %v3259_v33 = vld [vmem:[%s5905_s0 + $0xb4] sm:$0xf0]  ;;  %v3257_v34 = vld [vmem:[%s5905_s0 + $0xac] sm:$0xf] }
  0x1a   :  { %1047 = vmatpush.bf16.msra.mxu0 %v3365_v24  ;;  %v2663_v24 = vor.u32 %v3254_v17, %v2662_v16  ;;  %v2688_v35 = vld [vmem:[%s5905_s0 + $0xb8] sm:$0xf0]  ;;  %v2687_v38 = vor.u32 %v3259_v33, %v2686_v32  ;;  %v2702_v44 = vld [vmem:[%s5905_s0 + $0xc8] sm:$0xf]  ;;  %v3263_v45 = vld [vmem:[%s5905_s0 + $0xd4] sm:$0xf0] }
  0x1b   :  { %1216 = vmatpush.bf16.msra.mxu1 %v3373_v25  ;;  %v2667_v25 = vor.u32 %v3252_v18, %v2664_v19  ;;  %v2691_v39 = vor.u32 %v3257_v34, %v2688_v35  ;;  %v3261_v46 = vld [vmem:[%s5905_s0 + $0xcc] sm:$0xf]  ;;  %v2704_v47 = vld [vmem:[%s5905_s0 + $0xd8] sm:$0xf0]  ;;  %v2703_v50 = vor.u32 %v3263_v45, %v2702_v44  ;;  %v2718_v56 = vld [vmem:[%s5905_s0 + $0xe8] sm:$0xf] }
  0x1c   :  { %1385 = vmatpush.bf16.msra.mxu2 %v3381_v26  ;;  %v2671_v26 = vor.u32 %v3255_v21, %v2670_v20  ;;  %v2707_v51 = vor.u32 %v3261_v46, %v2704_v47  ;;  %v3267_v57 = vld [vmem:[%s5905_s0 + $0xf4] sm:$0xf0]  ;;  %v3265_v58 = vld [vmem:[%s5905_s0 + $0xec] sm:$0xf]  ;;  %v2720_v59 = vld [vmem:[%s5905_s0 + $0xf8] sm:$0xf0] }
  0x1d   :  { %1554 = vmatpush.bf16.msra.mxu3 %v3389_v27  ;;  %v2675_v27 = vor.u32 %v3253_v22, %v2672_v23  ;;  %v2719_v62 = vor.u32 %v3267_v57, %v2718_v56  ;;  %v2723_v63 = vor.u32 %v3265_v58, %v2720_v59  ;;  %v2734_v4 = vld [vmem:[%s5905_s0 + $0x108] sm:$0xf]  ;;  %v3271_v5 = vld [vmem:[%s5905_s0 + $0x114] sm:$0xf0]  ;;  %v3269_v6 = vld [vmem:[%s5905_s0 + $0x10c] sm:$0xf] }
  0x1e   :  { %1048 = vmatpush.bf16.msra.mxu0 %v3364_v28  ;;  %v2678_v28 = vld [vmem:[%s5905_s0 + $0xa0] sm:$0xf]  ;;  %v2736_v7 = vld [vmem:[%s5905_s0 + $0x118] sm:$0xf0]  ;;  %v3274_v23 = vld [vmem:[%s5905_s0 + $0x12c] sm:$0xf0] }
  0x1f   :  { %1217 = vmatpush.bf16.msra.mxu1 %v3372_v29  ;;  %v3258_v29 = vld [vmem:[%s5905_s0 + $0xac] sm:$0xf0]  ;;  %v2742_v22 = vld [vmem:[%s5905_s0 + $0x120] sm:$0xf] }
  0x20   :  { %1386 = vmatpush.bf16.msra.mxu2 %v3380_v30  ;;  %v3256_v30 = vld [vmem:[%s5905_s0 + $0xa4] sm:$0xf]  ;;  %v2679_v36 = vor.u32 %v3258_v29, %v2678_v28  ;;  %v3273_v28 = vld [vmem:[%s5905_s0 + $0x12c] sm:$0xf]  ;;  %v2752_v29 = vld [vmem:[%s5905_s0 + $0x138] sm:$0xf0]  ;;  %v2743_v32 = vor.u32 %v3274_v23, %v2742_v22 }
  0x21   :  { %1555 = vmatpush.bf16.msra.mxu3 %v3388_v31  ;;  %1049 = vmatmul.bf16.vlgmr.msra.gmra.mxu0 %v2599_v40  ;;  %v2680_v31 = vld [vmem:[%s5905_s0 + $0xb0] sm:$0xf0]  ;;  %v2694_v40 = vld [vmem:[%s5905_s0 + $0xc0] sm:$0xf] }
  0x22   :  { %1218 = vmatmul.bf16.vlgmr.msra.gmra.mxu1 %v2603_v41  ;;  %v2683_v37 = vor.u32 %v3256_v30, %v2680_v31  ;;  %v3262_v41 = vld [vmem:[%s5905_s0 + $0xcc] sm:$0xf0] }
  0x23   :  { %1387 = vmatmul.bf16.vlgmr.msra.gmra.mxu2 %v2607_v42  ;;  %v3260_v42 = vld [vmem:[%s5905_s0 + $0xc4] sm:$0xf]  ;;  %v2695_v48 = vor.u32 %v3262_v41, %v2694_v40 }
  0x24   :  { %1556 = vmatmul.bf16.vlgmr.msra.gmra.mxu3 %v2611_v43  ;;  %v2696_v43 = vld [vmem:[%s5905_s0 + $0xd0] sm:$0xf0] }
  0x25   :  { %v2699_v49 = vor.u32 %v3260_v42, %v2696_v43 }
  0x31   :  { %1054 = vmatmul.bf16.gmra.mxu0 %v2615_v52  ;;  %v2710_v52 = vld [vmem:[%s5905_s0 + $0xe0] sm:$0xf] }
  0x32   :  { %1223 = vmatmul.bf16.gmra.mxu1 %v2619_v53  ;;  %v3266_v53 = vld [vmem:[%s5905_s0 + $0xec] sm:$0xf0] }
  0x33   :  { %1392 = vmatmul.bf16.gmra.mxu2 %v2623_v54  ;;  %v3264_v54 = vld [vmem:[%s5905_s0 + $0xe4] sm:$0xf]  ;;  %v2711_v60 = vor.u32 %v3266_v53, %v2710_v52  ;;  %v2766_v52 = vld [vmem:[%s5905_s0 + $0x148] sm:$0xf]  ;;  %v3279_v53 = vld [vmem:[%s5905_s0 + $0x154] sm:$0xf0] }
  0x34   :  { %1561 = vmatmul.bf16.gmra.mxu3 %v2627_v55  ;;  %v2712_v55 = vld [vmem:[%s5905_s0 + $0xf0] sm:$0xf0] }
  0x35   :  { %v2715_v61 = vor.u32 %v3264_v54, %v2712_v55  ;;  %v3277_v54 = vld [vmem:[%s5905_s0 + $0x14c] sm:$0xf]  ;;  %v2768_v55 = vld [vmem:[%s5905_s0 + $0x158] sm:$0xf0] }
  0x41   :  { %1059 = vmatmul.bf16.gmra.mxu0 %v2631_v0  ;;  %v2726_v0 = vld [vmem:[%s5905_s0 + $0x100] sm:$0xf] }
  0x42   :  { %1228 = vmatmul.bf16.gmra.mxu1 %v2635_v1  ;;  %v3270_v1 = vld [vmem:[%s5905_s0 + $0x10c] sm:$0xf0] }
  0x43   :  { %1397 = vmatmul.bf16.gmra.mxu2 %v2639_v2  ;;  %v3268_v2 = vld [vmem:[%s5905_s0 + $0x104] sm:$0xf]  ;;  %v2727_v8 = vor.u32 %v3270_v1, %v2726_v0  ;;  %v2771_v0 = vor.u32 %v3277_v54, %v2768_v55 }
  0x44   :  { %1566 = vmatmul.bf16.gmra.mxu3 %v2643_v3  ;;  %v2728_v3 = vld [vmem:[%s5905_s0 + $0x110] sm:$0xf0] }
  0x45   :  { %v2731_v9 = vor.u32 %v3268_v2, %v2728_v3 }
  0x51   :  { %1064 = vmatmul.bf16.gmra.mxu0 %v2647_v12  ;;  %v2735_v12 = vor.u32 %v3271_v5, %v2734_v4 }
  0x52   :  { %1233 = vmatmul.bf16.gmra.mxu1 %v2651_v13  ;;  %v2739_v13 = vor.u32 %v3269_v6, %v2736_v7 }
  0x53   :  { %1402 = vmatmul.bf16.gmra.mxu2 %v2655_v14 }
  0x54   :  { %1571 = vmatmul.bf16.gmra.mxu3 %v2659_v15 }
  0x61   :  { %1069 = vmatmul.bf16.gmra.mxu0 %v2663_v24  ;;  %v3272_v24 = vld [vmem:[%s5905_s0 + $0x124] sm:$0xf] }
  0x62   :  { %1238 = vmatmul.bf16.gmra.mxu1 %v2667_v25  ;;  %v2744_v25 = vld [vmem:[%s5905_s0 + $0x130] sm:$0xf0] }
  0x63   :  { %1407 = vmatmul.bf16.gmra.mxu2 %v2671_v26  ;;  %v2750_v26 = vld [vmem:[%s5905_s0 + $0x128] sm:$0xf]  ;;  %v2747_v33 = vor.u32 %v3272_v24, %v2744_v25 }
  0x64   :  { %1576 = vmatmul.bf16.gmra.mxu3 %v2675_v27  ;;  %v3275_v27 = vld [vmem:[%s5905_s0 + $0x134] sm:$0xf0] }
  0x71   :  { %1074 = vmatmul.bf16.gmra.mxu0 %v2679_v36 }
  0x72   :  { %1243 = vmatmul.bf16.gmra.mxu1 %v2683_v37  ;;  %v2751_v37 = vor.u32 %v3275_v27, %v2750_v26 }
  0x73   :  { %1412 = vmatmul.bf16.gmra.mxu2 %v2687_v38  ;;  %v2755_v38 = vor.u32 %v3273_v28, %v2752_v29 }
  0x74   :  { %1581 = vmatmul.bf16.gmra.mxu3 %v2691_v39 }
  0x81   :  { %1079 = vmatmul.bf16.gmra.mxu0 %v2695_v48  ;;  %v2758_v48 = vld [vmem:[%s5905_s0 + $0x140] sm:$0xf] }
  0x82   :  { %1248 = vmatmul.bf16.gmra.mxu1 %v2699_v49  ;;  %v3278_v49 = vld [vmem:[%s5905_s0 + $0x14c] sm:$0xf0] }
  0x83   :  { %1417 = vmatmul.bf16.gmra.mxu2 %v2703_v50  ;;  %v3276_v50 = vld [vmem:[%s5905_s0 + $0x144] sm:$0xf]  ;;  %v2759_v58 = vor.u32 %v3278_v49, %v2758_v48 }
  0x84   :  { %1586 = vmatmul.bf16.gmra.mxu3 %v2707_v51  ;;  %v2760_v51 = vld [vmem:[%s5905_s0 + $0x150] sm:$0xf0] }
  0x85   :  { %v2763_v59 = vor.u32 %v3276_v50, %v2760_v51 }
  0x91   :  { %1084 = vmatmul.bf16.gmra.mxu0 %v2711_v60 }
  0x92   :  { %1253 = vmatmul.bf16.gmra.mxu1 %v2715_v61 }
  0x93   :  { %1422 = vmatmul.bf16.gmra.mxu2 %v2719_v62 }
  0x94   :  { %1591 = vmatmul.bf16.gmra.mxu3 %v2723_v63  ;;  %v2767_v63 = vor.u32 %v3279_v53, %v2766_v52 }
  0x9e   :  { %v1050_v10 = vpop.f32.mrf.mxu0 }
  0x9f   :  { %v1219_v11 = vpop.f32.mrf.mxu1 }
  0xa0   :  { %v1220_v14 = vadd.f32 %v1219_v11, %v1050_v10  ;;  %v2774_v10 = vld [vmem:[%s5905_s0 + $0x160] sm:$0xf]  ;;  %v3282_v11 = vld [vmem:[%s5905_s0 + $0x16c] sm:$0xf0] }
  0xa1   :  { %1089 = vmatmul.bf16.gmra.mxu0 %v2727_v8 }
  0xa2   :  { %1258 = vmatmul.bf16.gmra.mxu1 %v2731_v9 }
  0xa3   :  { %1427 = vmatmul.bf16.gmra.mxu2 %v2735_v12  ;;  %v3280_v12 = vld [vmem:[%s5905_s0 + $0x164] sm:$0xf] }
  0xa4   :  { %1596 = vmatmul.bf16.gmra.mxu3 %v2739_v13  ;;  %v2776_v13 = vld [vmem:[%s5905_s0 + $0x170] sm:$0xf0] }
  0xa5   :  { %v2779_v22 = vor.u32 %v3280_v12, %v2776_v13 }
  0xa6   :  { %v1388_v15 = vpop.f32.mrf.mxu2  ;;  %v1052_v18 = vpop.f32.mrf.mxu0 }
  0xa7   :  { %v1557_v16 = vpop.f32.mrf.mxu3  ;;  %v1389_v17 = vadd.f32 %v1388_v15, %v1220_v14  ;;  %v1221_v19 = vpop.f32.mrf.mxu1  ;;  %v2782_v14 = vld [vmem:[%s5905_s0 + $0x168] sm:$0xf]  ;;  %v3283_v15 = vld [vmem:[%s5905_s0 + $0x174] sm:$0xf0] }
  0xa8   :  { %v1222_v20 = vadd.f32 %v1221_v19, %v1052_v18  ;;  %v2783_v26 = vor.u32 %v3283_v15, %v2782_v14 }
  0xa9   :  { %v3739_v21 = vadd.f32 %v1557_v16, %v1389_v17  ;;  %v3281_v16 = vld [vmem:[%s5905_s0 + $0x16c] sm:$0xf]  ;;  %v2784_v17 = vld [vmem:[%s5905_s0 + $0x178] sm:$0xf0] }
  0xaa   :  { %v2787_v27 = vor.u32 %v3281_v16, %v2784_v17 }
  0xae   :  { %v1390_v30 = vpop.f32.mrf.mxu2  ;;  %v1055_v35 = vpop.f32.mrf.mxu0 }
  0xaf   :  { %v1559_v31 = vpop.f32.mrf.mxu3  ;;  %v1391_v34 = vadd.f32 %v1390_v30, %v1222_v20  ;;  %v1224_v36 = vpop.f32.mrf.mxu1  ;;  %v2775_v20 = vor.u32 %v3282_v11, %v2774_v10  ;;  %v2816_v10 = vld [vmem:[%s5905_s0 + $0x1b8] sm:$0xf0] }
  0xb0   :  { %v1225_v39 = vadd.f32 %v1224_v36, %v1055_v35 }
  0xb1   :  { %v3765_v40 = vadd.f32 %v1559_v31, %v1391_v34  ;;  %1094 = vmatmul.bf16.gmra.mxu0 %v2743_v32 }
  0xb2   :  { %1263 = vmatmul.bf16.gmra.mxu1 %v2747_v33 }
  0xb3   :  { %1432 = vmatmul.bf16.gmra.mxu2 %v2751_v37  ;;  %v2790_v37 = vld [vmem:[%s5905_s0 + $0x180] sm:$0xf] }
  0xb4   :  { %1601 = vmatmul.bf16.gmra.mxu3 %v2755_v38  ;;  %v3286_v38 = vld [vmem:[%s5905_s0 + $0x18c] sm:$0xf0] }
  0xb5   :  { %v2791_v49 = vor.u32 %v3286_v38, %v2790_v37  ;;  %v3295_v37 = vld [vmem:[%s5905_s0 + $0x1d4] sm:$0xf0]  ;;  %v3293_v38 = vld [vmem:[%s5905_s0 + $0x1cc] sm:$0xf] }
  0xb6   :  { %v1393_v41 = vpop.f32.mrf.mxu2  ;;  %v1057_v44 = vpop.f32.mrf.mxu0 }
  0xb7   :  { %v1562_v42 = vpop.f32.mrf.mxu3  ;;  %v1394_v43 = vadd.f32 %v1393_v41, %v1225_v39  ;;  %v1226_v45 = vpop.f32.mrf.mxu1  ;;  %v3284_v39 = vld [vmem:[%s5905_s0 + $0x184] sm:$0xf]  ;;  %v2792_v41 = vld [vmem:[%s5905_s0 + $0x190] sm:$0xf0] }
  0xb8   :  { %v1227_v46 = vadd.f32 %v1226_v45, %v1057_v44  ;;  %v3285_v44 = vld [vmem:[%s5905_s0 + $0x18c] sm:$0xf]  ;;  %v2800_v45 = vld [vmem:[%s5905_s0 + $0x198] sm:$0xf0]  ;;  %v2795_v50 = vor.u32 %v3284_v39, %v2792_v41 }
  0xb9   :  { %v3767_v47 = vadd.f32 %v1562_v42, %v1394_v43  ;;  %v2798_v42 = vld [vmem:[%s5905_s0 + $0x188] sm:$0xf]  ;;  %v3287_v43 = vld [vmem:[%s5905_s0 + $0x194] sm:$0xf0]  ;;  %v2803_v55 = vor.u32 %v3285_v44, %v2800_v45  ;;  %v2832_v39 = vld [vmem:[%s5905_s0 + $0x1d8] sm:$0xf0] }
  0xba   :  { %v2799_v54 = vor.u32 %v3287_v43, %v2798_v42 }
  0xbe   :  { %v1395_v56 = vpop.f32.mrf.mxu2  ;;  %v1060_v61 = vpop.f32.mrf.mxu0 }
  0xbf   :  { %v1564_v57 = vpop.f32.mrf.mxu3  ;;  %v1396_v60 = vadd.f32 %v1395_v56, %v1227_v46  ;;  %v1229_v62 = vpop.f32.mrf.mxu1 }
  0xc0   :  { %v1230_v1 = vadd.f32 %v1229_v62, %v1060_v61 }
  0xc1   :  { %v3793_v2 = vadd.f32 %v1564_v57, %v1396_v60  ;;  %1099 = vmatmul.bf16.gmra.mxu0 %v2759_v58 }
  0xc2   :  { %1268 = vmatmul.bf16.gmra.mxu1 %v2763_v59 }
  0xc3   :  { %1437 = vmatmul.bf16.gmra.mxu2 %v2767_v63 }
  0xc4   :  { %1606 = vmatmul.bf16.gmra.mxu3 %v2771_v0 }
  0xc6   :  { %v1398_v3 = vpop.f32.mrf.mxu2  ;;  %v1062_v6 = vpop.f32.mrf.mxu0 }
  0xc7   :  { %v1567_v4 = vpop.f32.mrf.mxu3  ;;  %v1399_v5 = vadd.f32 %v1398_v3, %v1230_v1  ;;  %v1231_v7 = vpop.f32.mrf.mxu1  ;;  %v2806_v1 = vld [vmem:[%s5905_s0 + $0x1a0] sm:$0xf]  ;;  %v3290_v3 = vld [vmem:[%s5905_s0 + $0x1ac] sm:$0xf0] }
  0xc8   :  { %v1232_v8 = vadd.f32 %v1231_v7, %v1062_v6  ;;  %v2814_v6 = vld [vmem:[%s5905_s0 + $0x1a8] sm:$0xf]  ;;  %v3291_v7 = vld [vmem:[%s5905_s0 + $0x1b4] sm:$0xf0]  ;;  %v2807_v13 = vor.u32 %v3290_v3, %v2806_v1  ;;  %v2840_v1 = vld [vmem:[%s5905_s0 + $0x1f0] sm:$0xf0] }
  0xc9   :  { %v3795_v9 = vadd.f32 %v1567_v4, %v1399_v5  ;;  %v3288_v4 = vld [vmem:[%s5905_s0 + $0x1a4] sm:$0xf]  ;;  %v2808_v5 = vld [vmem:[%s5905_s0 + $0x1b0] sm:$0xf0]  ;;  %v2846_v3 = vld [vmem:[%s5905_s0 + $0x1e8] sm:$0xf] }
  0xca   :  { %v2811_v14 = vor.u32 %v3288_v4, %v2808_v5  ;;  %v3299_v4 = vld [vmem:[%s5905_s0 + $0x1f4] sm:$0xf0]  ;;  %v3297_v5 = vld [vmem:[%s5905_s0 + $0x1ec] sm:$0xf] }
  0xce   :  { %v1400_v18 = vpop.f32.mrf.mxu2  ;;  %v1065_v24 = vpop.f32.mrf.mxu0 }
  0xcf   :  { %v1569_v19 = vpop.f32.mrf.mxu3  ;;  %v1401_v23 = vadd.f32 %v1400_v18, %v1232_v8  ;;  %v1234_v25 = vpop.f32.mrf.mxu1  ;;  %v3289_v8 = vld [vmem:[%s5905_s0 + $0x1ac] sm:$0xf]  ;;  %v2815_v18 = vor.u32 %v3291_v7, %v2814_v6  ;;  %v2848_v6 = vld [vmem:[%s5905_s0 + $0x1f8] sm:$0xf0] }
  0xd0   :  { %v1235_v28 = vadd.f32 %v1234_v25, %v1065_v24 }
  0xd1   :  { %v3821_v29 = vadd.f32 %v1569_v19, %v1401_v23  ;;  %1104 = vmatmul.bf16.gmra.mxu0 %v2775_v20  ;;  %v2819_v19 = vor.u32 %v3289_v8, %v2816_v10 }
  0xd2   :  { %1273 = vmatmul.bf16.gmra.mxu1 %v2779_v22 }
  0xd3   :  { %1442 = vmatmul.bf16.gmra.mxu2 %v2783_v26 }
  0xd4   :  { %1611 = vmatmul.bf16.gmra.mxu3 %v2787_v27 }
  0xd6   :  { %v1403_v30 = vpop.f32.mrf.mxu2  ;;  %v1067_v33 = vpop.f32.mrf.mxu0 }
  0xd7   :  { %v1572_v31 = vpop.f32.mrf.mxu3  ;;  %v1404_v32 = vadd.f32 %v1403_v30, %v1235_v28  ;;  %v1236_v34 = vpop.f32.mrf.mxu1 }
  0xd8   :  { %v1237_v35 = vadd.f32 %v1236_v34, %v1067_v33  ;;  %v3292_v33 = vld [vmem:[%s5905_s0 + $0x1c4] sm:$0xf]  ;;  %v2824_v34 = vld [vmem:[%s5905_s0 + $0x1d0] sm:$0xf0] }
  0xd9   :  { %v3823_v36 = vadd.f32 %v1572_v31, %v1404_v32  ;;  %v2822_v31 = vld [vmem:[%s5905_s0 + $0x1c0] sm:$0xf]  ;;  %v3294_v32 = vld [vmem:[%s5905_s0 + $0x1cc] sm:$0xf0]  ;;  %v2827_v44 = vor.u32 %v3292_v33, %v2824_v34  ;;  %v2856_v33 = vld [vmem:[%s5905_s0 + $0x210] sm:$0xf0] }
  0xda   :  { %v2823_v43 = vor.u32 %v3294_v32, %v2822_v31  ;;  %v3302_v31 = vld [vmem:[%s5905_s0 + $0x20c] sm:$0xf0]  ;;  %v3300_v32 = vld [vmem:[%s5905_s0 + $0x204] sm:$0xf]  ;;  %v2862_v34 = vld [vmem:[%s5905_s0 + $0x208] sm:$0xf] }
  0xde   :  { %v1405_v46 = vpop.f32.mrf.mxu2  ;;  %v1070_v52 = vpop.f32.mrf.mxu0 }
  0xdf   :  { %v1574_v48 = vpop.f32.mrf.mxu3  ;;  %v1406_v51 = vadd.f32 %v1405_v46, %v1237_v35  ;;  %v1239_v53 = vpop.f32.mrf.mxu1  ;;  %v2830_v35 = vld [vmem:[%s5905_s0 + $0x1c8] sm:$0xf] }
  0xe0   :  { %v1240_v56 = vadd.f32 %v1239_v53, %v1070_v52 }
  0xe1   :  { %v3849_v57 = vadd.f32 %v1574_v48, %v1406_v51  ;;  %1109 = vmatmul.bf16.gmra.mxu0 %v2791_v49  ;;  %v2831_v49 = vor.u32 %v3295_v37, %v2830_v35  ;;  %v3303_v35 = vld [vmem:[%s5905_s0 + $0x214] sm:$0xf0]  ;;  %v3301_v37 = vld [vmem:[%s5905_s0 + $0x20c] sm:$0xf] }
  0xe2   :  { %1278 = vmatmul.bf16.gmra.mxu1 %v2795_v50  ;;  %v2835_v50 = vor.u32 %v3293_v38, %v2832_v39  ;;  %v2864_v38 = vld [vmem:[%s5905_s0 + $0x218] sm:$0xf0] }
  0xe3   :  { %1447 = vmatmul.bf16.gmra.mxu2 %v2799_v54 }
  0xe4   :  { %1616 = vmatmul.bf16.gmra.mxu3 %v2803_v55 }
  0xe6   :  { %v1408_v58 = vpop.f32.mrf.mxu2  ;;  %v1072_v61 = vpop.f32.mrf.mxu0 }
  0xe7   :  { %v1577_v59 = vpop.f32.mrf.mxu3  ;;  %v1409_v60 = vadd.f32 %v1408_v58, %v1240_v56  ;;  %v1241_v62 = vpop.f32.mrf.mxu1 }
  0xe8   :  { %v1242_v63 = vadd.f32 %v1241_v62, %v1072_v61  ;;  %v2838_v61 = vld [vmem:[%s5905_s0 + $0x1e0] sm:$0xf]  ;;  %v3298_v62 = vld [vmem:[%s5905_s0 + $0x1ec] sm:$0xf0] }
  0xe9   :  { %v3851_v0 = vadd.f32 %v1577_v59, %v1409_v60  ;;  %v2839_v10 = vor.u32 %v3298_v62, %v2838_v61  ;;  %v2870_v62 = vld [vmem:[%s5905_s0 + $0x220] sm:$0xf] }
  0xee   :  { %v1410_v11 = vpop.f32.mrf.mxu2  ;;  %v1075_v16 = vpop.f32.mrf.mxu0 }
  0xef   :  { %v1579_v12 = vpop.f32.mrf.mxu3  ;;  %v1411_v15 = vadd.f32 %v1410_v11, %v1242_v63  ;;  %v1244_v17 = vpop.f32.mrf.mxu1  ;;  %v3296_v63 = vld [vmem:[%s5905_s0 + $0x1e4] sm:$0xf] }
  0xf0   :  { %v1245_v20 = vadd.f32 %v1244_v17, %v1075_v16  ;;  %v2843_v11 = vor.u32 %v3296_v63, %v2840_v1  ;;  %v2851_v16 = vor.u32 %v3297_v5, %v2848_v6  ;;  %v3306_v63 = vld [vmem:[%s5905_s0 + $0x22c] sm:$0xf0]  ;;  %v3304_v1 = vld [vmem:[%s5905_s0 + $0x224] sm:$0xf]  ;;  %v3307_v5 = vld [vmem:[%s5905_s0 + $0x234] sm:$0xf0] }
  0xf1   :  { %v3877_v22 = vadd.f32 %v1579_v12, %v1411_v15  ;;  %1114 = vmatmul.bf16.gmra.mxu0 %v2807_v13  ;;  %v2847_v15 = vor.u32 %v3299_v4, %v2846_v3  ;;  %v2872_v3 = vld [vmem:[%s5905_s0 + $0x230] sm:$0xf0]  ;;  %v2878_v4 = vld [vmem:[%s5905_s0 + $0x228] sm:$0xf]  ;;  %v3305_v6 = vld [vmem:[%s5905_s0 + $0x22c] sm:$0xf] }
  0xf2   :  { %1283 = vmatmul.bf16.gmra.mxu1 %v2811_v14 }
  0xf3   :  { %1452 = vmatmul.bf16.gmra.mxu2 %v2815_v18 }
  0xf4   :  { %1621 = vmatmul.bf16.gmra.mxu3 %v2819_v19 }
  0xf6   :  { %v1413_v23 = vpop.f32.mrf.mxu2  ;;  %v1077_v26 = vpop.f32.mrf.mxu0 }
  0xf7   :  { %v1582_v24 = vpop.f32.mrf.mxu3  ;;  %v1414_v25 = vadd.f32 %v1413_v23, %v1245_v20  ;;  %v1246_v27 = vpop.f32.mrf.mxu1 }
  0xf8   :  { %v1247_v28 = vadd.f32 %v1246_v27, %v1077_v26 }
  0xf9   :  { %v3879_v30 = vadd.f32 %v1582_v24, %v1414_v25 }
  0xfb   :  { %5999 = vst [vmem:[#allocation2_spill] sm:$0xff] %v3879_v30 }
  0xfe   :  { %v1415_v41 = vpop.f32.mrf.mxu2  ;;  %v1080_v46 = vpop.f32.mrf.mxu0 }
  0xff   :  { %v1584_v42 = vpop.f32.mrf.mxu3  ;;  %v1416_v45 = vadd.f32 %v1415_v41, %v1247_v28  ;;  %v1249_v48 = vpop.f32.mrf.mxu1  ;;  %v2854_v28 = vld [vmem:[%s5905_s0 + $0x200] sm:$0xf] }
 0x100   :  { %v1250_v51 = vadd.f32 %v1249_v48, %v1080_v46  ;;  %v2863_v48 = vor.u32 %v3303_v35, %v2862_v34  ;;  %v3310_v34 = vld [vmem:[%s5905_s0 + $0x24c] sm:$0xf0]  ;;  %v3308_v35 = vld [vmem:[%s5905_s0 + $0x244] sm:$0xf] }
 0x101   :  { %v3905_v52 = vadd.f32 %v1584_v42, %v1416_v45  ;;  %1119 = vmatmul.bf16.gmra.mxu0 %v2823_v43  ;;  %v2855_v42 = vor.u32 %v3302_v31, %v2854_v28  ;;  %v2859_v43 = vor.u32 %v3300_v32, %v2856_v33  ;;  %v2886_v33 = vld [vmem:[%s5905_s0 + $0x240] sm:$0xf] }
 0x102   :  { %1288 = vmatmul.bf16.gmra.mxu1 %v2827_v44 }
 0x103   :  { %6000 = vst [vmem:[#allocation3_spill] sm:$0xff] %v3905_v52  ;;  %1457 = vmatmul.bf16.gmra.mxu2 %v2831_v49  ;;  %v2867_v49 = vor.u32 %v3301_v37, %v2864_v38  ;;  %v2888_v37 = vld [vmem:[%s5905_s0 + $0x250] sm:$0xf0]  ;;  %v2894_v38 = vld [vmem:[%s5905_s0 + $0x248] sm:$0xf] }
 0x104   :  { %1626 = vmatmul.bf16.gmra.mxu3 %v2835_v50 }
 0x106   :  { %v1418_v53 = vpop.f32.mrf.mxu2  ;;  %v1082_v56 = vpop.f32.mrf.mxu0 }
 0x107   :  { %v1587_v54 = vpop.f32.mrf.mxu3  ;;  %v1419_v55 = vadd.f32 %v1418_v53, %v1250_v51  ;;  %v1251_v58 = vpop.f32.mrf.mxu1 }
 0x108   :  { %v1252_v59 = vadd.f32 %v1251_v58, %v1082_v56 }
 0x109   :  { %v3907_v60 = vadd.f32 %v1587_v54, %v1419_v55 }
 0x10b   :  { %6001 = vst [vmem:[#allocation4_spill] sm:$0xff] %v3907_v60 }
 0x10e   :  { %v1420_v7 = vpop.f32.mrf.mxu2  ;;  %v1085_v13 = vpop.f32.mrf.mxu0 }
 0x10f   :  { %v1589_v8 = vpop.f32.mrf.mxu3  ;;  %v1421_v12 = vadd.f32 %v1420_v7, %v1252_v59  ;;  %v1254_v14 = vpop.f32.mrf.mxu1  ;;  %v2880_v7 = vld [vmem:[%s5905_s0 + $0x238] sm:$0xf0] }
 0x110   :  { %v1255_v17 = vadd.f32 %v1254_v14, %v1085_v13 }
 0x111   :  { %v3933_v18 = vadd.f32 %v1589_v8, %v1421_v12  ;;  %1124 = vmatmul.bf16.gmra.mxu0 %v2839_v10  ;;  %v2875_v12 = vor.u32 %v3304_v1, %v2872_v3 }
 0x112   :  { %1293 = vmatmul.bf16.gmra.mxu1 %v2843_v11  ;;  %v2871_v11 = vor.u32 %v3306_v63, %v2870_v62 }
 0x113   :  { %6002 = vst [vmem:[#allocation5_spill] sm:$0xff] %v3933_v18  ;;  %1462 = vmatmul.bf16.gmra.mxu2 %v2847_v15 }
 0x114   :  { %1631 = vmatmul.bf16.gmra.mxu3 %v2851_v16  ;;  %v2879_v16 = vor.u32 %v3307_v5, %v2878_v4  ;;  %v2902_v5 = vld [vmem:[%s5905_s0 + $0x260] sm:$0xf] }
 0x116   :  { %v1423_v19 = vpop.f32.mrf.mxu2  ;;  %v1087_v24 = vpop.f32.mrf.mxu0 }
 0x117   :  { %v1592_v20 = vpop.f32.mrf.mxu3  ;;  %v1424_v23 = vadd.f32 %v1423_v19, %v1255_v17  ;;  %v1256_v25 = vpop.f32.mrf.mxu1  ;;  %v2883_v17 = vor.u32 %v3305_v6, %v2880_v7  ;;  %v3314_v6 = vld [vmem:[%s5905_s0 + $0x26c] sm:$0xf0]  ;;  %v3312_v7 = vld [vmem:[%s5905_s0 + $0x264] sm:$0xf] }
 0x118   :  { %v1257_v26 = vadd.f32 %v1256_v25, %v1087_v24 }
 0x119   :  { %v3935_v27 = vadd.f32 %v1592_v20, %v1424_v23 }
 0x11b   :  { %6003 = vst [vmem:[#allocation6_spill] sm:$0xff] %v3935_v27 }
 0x11e   :  { %v1425_v39 = vpop.f32.mrf.mxu2  ;;  %v1090_v45 = vpop.f32.mrf.mxu0 }
 0x11f   :  { %v1594_v41 = vpop.f32.mrf.mxu3  ;;  %v1426_v44 = vadd.f32 %v1425_v39, %v1257_v26  ;;  %v1259_v46 = vpop.f32.mrf.mxu1  ;;  %v3311_v39 = vld [vmem:[%s5905_s0 + $0x254] sm:$0xf0] }
 0x120   :  { %v1260_v50 = vadd.f32 %v1259_v46, %v1090_v45  ;;  %v2887_v45 = vor.u32 %v3310_v34, %v2886_v33  ;;  %v2891_v46 = vor.u32 %v3308_v35, %v2888_v37 }
 0x121   :  { %v3961_v51 = vadd.f32 %v1594_v41, %v1426_v44  ;;  %1129 = vmatmul.bf16.gmra.mxu0 %v2855_v42  ;;  %v3309_v41 = vld [vmem:[%s5905_s0 + $0x24c] sm:$0xf]  ;;  %v2896_v42 = vld [vmem:[%s5905_s0 + $0x258] sm:$0xf0] }
 0x122   :  { %1298 = vmatmul.bf16.gmra.mxu1 %v2859_v43 }
 0x123   :  { %6004 = vst [vmem:[#allocation7_spill] sm:$0xff] %v3961_v51  ;;  %1467 = vmatmul.bf16.gmra.mxu2 %v2863_v48 }
 0x124   :  { %1636 = vmatmul.bf16.gmra.mxu3 %v2867_v49 }
 0x126   :  { %v1428_v53 = vpop.f32.mrf.mxu2  ;;  %v1092_v56 = vpop.f32.mrf.mxu0 }
 0x127   :  { %v1597_v54 = vpop.f32.mrf.mxu3  ;;  %v1429_v55 = vadd.f32 %v1428_v53, %v1260_v50  ;;  %v1261_v58 = vpop.f32.mrf.mxu1  ;;  %v2895_v53 = vor.u32 %v3311_v39, %v2894_v38 }
 0x128   :  { %v1262_v59 = vadd.f32 %v1261_v58, %v1092_v56 }
 0x129   :  { %v3963_v61 = vadd.f32 %v1597_v54, %v1429_v55  ;;  %v2899_v54 = vor.u32 %v3309_v41, %v2896_v42  ;;  %v2918_v42 = vld [vmem:[%s5905_s0 + $0x280] sm:$0xf] }
 0x12b   :  { %6005 = vst [vmem:[#allocation8_spill] sm:$0xff] %v3963_v61 }
 0x12e   :  { %v1430_v8 = vpop.f32.mrf.mxu2  ;;  %v1095_v14 = vpop.f32.mrf.mxu0 }
 0x12f   :  { %v1599_v10 = vpop.f32.mrf.mxu3  ;;  %v1431_v13 = vadd.f32 %v1430_v8, %v1262_v59  ;;  %v1264_v15 = vpop.f32.mrf.mxu1  ;;  %v2904_v8 = vld [vmem:[%s5905_s0 + $0x270] sm:$0xf0] }
 0x130   :  { %v1265_v19 = vadd.f32 %v1264_v15, %v1095_v14 }
 0x131   :  { %v3989_v20 = vadd.f32 %v1599_v10, %v1431_v13  ;;  %1134 = vmatmul.bf16.gmra.mxu0 %v2871_v11  ;;  %v2910_v10 = vld [vmem:[%s5905_s0 + $0x268] sm:$0xf]  ;;  %v3315_v11 = vld [vmem:[%s5905_s0 + $0x274] sm:$0xf0]  ;;  %v2912_v13 = vld [vmem:[%s5905_s0 + $0x278] sm:$0xf0] }
 0x132   :  { %1303 = vmatmul.bf16.gmra.mxu1 %v2875_v12  ;;  %v3313_v12 = vld [vmem:[%s5905_s0 + $0x26c] sm:$0xf] }
 0x133   :  { %6006 = vst [vmem:[#allocation9_spill] sm:$0xff] %v3989_v20  ;;  %1472 = vmatmul.bf16.gmra.mxu2 %v2879_v16  ;;  %v2903_v16 = vor.u32 %v3314_v6, %v2902_v5 }
 0x134   :  { %1641 = vmatmul.bf16.gmra.mxu3 %v2883_v17  ;;  %v2907_v17 = vor.u32 %v3312_v7, %v2904_v8 }
 0x136   :  { %v1433_v23 = vpop.f32.mrf.mxu2  ;;  %v1097_v26 = vpop.f32.mrf.mxu0 }
 0x137   :  { %v1602_v24 = vpop.f32.mrf.mxu3  ;;  %v1434_v25 = vadd.f32 %v1433_v23, %v1265_v19  ;;  %v1266_v28 = vpop.f32.mrf.mxu1 }
 0x138   :  { %v1267_v31 = vadd.f32 %v1266_v28, %v1097_v26  ;;  %v2915_v26 = vor.u32 %v3313_v12, %v2912_v13 }
 0x139   :  { %v3991_v32 = vadd.f32 %v1602_v24, %v1434_v25  ;;  %v2911_v25 = vor.u32 %v3315_v11, %v2910_v10 }
 0x13b   :  { %6007 = vst [vmem:[#allocation10_spill] sm:$0xff] %v3991_v32 }
 0x13e   :  { %v1435_v43 = vpop.f32.mrf.mxu2  ;;  %v1100_v49 = vpop.f32.mrf.mxu0 }
 0x13f   :  { %v1604_v44 = vpop.f32.mrf.mxu3  ;;  %v1436_v48 = vadd.f32 %v1435_v43, %v1267_v31  ;;  %v1269_v50 = vpop.f32.mrf.mxu1  ;;  %v3318_v43 = vld [vmem:[%s5905_s0 + $0x28c] sm:$0xf0] }
 0x140   :  { %v1270_v55 = vadd.f32 %v1269_v50, %v1100_v49  ;;  %v3317_v49 = vld [vmem:[%s5905_s0 + $0x28c] sm:$0xf]  ;;  %v2928_v50 = vld [vmem:[%s5905_s0 + $0x298] sm:$0xf0] }
 0x141   :  { %v4017_v56 = vadd.f32 %v1604_v44, %v1436_v48  ;;  %1139 = vmatmul.bf16.gmra.mxu0 %v2887_v45  ;;  %v3316_v44 = vld [vmem:[%s5905_s0 + $0x284] sm:$0xf]  ;;  %v2920_v45 = vld [vmem:[%s5905_s0 + $0x290] sm:$0xf0]  ;;  %v3319_v48 = vld [vmem:[%s5905_s0 + $0x294] sm:$0xf0] }
 0x142   :  { %1308 = vmatmul.bf16.gmra.mxu1 %v2891_v46  ;;  %v2926_v46 = vld [vmem:[%s5905_s0 + $0x288] sm:$0xf] }
 0x143   :  { %6008 = vst [vmem:[#allocation11_spill] sm:$0xff] %v4017_v56  ;;  %1477 = vmatmul.bf16.gmra.mxu2 %v2895_v53 }
 0x144   :  { %1646 = vmatmul.bf16.gmra.mxu3 %v2899_v54 }
 0x146   :  { %v1438_v58 = vpop.f32.mrf.mxu2  ;;  %v1102_v63 = vpop.f32.mrf.mxu0 }
 0x147   :  { %v1607_v59 = vpop.f32.mrf.mxu3  ;;  %v1439_v62 = vadd.f32 %v1438_v58, %v1270_v55  ;;  %v1271_v1 = vpop.f32.mrf.mxu1  ;;  %v2919_v55 = vor.u32 %v3318_v43, %v2918_v42  ;;  %v2923_v58 = vor.u32 %v3316_v44, %v2920_v45 }
 0x148   :  { %v1272_v3 = vadd.f32 %v1271_v1, %v1102_v63  ;;  %v2927_v1 = vor.u32 %v3319_v48, %v2926_v46 }
 0x149   :  { %v4019_v4 = vadd.f32 %v1607_v59, %v1439_v62 }
 0x14b   :  { %6009 = vst [vmem:[#allocation12_spill] sm:$0xff] %v4019_v4 }
 0x14e   :  { %v1440_v14 = vpop.f32.mrf.mxu2  ;;  %v1105_v23 = vpop.f32.mrf.mxu0 }
 0x14f   :  { %v1609_v15 = vpop.f32.mrf.mxu3  ;;  %v1441_v19 = vadd.f32 %v1440_v14, %v1272_v3  ;;  %v1274_v24 = vpop.f32.mrf.mxu1  ;;  %v2931_v3 = vor.u32 %v3317_v49, %v2928_v50 }
 0x150   :  { %v1275_v28 = vadd.f32 %v1274_v24, %v1105_v23  ;;  %v2942_v23 = vld [vmem:[%s5905_s0 + $0x2a8] sm:$0xf]  ;;  %v3323_v24 = vld [vmem:[%s5905_s0 + $0x2b4] sm:$0xf0] }
 0x151   :  { %v4045_v31 = vadd.f32 %v1609_v15, %v1441_v19  ;;  %1144 = vmatmul.bf16.gmra.mxu0 %v2903_v16  ;;  %v2934_v15 = vld [vmem:[%s5905_s0 + $0x2a0] sm:$0xf]  ;;  %v3322_v16 = vld [vmem:[%s5905_s0 + $0x2ac] sm:$0xf0]  ;;  %v2936_v19 = vld [vmem:[%s5905_s0 + $0x2b0] sm:$0xf0]  ;;  %v2943_v42 = vor.u32 %v3323_v24, %v2942_v23 }
 0x152   :  { %1313 = vmatmul.bf16.gmra.mxu1 %v2907_v17  ;;  %v3320_v17 = vld [vmem:[%s5905_s0 + $0x2a4] sm:$0xf] }
 0x153   :  { %6010 = vst [vmem:[#allocation13_spill] sm:$0xff] %v4045_v31  ;;  %1482 = vmatmul.bf16.gmra.mxu2 %v2911_v25  ;;  %v3321_v25 = vld [vmem:[%s5905_s0 + $0x2ac] sm:$0xf] }
 0x154   :  { %1651 = vmatmul.bf16.gmra.mxu3 %v2915_v26  ;;  %v2944_v26 = vld [vmem:[%s5905_s0 + $0x2b8] sm:$0xf0] }
 0x155   :  { %v2947_v43 = vor.u32 %v3321_v25, %v2944_v26 }
 0x156   :  { %v1443_v33 = vpop.f32.mrf.mxu2  ;;  %v1107_v37 = vpop.f32.mrf.mxu0 }
 0x157   :  { %v1612_v34 = vpop.f32.mrf.mxu3  ;;  %v1444_v35 = vadd.f32 %v1443_v33, %v1275_v28  ;;  %v1276_v38 = vpop.f32.mrf.mxu1 }
 0x158   :  { %v1277_v39 = vadd.f32 %v1276_v38, %v1107_v37 }
 0x159   :  { %v4047_v41 = vadd.f32 %v1612_v34, %v1444_v35  ;;  %v2935_v34 = vor.u32 %v3322_v16, %v2934_v15  ;;  %v2939_v35 = vor.u32 %v3320_v17, %v2936_v19 }
 0x15b   :  { %6011 = vst [vmem:[#allocation14_spill] sm:$0xff] %v4047_v41 }
 0x15e   :  { %v1445_v53 = vpop.f32.mrf.mxu2  ;;  %v1110_v62 = vpop.f32.mrf.mxu0 }
 0x15f   :  { %v1614_v54 = vpop.f32.mrf.mxu3  ;;  %v1446_v59 = vadd.f32 %v1445_v53, %v1277_v39  ;;  %v1279_v63 = vpop.f32.mrf.mxu1 }
 0x160   :  { %v1280_v5 = vadd.f32 %v1279_v63, %v1110_v62  ;;  %v3324_v62 = vld [vmem:[%s5905_s0 + $0x2c4] sm:$0xf]  ;;  %v2952_v63 = vld [vmem:[%s5905_s0 + $0x2d0] sm:$0xf0] }
 0x161   :  { %v4073_v6 = vadd.f32 %v1614_v54, %v1446_v59  ;;  %1149 = vmatmul.bf16.gmra.mxu0 %v2919_v55  ;;  %v3326_v59 = vld [vmem:[%s5905_s0 + $0x2cc] sm:$0xf0] }
 0x162   :  { %1318 = vmatmul.bf16.gmra.mxu1 %v2923_v58  ;;  %v2950_v58 = vld [vmem:[%s5905_s0 + $0x2c0] sm:$0xf] }
 0x163   :  { %6012 = vst [vmem:[#allocation15_spill] sm:$0xff] %v4073_v6  ;;  %1487 = vmatmul.bf16.gmra.mxu2 %v2927_v1  ;;  %v2958_v1 = vld [vmem:[%s5905_s0 + $0x2c8] sm:$0xf] }
 0x164   :  { %1656 = vmatmul.bf16.gmra.mxu3 %v2931_v3  ;;  %v3327_v3 = vld [vmem:[%s5905_s0 + $0x2d4] sm:$0xf0] }
 0x165   :  { %v2959_v17 = vor.u32 %v3327_v3, %v2958_v1 }
 0x166   :  { %v1448_v7 = vpop.f32.mrf.mxu2  ;;  %v1112_v11 = vpop.f32.mrf.mxu0 }
 0x167   :  { %v1617_v8 = vpop.f32.mrf.mxu3  ;;  %v1449_v10 = vadd.f32 %v1448_v7, %v1280_v5  ;;  %v1281_v12 = vpop.f32.mrf.mxu1  ;;  %v3325_v5 = vld [vmem:[%s5905_s0 + $0x2cc] sm:$0xf]  ;;  %v2960_v7 = vld [vmem:[%s5905_s0 + $0x2d8] sm:$0xf0] }
 0x168   :  { %v1282_v13 = vadd.f32 %v1281_v12, %v1112_v11  ;;  %v2951_v11 = vor.u32 %v3326_v59, %v2950_v58  ;;  %v2955_v12 = vor.u32 %v3324_v62, %v2952_v63  ;;  %v2963_v19 = vor.u32 %v3325_v5, %v2960_v7 }
 0x169   :  { %v4075_v14 = vadd.f32 %v1617_v8, %v1449_v10 }
 0x16b   :  { %6013 = vst [vmem:[#allocation16_spill] sm:$0xff] %v4075_v14 }
 0x16e   :  { %v1450_v28 = vpop.f32.mrf.mxu2  ;;  %v1115_v38 = vpop.f32.mrf.mxu0 }
 0x16f   :  { %v1619_v33 = vpop.f32.mrf.mxu3  ;;  %v1451_v37 = vadd.f32 %v1450_v28, %v1282_v13  ;;  %v1284_v39 = vpop.f32.mrf.mxu1 }
 0x170   :  { %v1285_v44 = vadd.f32 %v1284_v39, %v1115_v38  ;;  %v2966_v38 = vld [vmem:[%s5905_s0 + $0x2e0] sm:$0xf]  ;;  %v3330_v39 = vld [vmem:[%s5905_s0 + $0x2ec] sm:$0xf0] }
 0x171   :  { %v4101_v45 = vadd.f32 %v1619_v33, %v1451_v37  ;;  %1154 = vmatmul.bf16.gmra.mxu0 %v2935_v34 }
 0x172   :  { %1323 = vmatmul.bf16.gmra.mxu1 %v2939_v35 }
 0x173   :  { %6014 = vst [vmem:[#allocation17_spill] sm:$0xff] %v4101_v45  ;;  %1492 = vmatmul.bf16.gmra.mxu2 %v2943_v42  ;;  %v3328_v42 = vld [vmem:[%s5905_s0 + $0x2e4] sm:$0xf] }
 0x174   :  { %1661 = vmatmul.bf16.gmra.mxu3 %v2947_v43  ;;  %v2968_v43 = vld [vmem:[%s5905_s0 + $0x2f0] sm:$0xf0] }
 0x175   :  { %v2971_v58 = vor.u32 %v3328_v42, %v2968_v43 }
 0x176   :  { %v1453_v46 = vpop.f32.mrf.mxu2  ;;  %v1117_v50 = vpop.f32.mrf.mxu0 }
 0x177   :  { %v1622_v48 = vpop.f32.mrf.mxu3  ;;  %v1454_v49 = vadd.f32 %v1453_v46, %v1285_v44  ;;  %v1286_v53 = vpop.f32.mrf.mxu1  ;;  %v2974_v44 = vld [vmem:[%s5905_s0 + $0x2e8] sm:$0xf]  ;;  %v3331_v46 = vld [vmem:[%s5905_s0 + $0x2f4] sm:$0xf0] }
 0x178   :  { %v1287_v54 = vadd.f32 %v1286_v53, %v1117_v50  ;;  %v2975_v1 = vor.u32 %v3331_v46, %v2974_v44 }
 0x179   :  { %v4103_v55 = vadd.f32 %v1622_v48, %v1454_v49  ;;  %v3329_v48 = vld [vmem:[%s5905_s0 + $0x2ec] sm:$0xf]  ;;  %v2976_v49 = vld [vmem:[%s5905_s0 + $0x2f8] sm:$0xf0] }
 0x17a   :  { %v2979_v3 = vor.u32 %v3329_v48, %v2976_v49 }
 0x17b   :  { %6015 = vst [vmem:[#allocation18_spill] sm:$0xff] %v4103_v55 }
 0x17e   :  { %v1455_v8 = vpop.f32.mrf.mxu2  ;;  %v1120_v15 = vpop.f32.mrf.mxu0 }
 0x17f   :  { %v1624_v10 = vpop.f32.mrf.mxu3  ;;  %v1456_v13 = vadd.f32 %v1455_v8, %v1287_v54  ;;  %v1289_v16 = vpop.f32.mrf.mxu1  ;;  %v2967_v54 = vor.u32 %v3330_v39, %v2966_v38 }
 0x180   :  { %v1290_v23 = vadd.f32 %v1289_v16, %v1120_v15 }
 0x181   :  { %v4129_v24 = vadd.f32 %v1624_v10, %v1456_v13  ;;  %1159 = vmatmul.bf16.gmra.mxu0 %v2951_v11 }
 0x182   :  { %1328 = vmatmul.bf16.gmra.mxu1 %v2955_v12 }
 0x183   :  { %6016 = vst [vmem:[#allocation19_spill] sm:$0xff] %v4129_v24  ;;  %1497 = vmatmul.bf16.gmra.mxu2 %v2959_v17  ;;  %v2982_v17 = vld [vmem:[%s5905_s0 + $0x300] sm:$0xf] }
 0x184   :  { %1666 = vmatmul.bf16.gmra.mxu3 %v2963_v19  ;;  %v3334_v19 = vld [vmem:[%s5905_s0 + $0x30c] sm:$0xf0] }
 0x185   :  { %v2983_v39 = vor.u32 %v3334_v19, %v2982_v17  ;;  %v3008_v17 = vld [vmem:[%s5905_s0 + $0x338] sm:$0xf0] }
 0x186   :  { %v1458_v25 = vpop.f32.mrf.mxu2  ;;  %v1122_v33 = vpop.f32.mrf.mxu0 }
 0x187   :  { %v1627_v26 = vpop.f32.mrf.mxu3  ;;  %v1459_v28 = vadd.f32 %v1458_v25, %v1290_v23  ;;  %v1291_v34 = vpop.f32.mrf.mxu1  ;;  %v3332_v23 = vld [vmem:[%s5905_s0 + $0x304] sm:$0xf]  ;;  %v2984_v25 = vld [vmem:[%s5905_s0 + $0x310] sm:$0xf0] }
 0x188   :  { %v1292_v35 = vadd.f32 %v1291_v34, %v1122_v33  ;;  %v3333_v33 = vld [vmem:[%s5905_s0 + $0x30c] sm:$0xf]  ;;  %v2992_v34 = vld [vmem:[%s5905_s0 + $0x318] sm:$0xf0]  ;;  %v2987_v42 = vor.u32 %v3332_v23, %v2984_v25 }
 0x189   :  { %v4131_v37 = vadd.f32 %v1627_v26, %v1459_v28  ;;  %v2990_v26 = vld [vmem:[%s5905_s0 + $0x308] sm:$0xf]  ;;  %v3335_v28 = vld [vmem:[%s5905_s0 + $0x314] sm:$0xf0]  ;;  %v2995_v49 = vor.u32 %v3333_v33, %v2992_v34 }
 0x18a   :  { %v2991_v48 = vor.u32 %v3335_v28, %v2990_v26 }
 0x18b   :  { %6017 = vst [vmem:[#allocation20_spill] sm:$0xff] %v4131_v37 }
 0x18e   :  { %v1460_v50 = vpop.f32.mrf.mxu2  ;;  %v1125_v62 = vpop.f32.mrf.mxu0 }
 0x18f   :  { %v1629_v53 = vpop.f32.mrf.mxu3  ;;  %v1461_v59 = vadd.f32 %v1460_v50, %v1292_v35  ;;  %v1294_v63 = vpop.f32.mrf.mxu1 }
 0x190   :  { %v1295_v5 = vadd.f32 %v1294_v63, %v1125_v62 }
 0x191   :  { %v4157_v7 = vadd.f32 %v1629_v53, %v1461_v59  ;;  %1164 = vmatmul.bf16.gmra.mxu0 %v2967_v54 }
 0x192   :  { %1333 = vmatmul.bf16.gmra.mxu1 %v2971_v58 }
 0x193   :  { %6018 = vst [vmem:[#allocation21_spill] sm:$0xff] %v4157_v7  ;;  %1502 = vmatmul.bf16.gmra.mxu2 %v2975_v1 }
 0x194   :  { %1671 = vmatmul.bf16.gmra.mxu3 %v2979_v3 }
 0x196   :  { %v1463_v8 = vpop.f32.mrf.mxu2  ;;  %v1127_v12 = vpop.f32.mrf.mxu0 }
 0x197   :  { %v1632_v10 = vpop.f32.mrf.mxu3  ;;  %v1464_v11 = vadd.f32 %v1463_v8, %v1295_v5  ;;  %v1296_v13 = vpop.f32.mrf.mxu1  ;;  %v2998_v5 = vld [vmem:[%s5905_s0 + $0x320] sm:$0xf]  ;;  %v3338_v8 = vld [vmem:[%s5905_s0 + $0x32c] sm:$0xf0] }
 0x198   :  { %v1297_v15 = vadd.f32 %v1296_v13, %v1127_v12  ;;  %v3006_v12 = vld [vmem:[%s5905_s0 + $0x328] sm:$0xf]  ;;  %v3339_v13 = vld [vmem:[%s5905_s0 + $0x334] sm:$0xf0]  ;;  %v2999_v25 = vor.u32 %v3338_v8, %v2998_v5  ;;  %v3341_v8 = vld [vmem:[%s5905_s0 + $0x34c] sm:$0xf] }
 0x199   :  { %v4159_v16 = vadd.f32 %v1632_v10, %v1464_v11  ;;  %v3336_v10 = vld [vmem:[%s5905_s0 + $0x324] sm:$0xf]  ;;  %v3000_v11 = vld [vmem:[%s5905_s0 + $0x330] sm:$0xf0]  ;;  %v3343_v5 = vld [vmem:[%s5905_s0 + $0x354] sm:$0xf0] }
 0x19a   :  { %v3003_v26 = vor.u32 %v3336_v10, %v3000_v11  ;;  %v3024_v10 = vld [vmem:[%s5905_s0 + $0x358] sm:$0xf0] }
 0x19b   :  { %6019 = vst [vmem:[#allocation22_spill] sm:$0xff] %v4159_v16 }
 0x19e   :  { %v1465_v35 = vpop.f32.mrf.mxu2  ;;  %v1130_v44 = vpop.f32.mrf.mxu0 }
 0x19f   :  { %v1634_v38 = vpop.f32.mrf.mxu3  ;;  %v1466_v43 = vadd.f32 %v1465_v35, %v1297_v15  ;;  %v1299_v46 = vpop.f32.mrf.mxu1  ;;  %v3337_v15 = vld [vmem:[%s5905_s0 + $0x32c] sm:$0xf]  ;;  %v3007_v35 = vor.u32 %v3339_v13, %v3006_v12 }
 0x1a0   :  { %v1300_v50 = vadd.f32 %v1299_v46, %v1130_v44 }
 0x1a1   :  { %v4185_v53 = vadd.f32 %v1634_v38, %v1466_v43  ;;  %1169 = vmatmul.bf16.gmra.mxu0 %v2983_v39  ;;  %v3011_v38 = vor.u32 %v3337_v15, %v3008_v17 }
 0x1a2   :  { %1338 = vmatmul.bf16.gmra.mxu1 %v2987_v42 }
 0x1a3   :  { %6020 = vst [vmem:[#allocation23_spill] sm:$0xff] %v4185_v53  ;;  %1507 = vmatmul.bf16.gmra.mxu2 %v2991_v48 }
 0x1a4   :  { %1676 = vmatmul.bf16.gmra.mxu3 %v2995_v49 }
 0x1a6   :  { %v1468_v54 = vpop.f32.mrf.mxu2  ;;  %v1132_v62 = vpop.f32.mrf.mxu0 }
 0x1a7   :  { %v1637_v58 = vpop.f32.mrf.mxu3  ;;  %v1469_v59 = vadd.f32 %v1468_v54, %v1300_v50  ;;  %v1301_v63 = vpop.f32.mrf.mxu1 }
 0x1a8   :  { %v1302_v1 = vadd.f32 %v1301_v63, %v1132_v62  ;;  %v3340_v62 = vld [vmem:[%s5905_s0 + $0x344] sm:$0xf]  ;;  %v3016_v63 = vld [vmem:[%s5905_s0 + $0x350] sm:$0xf0] }
 0x1a9   :  { %v4187_v3 = vadd.f32 %v1637_v58, %v1469_v59  ;;  %v3014_v58 = vld [vmem:[%s5905_s0 + $0x340] sm:$0xf]  ;;  %v3342_v59 = vld [vmem:[%s5905_s0 + $0x34c] sm:$0xf0]  ;;  %v3019_v15 = vor.u32 %v3340_v62, %v3016_v63  ;;  %v3347_v62 = vld [vmem:[%s5905_s0 + $0x374] sm:$0xf0] }
 0x1aa   :  { %v3015_v13 = vor.u32 %v3342_v59, %v3014_v58  ;;  %v3032_v58 = vld [vmem:[%s5905_s0 + $0x370] sm:$0xf0]  ;;  %v3038_v59 = vld [vmem:[%s5905_s0 + $0x368] sm:$0xf]  ;;  %v3345_v63 = vld [vmem:[%s5905_s0 + $0x36c] sm:$0xf] }
 0x1ab   :  { %6021 = vst [vmem:[#allocation24_spill] sm:$0xff] %v4187_v3 }
 0x1ae   :  { %v1470_v19 = vpop.f32.mrf.mxu2  ;;  %v1135_v33 = vpop.f32.mrf.mxu0 }
 0x1af   :  { %v1639_v23 = vpop.f32.mrf.mxu3  ;;  %v1471_v28 = vadd.f32 %v1470_v19, %v1302_v1  ;;  %v1304_v34 = vpop.f32.mrf.mxu1  ;;  %v3022_v1 = vld [vmem:[%s5905_s0 + $0x348] sm:$0xf] }
 0x1b0   :  { %v1305_v39 = vadd.f32 %v1304_v34, %v1135_v33 }
 0x1b1   :  { %v4213_v42 = vadd.f32 %v1639_v23, %v1471_v28  ;;  %1174 = vmatmul.bf16.gmra.mxu0 %v2999_v25  ;;  %v3023_v25 = vor.u32 %v3343_v5, %v3022_v1  ;;  %v3040_v1 = vld [vmem:[%s5905_s0 + $0x378] sm:$0xf0] }
 0x1b2   :  { %1343 = vmatmul.bf16.gmra.mxu1 %v3003_v26  ;;  %v3027_v26 = vor.u32 %v3341_v8, %v3024_v10 }
 0x1b3   :  { %6022 = vst [vmem:[#allocation25_spill] sm:$0xff] %v4213_v42  ;;  %1512 = vmatmul.bf16.gmra.mxu2 %v3007_v35 }
 0x1b4   :  { %1681 = vmatmul.bf16.gmra.mxu3 %v3011_v38 }
 0x1b6   :  { %v1473_v43 = vpop.f32.mrf.mxu2  ;;  %v1137_v48 = vpop.f32.mrf.mxu0 }
 0x1b7   :  { %v1642_v44 = vpop.f32.mrf.mxu3  ;;  %v1474_v46 = vadd.f32 %v1473_v43, %v1305_v39  ;;  %v1306_v49 = vpop.f32.mrf.mxu1 }
 0x1b8   :  { %v1307_v50 = vadd.f32 %v1306_v49, %v1137_v48  ;;  %v3030_v48 = vld [vmem:[%s5905_s0 + $0x360] sm:$0xf]  ;;  %v3346_v49 = vld [vmem:[%s5905_s0 + $0x36c] sm:$0xf0] }
 0x1b9   :  { %v4215_v54 = vadd.f32 %v1642_v44, %v1474_v46  ;;  %v3031_v10 = vor.u32 %v3346_v49, %v3030_v48  ;;  %v3350_v48 = vld [vmem:[%s5905_s0 + $0x38c] sm:$0xf0]  ;;  %v3348_v49 = vld [vmem:[%s5905_s0 + $0x384] sm:$0xf] }
 0x1bb   :  { %6023 = vst [vmem:[#allocation26_spill] sm:$0xff] %v4215_v54 }
 0x1be   :  { %v1475_v11 = vpop.f32.mrf.mxu2  ;;  %v1140_v19 = vpop.f32.mrf.mxu0 }
 0x1bf   :  { %v1644_v12 = vpop.f32.mrf.mxu3  ;;  %v1476_v17 = vadd.f32 %v1475_v11, %v1307_v50  ;;  %v1309_v23 = vpop.f32.mrf.mxu1  ;;  %v3344_v50 = vld [vmem:[%s5905_s0 + $0x364] sm:$0xf] }
 0x1c0   :  { %v1310_v28 = vadd.f32 %v1309_v23, %v1140_v19  ;;  %v3035_v11 = vor.u32 %v3344_v50, %v3032_v58  ;;  %v3043_v19 = vor.u32 %v3345_v63, %v3040_v1  ;;  %v3048_v50 = vld [vmem:[%s5905_s0 + $0x390] sm:$0xf0]  ;;  %v3054_v58 = vld [vmem:[%s5905_s0 + $0x388] sm:$0xf]  ;;  %v3056_v63 = vld [vmem:[%s5905_s0 + $0x398] sm:$0xf0] }
 0x1c1   :  { %v4241_v33 = vadd.f32 %v1644_v12, %v1476_v17  ;;  %1179 = vmatmul.bf16.gmra.mxu0 %v3015_v13  ;;  %v3039_v17 = vor.u32 %v3347_v62, %v3038_v59  ;;  %v3351_v59 = vld [vmem:[%s5905_s0 + $0x394] sm:$0xf0]  ;;  %v3349_v62 = vld [vmem:[%s5905_s0 + $0x38c] sm:$0xf] }
 0x1c2   :  { %1348 = vmatmul.bf16.gmra.mxu1 %v3019_v15 }
 0x1c3   :  { %6024 = vst [vmem:[#allocation27_spill] sm:$0xff] %v4241_v33  ;;  %1517 = vmatmul.bf16.gmra.mxu2 %v3023_v25 }
 0x1c4   :  { %1686 = vmatmul.bf16.gmra.mxu3 %v3027_v26 }
 0x1c6   :  { %v1478_v34 = vpop.f32.mrf.mxu2  ;;  %v1142_v39 = vpop.f32.mrf.mxu0 }
 0x1c7   :  { %v1647_v35 = vpop.f32.mrf.mxu3  ;;  %v1479_v38 = vadd.f32 %v1478_v34, %v1310_v28  ;;  %v1311_v43 = vpop.f32.mrf.mxu1 }
 0x1c8   :  { %v1312_v44 = vadd.f32 %v1311_v43, %v1142_v39 }
 0x1c9   :  { %v4243_v46 = vadd.f32 %v1647_v35, %v1479_v38 }
 0x1cb   :  { %6025 = vst [vmem:[#allocation28_spill] sm:$0xff] %v4243_v46 }
 0x1ce   :  { %v1480_v5 = vpop.f32.mrf.mxu2  ;;  %v1145_v13 = vpop.f32.mrf.mxu0 }
 0x1cf   :  { %v1649_v8 = vpop.f32.mrf.mxu3  ;;  %v1481_v12 = vadd.f32 %v1480_v5, %v1312_v44  ;;  %v1314_v15 = vpop.f32.mrf.mxu1  ;;  %v3046_v44 = vld [vmem:[%s5905_s0 + $0x380] sm:$0xf] }
 0x1d0   :  { %v1315_v23 = vadd.f32 %v1314_v15, %v1145_v13  ;;  %v3055_v15 = vor.u32 %v3351_v59, %v3054_v58  ;;  %v3070_v58 = vld [vmem:[%s5905_s0 + $0x3a8] sm:$0xf]  ;;  %v3355_v59 = vld [vmem:[%s5905_s0 + $0x3b4] sm:$0xf0] }
 0x1d1   :  { %v4269_v25 = vadd.f32 %v1649_v8, %v1481_v12  ;;  %1184 = vmatmul.bf16.gmra.mxu0 %v3031_v10  ;;  %v3047_v8 = vor.u32 %v3350_v48, %v3046_v44  ;;  %v3051_v10 = vor.u32 %v3348_v49, %v3048_v50  ;;  %v3354_v48 = vld [vmem:[%s5905_s0 + $0x3ac] sm:$0xf0]  ;;  %v3352_v49 = vld [vmem:[%s5905_s0 + $0x3a4] sm:$0xf]  ;;  %v3064_v50 = vld [vmem:[%s5905_s0 + $0x3b0] sm:$0xf0] }
 0x1d2   :  { %1353 = vmatmul.bf16.gmra.mxu1 %v3035_v11 }
 0x1d3   :  { %6026 = vst [vmem:[#allocation29_spill] sm:$0xff] %v4269_v25  ;;  %1522 = vmatmul.bf16.gmra.mxu2 %v3039_v17  ;;  %v3059_v17 = vor.u32 %v3349_v62, %v3056_v63  ;;  %v3353_v62 = vld [vmem:[%s5905_s0 + $0x3ac] sm:$0xf]  ;;  %v3072_v63 = vld [vmem:[%s5905_s0 + $0x3b8] sm:$0xf0] }
 0x1d4   :  { %1691 = vmatmul.bf16.gmra.mxu3 %v3043_v19 }
 0x1d6   :  { %v1483_v26 = vpop.f32.mrf.mxu2  ;;  %v1147_v35 = vpop.f32.mrf.mxu0 }
 0x1d7   :  { %v1652_v28 = vpop.f32.mrf.mxu3  ;;  %v1484_v34 = vadd.f32 %v1483_v26, %v1315_v23  ;;  %v1316_v38 = vpop.f32.mrf.mxu1 }
 0x1d8   :  { %v1317_v39 = vadd.f32 %v1316_v38, %v1147_v35 }
 0x1d9   :  { %v4271_v43 = vadd.f32 %v1652_v28, %v1484_v34 }
 0x1db   :  { %6027 = vst [vmem:[#allocation30_spill] sm:$0xff] %v4271_v43 }
 0x1de   :  { %v1485_v1 = vpop.f32.mrf.mxu2  ;;  %v1150_v12 = vpop.f32.mrf.mxu0 }
 0x1df   :  { %v1654_v5 = vpop.f32.mrf.mxu3  ;;  %v1486_v11 = vadd.f32 %v1485_v1, %v1317_v39  ;;  %v1319_v13 = vpop.f32.mrf.mxu1  ;;  %v3062_v39 = vld [vmem:[%s5905_s0 + $0x3a0] sm:$0xf] }
 0x1e0   :  { %v1320_v19 = vadd.f32 %v1319_v13, %v1150_v12 }
 0x1e1   :  { %v4297_v23 = vadd.f32 %v1654_v5, %v1486_v11  ;;  %1189 = vmatmul.bf16.gmra.mxu0 %v3047_v8  ;;  %v3063_v8 = vor.u32 %v3354_v48, %v3062_v39  ;;  %v3358_v48 = vld [vmem:[%s5905_s0 + $0x3cc] sm:$0xf0] }
 0x1e2   :  { %1358 = vmatmul.bf16.gmra.mxu1 %v3051_v10  ;;  %v3067_v10 = vor.u32 %v3352_v49, %v3064_v50  ;;  %v3356_v49 = vld [vmem:[%s5905_s0 + $0x3c4] sm:$0xf]  ;;  %v3080_v50 = vld [vmem:[%s5905_s0 + $0x3d0] sm:$0xf0] }
 0x1e3   :  { %6028 = vst [vmem:[#allocation31_spill] sm:$0xff] %v4297_v23  ;;  %1527 = vmatmul.bf16.gmra.mxu2 %v3055_v15  ;;  %v3071_v15 = vor.u32 %v3355_v59, %v3070_v58  ;;  %v3359_v58 = vld [vmem:[%s5905_s0 + $0x3d4] sm:$0xf0]  ;;  %v3357_v59 = vld [vmem:[%s5905_s0 + $0x3cc] sm:$0xf] }
 0x1e4   :  { %1696 = vmatmul.bf16.gmra.mxu3 %v3059_v17  ;;  %v3075_v17 = vor.u32 %v3353_v62, %v3072_v63  ;;  %v3088_v62 = vld [vmem:[%s5905_s0 + $0x3d8] sm:$0xf0] }
 0x1e6   :  { %v1488_v26 = vpop.f32.mrf.mxu2  ;;  %v1152_v35 = vpop.f32.mrf.mxu0 }
 0x1e7   :  { %v1657_v28 = vpop.f32.mrf.mxu3  ;;  %v1489_v34 = vadd.f32 %v1488_v26, %v1320_v19  ;;  %v1321_v38 = vpop.f32.mrf.mxu1 }
 0x1e8   :  { %v1322_v43 = vadd.f32 %v1321_v38, %v1152_v35 }
 0x1e9   :  { %v4299_v44 = vadd.f32 %v1657_v28, %v1489_v34 }
 0x1eb   :  { %6029 = vst [vmem:[#allocation32_spill] sm:$0xff] %v4299_v44 }
 0x1ee   :  { %v1490_v1 = vpop.f32.mrf.mxu2  ;;  %v1155_v12 = vpop.f32.mrf.mxu0 }
 0x1ef   :  { %v1659_v5 = vpop.f32.mrf.mxu3  ;;  %v1491_v11 = vadd.f32 %v1490_v1, %v1322_v43  ;;  %v1324_v13 = vpop.f32.mrf.mxu1  ;;  %v3078_v43 = vld [vmem:[%s5905_s0 + $0x3c0] sm:$0xf] }
 0x1f0   :  { %v1325_v19 = vadd.f32 %v1324_v13, %v1155_v12 }
 0x1f1   :  { %v4325_v26 = vadd.f32 %v1659_v5, %v1491_v11  ;;  %1194 = vmatmul.bf16.gmra.mxu0 %v3063_v8  ;;  %v3079_v5 = vor.u32 %v3358_v48, %v3078_v43  ;;  %v3083_v8 = vor.u32 %v3356_v49, %v3080_v50  ;;  %v3362_v48 = vld [vmem:[%s5905_s0 + $0x3ec] sm:$0xf0]  ;;  %v3360_v49 = vld [vmem:[%s5905_s0 + $0x3e4] sm:$0xf]  ;;  %v3096_v50 = vld [vmem:[%s5905_s0 + $0x3f0] sm:$0xf0] }
 0x1f2   :  { %1363 = vmatmul.bf16.gmra.mxu1 %v3067_v10 }
 0x1f3   :  { %6030 = vst [vmem:[#allocation33_spill] sm:$0xff] %v4325_v26  ;;  %1532 = vmatmul.bf16.gmra.mxu2 %v3071_v15  ;;  %v3091_v15 = vor.u32 %v3357_v59, %v3088_v62  ;;  %v3104_v59 = vld [vmem:[%s5905_s0 + $0x3f8] sm:$0xf0] }
 0x1f4   :  { %1701 = vmatmul.bf16.gmra.mxu3 %v3075_v17 }
 0x1f6   :  { %v1493_v28 = vpop.f32.mrf.mxu2  ;;  %v1157_v38 = vpop.f32.mrf.mxu0 }
 0x1f7   :  { %v1662_v34 = vpop.f32.mrf.mxu3  ;;  %v1494_v35 = vadd.f32 %v1493_v28, %v1325_v19  ;;  %v1326_v44 = vpop.f32.mrf.mxu1 }
 0x1f8   :  { %v1327_v23 = vadd.f32 %v1326_v44, %v1157_v38  ;;  %v3086_v44 = vld [vmem:[%s5905_s0 + $0x3c8] sm:$0xf] }
 0x1f9   :  { %v4327_v39 = vadd.f32 %v1662_v34, %v1494_v35  ;;  %v3087_v13 = vor.u32 %v3359_v58, %v3086_v44  ;;  %v3363_v44 = vld [vmem:[%s5905_s0 + $0x3f4] sm:$0xf0]  ;;  %v3361_v58 = vld [vmem:[%s5905_s0 + $0x3ec] sm:$0xf] }
 0x1fb   :  { %6031 = vst [vmem:[#allocation34_spill] sm:$0xff] %v4327_v39 }
 0x1fe   :  { %v1495_v63 = vpop.f32.mrf.mxu2  ;;  %v1160_v11 = vpop.f32.mrf.mxu0 }
 0x1ff   :  { %v1664_v1 = vpop.f32.mrf.mxu3  ;;  %v1496_v10 = vadd.f32 %v1495_v63, %v1327_v23  ;;  %v1329_v12 = vpop.f32.mrf.mxu1  ;;  %v3094_v23 = vld [vmem:[%s5905_s0 + $0x3e0] sm:$0xf] }
 0x200   :  { %v1330_v17 = vadd.f32 %v1329_v12, %v1160_v11 }
 0x201   :  { %v4353_v19 = vadd.f32 %v1664_v1, %v1496_v10  ;;  %1199 = vmatmul.bf16.gmra.mxu0 %v3079_v5  ;;  %v3095_v1 = vor.u32 %v3362_v48, %v3094_v23  ;;  %v3099_v5 = vor.u32 %v3360_v49, %v3096_v50 }
 0x202   :  { %1368 = vmatmul.bf16.gmra.mxu1 %v3083_v8 }
 0x203   :  { %6032 = vst [vmem:[#allocation35_spill] sm:$0xff] %v4353_v19  ;;  %1537 = vmatmul.bf16.gmra.mxu2 %v3087_v13  ;;  %v3107_v13 = vor.u32 %v3361_v58, %v3104_v59 }
 0x204   :  { %1706 = vmatmul.bf16.gmra.mxu3 %v3091_v15 }
 0x206   :  { %v1498_v28 = vpop.f32.mrf.mxu2  ;;  %v1162_v38 = vpop.f32.mrf.mxu0 }
 0x207   :  { %v1667_v34 = vpop.f32.mrf.mxu3  ;;  %v1499_v35 = vadd.f32 %v1498_v28, %v1330_v17  ;;  %v1331_v39 = vpop.f32.mrf.mxu1 }
 0x208   :  { %v1332_v26 = vadd.f32 %v1331_v39, %v1162_v38  ;;  %v3102_v39 = vld [vmem:[%s5905_s0 + $0x3e8] sm:$0xf] }
 0x209   :  { %v4355_v43 = vadd.f32 %v1667_v34, %v1499_v35  ;;  %v3103_v12 = vor.u32 %v3363_v44, %v3102_v39 }
 0x20b   :  { %6033 = vst [vmem:[#allocation36_spill] sm:$0xff] %v4355_v43 }
 0x20e   :  { %v1500_v62 = vpop.f32.mrf.mxu2  ;;  %v1165_v10 = vpop.f32.mrf.mxu0 }
 0x20f   :  { %v1669_v63 = vpop.f32.mrf.mxu3  ;;  %v1501_v8 = vadd.f32 %v1500_v62, %v1332_v26  ;;  %v1334_v11 = vpop.f32.mrf.mxu1 }
 0x210   :  { %v1335_v15 = vadd.f32 %v1334_v11, %v1165_v10 }
 0x211   :  { %v4381_v17 = vadd.f32 %v1669_v63, %v1501_v8  ;;  %1204 = vmatmul.bf16.gmra.mxu0 %v3095_v1 }
 0x212   :  { %1373 = vmatmul.bf16.gmra.mxu1 %v3099_v5 }
 0x213   :  { %6034 = vst [vmem:[#allocation37_spill] sm:$0xff] %v4381_v17  ;;  %1542 = vmatmul.bf16.gmra.mxu2 %v3103_v12 }
 0x214   :  { %1711 = vmatmul.bf16.gmra.mxu3 %v3107_v13  ;;  %v1721_v13 = vsel %vm1717_vm0, %v3767_v47, 0.0 }
 0x216   :  { %v1503_v28 = vpop.f32.mrf.mxu2  ;;  %v1167_v38 = vpop.f32.mrf.mxu0 }
 0x217   :  { %v1672_v34 = vpop.f32.mrf.mxu3  ;;  %v1504_v35 = vadd.f32 %v1503_v28, %v1335_v15  ;;  %v1336_v43 = vpop.f32.mrf.mxu1 }
 0x218   :  { %v1337_v19 = vadd.f32 %v1336_v43, %v1167_v38  ;;  %v1719_v43 = vsel %vm1717_vm0, %v3765_v40, 0.0 }
 0x219   :  { %v4383_v23 = vadd.f32 %v1672_v34, %v1504_v35 }
 0x21b   :  { %6035 = vst [vmem:[#allocation38_spill] sm:$0xff] %v4383_v23 }
 0x21e   :  { %v1505_v26 = vpop.f32.mrf.mxu2  ;;  %v1170_v50 = vpop.f32.mrf.mxu0 }
 0x21f   :  { %v1674_v48 = vpop.f32.mrf.mxu3  ;;  %v1506_v49 = vadd.f32 %v1505_v26, %v1337_v19  ;;  %v1339_v39 = vpop.f32.mrf.mxu1  ;;  %v1718_v19 = vsel %vm1717_vm0, %v3739_v21, 0.0  ;;  %v1723_v26 = vsel %vm1717_vm0, %v3793_v2, 0.0 }
 0x220   :  { %v1340_v44 = vadd.f32 %v1339_v39, %v1170_v50  ;;  %v1720_v35 = vadd.f32 %v1719_v43, %v1718_v19  ;;  %v1725_v50 = vsel %vm1717_vm0, %v3795_v9, 0.0  ;;  %v1731_v19 = vsel %vm1717_vm0, %v3849_v57, 0.0 }
 0x221   :  { %v4385_v58 = vadd.f32 %v1674_v48, %v1506_v49 }
 0x222   :  { %v1722_v49 = vadd.f32 %v1721_v13, %v1720_v35  ;;  %v1735_v35 = vsel %vm1717_vm0, %v3877_v22, 0.0 }
 0x223   :  { %6036 = vst [vmem:[#allocation39_spill] sm:$0xff] %v4385_v58 }
 0x224   :  { %v1724_v39 = vadd.f32 %v1723_v26, %v1722_v49 }
 0x226   :  { %v1508_v59 = vpop.f32.mrf.mxu2  ;;  %v1172_v1 = vpop.f32.mrf.mxu0 }
 0x227   :  { %v1677_v62 = vpop.f32.mrf.mxu3  ;;  %v1509_v63 = vadd.f32 %v1508_v59, %v1340_v44  ;;  %v1341_v5 = vpop.f32.mrf.mxu1  ;;  %v1727_v44 = vsel %vm1717_vm0, %v3821_v29, 0.0  ;;  %v1726_v59 = vadd.f32 %v1725_v50, %v1724_v39  ;;  %v1737_v50 = vsel %vm1717_vm0, %v3879_v30, 0.0 }
 0x228   :  { %v1342_v8 = vadd.f32 %v1341_v5, %v1172_v1  ;;  %v1729_v1 = vsel %vm1717_vm0, %v3823_v36, 0.0 }
 0x229   :  { %v4387_v10 = vadd.f32 %v1677_v62, %v1509_v63 }
 0x22b   :  { %6037 = vst [vmem:[#allocation40_spill] sm:$0xff] %v4387_v10 }
 0x22e   :  { %v1510_v11 = vpop.f32.mrf.mxu2  ;;  %v1175_v28 = vpop.f32.mrf.mxu0 }
 0x22f   :  { %v1679_v12 = vpop.f32.mrf.mxu3  ;;  %v1511_v15 = vadd.f32 %v1510_v11, %v1342_v8  ;;  %v1344_v34 = vpop.f32.mrf.mxu1  ;;  %v1728_v11 = vadd.f32 %v1727_v44, %v1726_v59 }
 0x230   :  { %v1345_v38 = vadd.f32 %v1344_v34, %v1175_v28  ;;  %v1733_v28 = vsel %vm1717_vm0, %v3851_v0, 0.0 }
 0x231   :  { %v4397_v48 = vadd.f32 %v1679_v12, %v1511_v15  ;;  %v1730_v15 = vadd.f32 %v1729_v1, %v1728_v11  ;;  %v1739_v1 = vsel %vm1717_vm0, %v3905_v52, 0.0  ;;  %v6043_v52 = vld [vmem:[#allocation35_spill] sm:$0xff] }
 0x233   :  { %v1732_v34 = vadd.f32 %v1731_v19, %v1730_v15  ;;  %v1743_v19 = vsel %vm1717_vm0, %v3933_v18, 0.0 }
 0x235   :  { %v1734_v26 = vadd.f32 %v1733_v28, %v1732_v34  ;;  %v1745_v34 = vsel %vm1717_vm0, %v3935_v27, 0.0 }
 0x236   :  { %v1513_v62 = vpop.f32.mrf.mxu2  ;;  %v1177_v8 = vpop.f32.mrf.mxu0 }
 0x237   :  { %v1682_v63 = vpop.f32.mrf.mxu3  ;;  %v1514_v5 = vadd.f32 %v1513_v62, %v1345_v38  ;;  %v1346_v43 = vpop.f32.mrf.mxu1  ;;  %v1736_v62 = vadd.f32 %v1735_v35, %v1734_v26 }
 0x238   :  { %v1347_v12 = vadd.f32 %v1346_v43, %v1177_v8  ;;  %v1741_v43 = vsel %vm1717_vm0, %v3907_v60, 0.0 }
 0x239   :  { %v4407_v13 = vadd.f32 %v1682_v63, %v1514_v5  ;;  %v1738_v8 = vadd.f32 %v1737_v50, %v1736_v62  ;;  %v1747_v50 = vsel %vm1717_vm0, %v3961_v51, 0.0 }
 0x23b   :  { %v1740_v11 = vadd.f32 %v1739_v1, %v1738_v8  ;;  %v1751_v1 = vsel %vm1717_vm0, %v3989_v20, 0.0 }
 0x23d   :  { %v1742_v15 = vadd.f32 %v1741_v43, %v1740_v11  ;;  %v1753_v11 = vsel %vm1717_vm0, %v3991_v32, 0.0  ;;  %v1761_v32 = vsel %vm1717_vm0, %v4047_v41, 0.0 }
 0x23e   :  { %v1515_v49 = vpop.f32.mrf.mxu2  ;;  %v1180_v44 = vpop.f32.mrf.mxu0 }
 0x23f   :  { %v1684_v38 = vpop.f32.mrf.mxu3  ;;  %v1516_v39 = vadd.f32 %v1515_v49, %v1347_v12  ;;  %v1349_v59 = vpop.f32.mrf.mxu1 }
 0x240   :  { %v1350_v63 = vadd.f32 %v1349_v59, %v1180_v44  ;;  %v1749_v59 = vsel %vm1717_vm0, %v3963_v61, 0.0 }
 0x241   :  { %v4417_v5 = vadd.f32 %v1684_v38, %v1516_v39  ;;  %v1744_v38 = vadd.f32 %v1743_v19, %v1742_v15 }
 0x243   :  { %v1746_v44 = vadd.f32 %v1745_v34, %v1744_v38 }
 0x245   :  { %v1748_v62 = vadd.f32 %v1747_v50, %v1746_v44  ;;  %v1759_v50 = vsel %vm1717_vm0, %v4045_v31, 0.0 }
 0x246   :  { %v1518_v28 = vpop.f32.mrf.mxu2  ;;  %v4425_v26 = vpop.f32.mrf.mxu0 }
 0x247   :  { %v1687_v12 = vpop.f32.mrf.mxu3  ;;  %v1519_v35 = vadd.f32 %v1518_v28, %v1350_v63  ;;  %v4427_v49 = vpop.f32.mrf.mxu1  ;;  %v1750_v8 = vadd.f32 %v1749_v59, %v1748_v62 }
 0x249   :  { %v4431_v39 = vadd.f32 %v1687_v12, %v1519_v35  ;;  %v1752_v28 = vadd.f32 %v1751_v1, %v1750_v8  ;;  %v1755_v12 = vsel %vm1717_vm0, %v4017_v56, 0.0  ;;  %v1757_v35 = vsel %vm1717_vm0, %v4019_v4, 0.0 }
 0x24a   :  { %v1769_v56 = vsel %vm1717_vm0, %v4103_v55, 0.0 }
 0x24b   :  { %v1754_v34 = vadd.f32 %v1753_v11, %v1752_v28  ;;  %v1763_v28 = vsel %vm1717_vm0, %v4073_v6, 0.0  ;;  %v1777_v6 = vsel %vm1717_vm0, %v4159_v16, 0.0 }
 0x24d   :  { %v1756_v38 = vadd.f32 %v1755_v12, %v1754_v34  ;;  %v1765_v34 = vsel %vm1717_vm0, %v4075_v14, 0.0 }
 0x24e   :  { %v4437_v63 = vpop.f32.mrf.mxu2  ;;  %v4443_v19 = vpop.f32.mrf.mxu0 }
 0x24f   :  { %v4439_v43 = vpop.f32.mrf.mxu3  ;;  %v4445_v15 = vpop.f32.mrf.mxu1  ;;  %v1758_v44 = vadd.f32 %v1757_v35, %v1756_v38  ;;  %v1767_v38 = vsel %vm1717_vm0, %v4101_v45, 0.0 }
 0x251   :  { %v1760_v11 = vadd.f32 %v1759_v50, %v1758_v44 }
 0x253   :  { %v1762_v12 = vadd.f32 %v1761_v32, %v1760_v11  ;;  %v1771_v11 = vsel %vm1717_vm0, %v4129_v24, 0.0  ;;  %v1785_v24 = vsel %vm1717_vm0, %v4215_v54, 0.0 }
 0x255   :  { %v1764_v35 = vadd.f32 %v1763_v28, %v1762_v12  ;;  %v1773_v12 = vsel %vm1717_vm0, %v4131_v37, 0.0 }
 0x256   :  { %v4453_v59 = vpop.f32.mrf.mxu2  ;;  %v4459_v1 = vpop.f32.mrf.mxu0 }
 0x257   :  { %v4455_v62 = vpop.f32.mrf.mxu3  ;;  %v4461_v8 = vpop.f32.mrf.mxu1  ;;  %v1766_v31 = vadd.f32 %v1765_v34, %v1764_v35  ;;  %v1775_v35 = vsel %vm1717_vm0, %v4157_v7, 0.0 }
 0x259   :  { %v1768_v32 = vadd.f32 %v1767_v38, %v1766_v31 }
 0x25b   :  { %v1770_v28 = vadd.f32 %v1769_v56, %v1768_v32  ;;  %v1779_v32 = vsel %vm1717_vm0, %v4185_v53, 0.0  ;;  %v6038_v53 = vld [vmem:[#allocation30_spill] sm:$0xff] }
 0x25c   :  { %v1793_v20 = vsel %vm1717_vm0, %v6038_v53, 0.0  ;;  %v6042_v53 = vld [vmem:[#allocation34_spill] sm:$0xff] }
 0x25d   :  { %v1772_v34 = vadd.f32 %v1771_v11, %v1770_v28  ;;  %v1781_v28 = vsel %vm1717_vm0, %v4187_v3, 0.0  ;;  %v1801_v18 = vsel %vm1717_vm0, %v6042_v53, 0.0  ;;  %v1809_v53 = vsel %vm1717_vm0, %v4383_v23, 0.0 }
 0x25e   :  { %v4469_v4 = vpop.f32.mrf.mxu2  ;;  %v4475_v50 = vpop.f32.mrf.mxu0  ;;  %v1815_v23 = vsel %vm1717_vm0, %v4397_v48, 0.0 }
 0x25f   :  { %v4471_v41 = vpop.f32.mrf.mxu3  ;;  %v4477_v44 = vpop.f32.mrf.mxu1  ;;  %v1774_v45 = vadd.f32 %v1773_v12, %v1772_v34  ;;  %v1783_v34 = vsel %vm1717_vm0, %v4213_v42, 0.0 }
 0x261   :  { %v1776_v56 = vadd.f32 %v1775_v35, %v1774_v45 }
 0x263   :  { %v1778_v11 = vadd.f32 %v1777_v6, %v1776_v56  ;;  %v1787_v56 = vsel %vm1717_vm0, %v4241_v33, 0.0 }
 0x265   :  { %v1780_v12 = vadd.f32 %v1779_v32, %v1778_v11  ;;  %v1789_v11 = vsel %vm1717_vm0, %v4243_v46, 0.0 }
 0x266   :  { %v4485_v14 = vpop.f32.mrf.mxu2  ;;  %v4491_v31 = vpop.f32.mrf.mxu0 }
 0x267   :  { %v4487_v55 = vpop.f32.mrf.mxu3  ;;  %v4493_v38 = vpop.f32.mrf.mxu1  ;;  %v1782_v7 = vadd.f32 %v1781_v28, %v1780_v12  ;;  %v1791_v12 = vsel %vm1717_vm0, %v4269_v25, 0.0 }
 0x269   :  { %v1784_v6 = vadd.f32 %v1783_v34, %v1782_v7 }
 0x26b   :  { %v1786_v32 = vadd.f32 %v1785_v24, %v1784_v6  ;;  %v6039_v24 = vld [vmem:[#allocation31_spill] sm:$0xff] }
 0x26c   :  { %v1795_v6 = vsel %vm1717_vm0, %v6039_v24, 0.0  ;;  %v6044_v24 = vld [vmem:[#allocation36_spill] sm:$0xff] }
 0x26d   :  { %v1788_v28 = vadd.f32 %v1787_v56, %v1786_v32  ;;  %v6040_v56 = vld [vmem:[#allocation32_spill] sm:$0xff] }
 0x26e   :  { %v4501_v37 = vpop.f32.mrf.mxu2  ;;  %v4507_v45 = vpop.f32.mrf.mxu0  ;;  %v1797_v32 = vsel %vm1717_vm0, %v6040_v56, 0.0 }
 0x26f   :  { %v4503_v16 = vpop.f32.mrf.mxu3  ;;  %v4509_v35 = vpop.f32.mrf.mxu1  ;;  %v1790_v42 = vadd.f32 %v1789_v11, %v1788_v28  ;;  %v6041_v11 = vld [vmem:[#allocation33_spill] sm:$0xff] }
 0x270   :  { %v1799_v28 = vsel %vm1717_vm0, %v6041_v11, 0.0 }
 0x271   :  { %v1792_v33 = vadd.f32 %v1791_v12, %v1790_v42 }
 0x273   :  { %v1794_v46 = vadd.f32 %v1793_v20, %v1792_v33  ;;  %v1803_v20 = vsel %vm1717_vm0, %v6043_v52, 0.0 }
 0x275   :  { %v1796_v25 = vadd.f32 %v1795_v6, %v1794_v46  ;;  %v1805_v46 = vsel %vm1717_vm0, %v6044_v24, 0.0 }
 0x276   :  { %v4517_v3 = vpop.f32.mrf.mxu2  ;;  %v4523_v7 = vpop.f32.mrf.mxu0 }
 0x277   :  { %v4519_v54 = vpop.f32.mrf.mxu3  ;;  %v1366_v34 = vpop.f32.mrf.mxu1  ;;  %v1798_v61 = vadd.f32 %v1797_v32, %v1796_v25  ;;  %v1807_v25 = vsel %vm1717_vm0, %v4381_v17, 0.0 }
 0x279   :  { %v1800_v12 = vadd.f32 %v1799_v28, %v1798_v61 }
 0x27b   :  { %v1802_v33 = vadd.f32 %v1801_v18, %v1800_v12  ;;  %v1811_v18 = vsel %vm1717_vm0, %v4385_v58, 0.0  ;;  %v1360_v58 = vadd.f32 %v4477_v44, %v4475_v50 }
 0x27d   :  { %v1804_v6 = vadd.f32 %v1803_v20, %v1802_v33  ;;  %v1813_v20 = vsel %vm1717_vm0, %v4387_v10, 0.0  ;;  %v1352_v33 = vadd.f32 %v4427_v49, %v4425_v26  ;;  %v1357_v26 = vadd.f32 %v4461_v8, %v4459_v1 }
 0x27e   :  { %v1535_v51 = vpop.f32.mrf.mxu2  ;;  %v1200_v60 = vpop.f32.mrf.mxu0  ;;  %v1529_v44 = vadd.f32 %v4485_v14, %v1360_v58 }
 0x27f   :  { %v4531_v27 = vpop.f32.mrf.mxu3  ;;  %v1369_v42 = vpop.f32.mrf.mxu1  ;;  %v1806_v32 = vadd.f32 %v1805_v46, %v1804_v6  ;;  %v1355_v46 = vadd.f32 %v4445_v15, %v4443_v19  ;;  %v1819_v15 = vsel %vm1717_vm0, %v4417_v5, 0.0 }
 0x281   :  { %v1808_v30 = vadd.f32 %v1807_v25, %v1806_v32  ;;  %v1521_v25 = vadd.f32 %v4437_v63, %v1352_v33  ;;  %v1524_v10 = vadd.f32 %v4453_v59, %v1355_v46  ;;  %v1821_v59 = vsel %vm1717_vm0, %v4431_v39, 0.0 }
 0x282   :  { %v4586_v46 = vadd.f32 %v4487_v55, %v1529_v44 }
 0x283   :  { %v1810_v12 = vadd.f32 %v1809_v53, %v1808_v30  ;;  %v1817_v53 = vsel %vm1717_vm0, %v4407_v13, 0.0  ;;  %v4566_v63 = vadd.f32 %v4439_v43, %v1521_v25  ;;  %v4573_v1 = vadd.f32 %v4455_v62, %v1524_v10 }
 0x284   :  { %v1365_v43 = vadd.f32 %v4509_v35, %v4507_v45  ;;  %v1370_v45 = vadd.f32 %v1369_v42, %v1200_v60  ;;  %v1829_v55 = vsel %vm1717_vm0, %v4586_v46, 0.0 }
 0x285   :  { %v1812_v6 = vadd.f32 %v1811_v18, %v1810_v12  ;;  %v1526_v18 = vadd.f32 %v4469_v4, %v1357_v26  ;;  %v1823_v4 = vsel %vm1717_vm0, %v4566_v63, 0.0  ;;  %v1825_v62 = vsel %vm1717_vm0, %v4573_v1, 0.0 }
 0x286   :  { %v1538_v11 = vpop.f32.mrf.mxu2  ;;  %v1202_v61 = vpop.f32.mrf.mxu0 }
 0x287   :  { %v4541_v56 = vpop.f32.mrf.mxu3  ;;  %v1371_v28 = vpop.f32.mrf.mxu1  ;;  %v1814_v32 = vadd.f32 %v1813_v20, %v1812_v6  ;;  %v4582_v14 = vadd.f32 %v4471_v41, %v1526_v18 }
 0x288   :  { %v1372_v26 = vadd.f32 %v1371_v28, %v1202_v61 }
 0x289   :  { %v1816_v49 = vadd.f32 %v1815_v23, %v1814_v32  ;;  %v1362_v23 = vadd.f32 %v4493_v38, %v4491_v31  ;;  %v1534_v31 = vadd.f32 %v4517_v3, %v1365_v43  ;;  %v1367_v38 = vadd.f32 %v1366_v34, %v4523_v7 }
 0x28a   :  { %v1827_v41 = vsel %vm1717_vm0, %v4582_v14, 0.0  ;;  %v1539_v3 = vadd.f32 %v1538_v11, %v1370_v45 }
 0x28b   :  { %v1818_v50 = vadd.f32 %v1817_v53, %v1816_v49  ;;  %v1531_v58 = vadd.f32 %v4501_v37, %v1362_v23  ;;  %v1536_v37 = vadd.f32 %v1535_v51, %v1367_v38  ;;  %v4600_v53 = vadd.f32 %v4519_v54, %v1534_v31 }
 0x28c   :  { %v4610_v54 = vadd.f32 %v4541_v56, %v1539_v3  ;;  %v3401_v31 = vmov 512.0  }
 0x28d   :  { %v1820_v8 = vadd.f32 %v1819_v15, %v1818_v50  ;;  %v4595_v6 = vadd.f32 %v4503_v16, %v1531_v58  ;;  %v4605_v16 = vadd.f32 %v4531_v27, %v1536_v37  ;;  %v1833_v50 = vsel %vm1717_vm0, %v4600_v53, 0.0 }
 0x28e   :  { %v1540_v30 = vpop.f32.mrf.mxu2  ;;  %v1205_v12 = vpop.f32.mrf.mxu0  ;;  %6046 = vst [vmem:[#allocation42_spill] sm:$0xff] %v4610_v54  ;;  %3397 = vrcp.f32 %v3401_v31 }
 0x28f   :  { %v1709_v19 = vpop.f32.mrf.mxu3  ;;  %v1374_v20 = vpop.f32.mrf.mxu1  ;;  %v1822_v33 = vadd.f32 %v1821_v59, %v1820_v8  ;;  %v1831_v49 = vsel %vm1717_vm0, %v4595_v6, 0.0  ;;  %6045 = vst [vmem:[#allocation41_spill] sm:$0xff] %v4605_v16  ;;  %v1541_v51 = vadd.f32 %v1540_v30, %v1372_v26  ;;  %v1835_v44 = vsel %vm1717_vm0, %v4605_v16, 0.0 }
 0x290   :  { %v1375_v7 = vadd.f32 %v1374_v20, %v1205_v12  ;;  %v1837_v30 = vsel %vm1717_vm0, %v4610_v54, 0.0 }
 0x291   :  { %v1824_v35 = vadd.f32 %v1823_v4, %v1822_v33  ;;  %v4614_v12 = vadd.f32 %v1709_v19, %v1541_v51 }
 0x293   :  { %v1826_v25 = vadd.f32 %v1825_v62, %v1824_v35  ;;  %6047 = vst [vmem:[#allocation43_spill] sm:$0xff] %v4614_v12  ;;  %v1839_v56 = vsel %vm1717_vm0, %v4614_v12, 0.0 }
 0x294   :  { %v3398_v45 = vpop.eup %3397 }
 0x295   :  { %v1828_v60 = vadd.f32 %v1827_v41, %v1826_v25  ;;  %v1852_v41 = vmul.f32 512.0, %v3398_v45  ;;  %vm1856_vm1 = vweird.f32 %v3398_v45 }
 0x296   :  { %v1543_v10 = vpop.f32.mrf.mxu2  ;;  %v1207_v34 = vpop.f32.mrf.mxu0 }
 0x297   :  { %v1712_v32 = vpop.f32.mrf.mxu3  ;;  %v1376_v42 = vpop.f32.mrf.mxu1  ;;  %v1830_v15 = vadd.f32 %v1829_v55, %v1828_v60  ;;  %v1544_v11 = vadd.f32 %v1543_v10, %v1375_v7  ;;  %v1853_v25 = vsub.f32 1.0, %v1852_v41 }
 0x298   :  { %v1377_v61 = vadd.f32 %v1376_v42, %v1207_v34 }
 0x299   :  { %v1832_v28 = vadd.f32 %v1831_v49, %v1830_v15  ;;  %v4618_v59 = vadd.f32 %v1712_v32, %v1544_v11  ;;  %v1854_v32 = vmul.f32 %v3398_v45, %v1853_v25 }
 0x29b   :  { %v1834_v27 = vadd.f32 %v1833_v50, %v1832_v28  ;;  %6048 = vst [vmem:[#allocation44_spill] sm:$0xff] %v4618_v59  ;;  %v1841_v58 = vsel %vm1717_vm0, %v4618_v59, 0.0  ;;  %v1855_v26 = vadd.f32 %v3398_v45, %v1854_v32 }
 0x29d   :  { %v1836_v23 = vadd.f32 %v1835_v44, %v1834_v27  ;;  %v4628_v60 = vsel %vm1856_vm1, %v3398_v45, %v1855_v26 }
 0x29e   :  { %v1545_v18 = vpop.f32.mrf.mxu2 }
 0x29f   :  { %v1546_v20 = vadd.f32 %v1545_v18, %v1377_v61  ;;  %v1714_v43 = vpop.f32.mrf.mxu3  ;;  %v1838_v4 = vadd.f32 %v1837_v30, %v1836_v23 }
 0x2a1   :  { %v4622_v8 = vadd.f32 %v1714_v43, %v1546_v20  ;;  %v1840_v19 = vadd.f32 %v1839_v56, %v1838_v4 }
 0x2a3   :  { %v1843_v33 = vsel %vm1717_vm0, %v4622_v8, 0.0  ;;  %v1842_v10 = vadd.f32 %v1841_v58, %v1840_v19 }
 0x2a5   :  { %v1844_v62 = vadd.f32 %v1843_v33, %v1842_v10 }
 0x2a7   :  { %v1845_v38 = vrot.slane %v1844_v62, 4 }
 0x2a9   :  { %v1846_v35 = vadd.f32 %v1845_v38, %v1844_v62 }
 0x2ab   :  { %v1847_v37 = vrot.slane %v1846_v35, 2 }
 0x2ad   :  { %v1848_v55 = vadd.f32 %v1847_v37, %v1846_v35 }
 0x2af   :  { %v1849_v3 = vrot.slane %v1848_v55, 1 }
 0x2b1   :  { %v1850_v7 = vadd.f32 %v1849_v3, %v1848_v55  ;;  %v6049_v55 = vld [vmem:[#allocation2_spill] sm:$0xff] }
 0x2b3   :  { %v4631_v34 = vmul.f32 %v4628_v60, %v1850_v7 }
 0x2b5   :  { %v1859_v42 = vsub.f32 %v3739_v21, %v4631_v34  ;;  %v1860_v49 = vsub.f32 %v3765_v40, %v4631_v34  ;;  %v1861_v51 = vsub.f32 %v3767_v47, %v4631_v34  ;;  %v1862_v15 = vsub.f32 %v3793_v2, %v4631_v34 }
 0x2b6   :  { %v1863_v11 = vsub.f32 %v3795_v9, %v4631_v34  ;;  %v1864_v28 = vsub.f32 %v3821_v29, %v4631_v34  ;;  %v1865_v23 = vsub.f32 %v3823_v36, %v4631_v34  ;;  %v1866_v58 = vsub.f32 %v3849_v57, %v4631_v34 }
 0x2b7   :  { %v1923_v18 = vmul.f32 %v1859_v42, %v1859_v42  ;;  %v1924_v50 = vmul.f32 %v1860_v49, %v1860_v49  ;;  %v1925_v61 = vmul.f32 %v1861_v51, %v1861_v51  ;;  %v1926_v44 = vmul.f32 %v1862_v15, %v1862_v15  ;;  %v6050_v42 = vld [vmem:[#allocation3_spill] sm:$0xff] }
 0x2b8   :  { %v1927_v43 = vmul.f32 %v1863_v11, %v1863_v11  ;;  %v1928_v19 = vmul.f32 %v1864_v28, %v1864_v28  ;;  %v1867_v62 = vsub.f32 %v3851_v0, %v4631_v34  ;;  %v1929_v31 = vmul.f32 %v1865_v23, %v1865_v23 }
 0x2b9   :  { %v1987_v20 = vsel %vm1717_vm0, %v1923_v18, 0.0  ;;  %v1988_v27 = vsel %vm1717_vm0, %v1924_v50, 0.0  ;;  %v1990_v56 = vsel %vm1717_vm0, %v1925_v61, 0.0  ;;  %v1992_v33 = vsel %vm1717_vm0, %v1926_v44, 0.0  ;;  %v6051_v50 = vld [vmem:[#allocation4_spill] sm:$0xff] }
 0x2ba   :  { %v1989_v30 = vadd.f32 %v1988_v27, %v1987_v20  ;;  %v1994_v38 = vsel %vm1717_vm0, %v1927_v43, 0.0  ;;  %v1868_v35 = vsub.f32 %v3877_v22, %v4631_v34  ;;  %v1930_v41 = vmul.f32 %v1866_v58, %v1866_v58  ;;  %v6052_v20 = vld [vmem:[#allocation5_spill] sm:$0xff] }
 0x2bb   :  { %v1996_v37 = vsel %vm1717_vm0, %v1928_v19, 0.0  ;;  %v1869_v32 = vsub.f32 %v6049_v55, %v4631_v34  ;;  %v1931_v3 = vmul.f32 %v1867_v62, %v1867_v62  ;;  %v1998_v26 = vsel %vm1717_vm0, %v1929_v31, 0.0 }
 0x2bc   :  { %v1991_v4 = vadd.f32 %v1990_v56, %v1989_v30  ;;  %v1870_v49 = vsub.f32 %v6050_v42, %v4631_v34  ;;  %v1932_v51 = vmul.f32 %v1868_v35, %v1868_v35  ;;  %v2000_v15 = vsel %vm1717_vm0, %v1930_v41, 0.0  ;;  %v6053_v56 = vld [vmem:[#allocation6_spill] sm:$0xff]  ;;  %v6055_v35 = vld [vmem:[#allocation8_spill] sm:$0xff] }
 0x2bd   :  { %v1871_v11 = vsub.f32 %v6051_v50, %v4631_v34  ;;  %v1933_v61 = vmul.f32 %v1869_v32, %v1869_v32  ;;  %v2002_v28 = vsel %vm1717_vm0, %v1931_v3, 0.0  ;;  %v1872_v27 = vsub.f32 %v6052_v20, %v4631_v34  ;;  %v6056_v3 = vld [vmem:[#allocation9_spill] sm:$0xff] }
 0x2be   :  { %v1993_v10 = vadd.f32 %v1992_v33, %v1991_v4  ;;  %v1934_v30 = vmul.f32 %v1870_v49, %v1870_v49  ;;  %v2004_v23 = vsel %vm1717_vm0, %v1932_v51, 0.0  ;;  %v1873_v4 = vsub.f32 %v6053_v56, %v4631_v34 }
 0x2bf   :  { %v1935_v58 = vmul.f32 %v1871_v11, %v1871_v11  ;;  %v2006_v19 = vsel %vm1717_vm0, %v1933_v61, 0.0  ;;  %v1936_v31 = vmul.f32 %v1872_v27, %v1872_v27  ;;  %v1875_v41 = vsub.f32 %v6055_v35, %v4631_v34 }
 0x2c0   :  { %v1995_v45 = vadd.f32 %v1994_v38, %v1993_v10  ;;  %v6054_v10 = vld [vmem:[#allocation7_spill] sm:$0xff]  ;;  %v2008_v38 = vsel %vm1717_vm0, %v1934_v30, 0.0 }
 0x2c1   :  { %v1874_v62 = vsub.f32 %v6054_v10, %v4631_v34  ;;  %v2012_v49 = vsel %vm1717_vm0, %v1936_v31, 0.0  ;;  %v1939_v11 = vmul.f32 %v1875_v41, %v1875_v41  ;;  %v6060_v31 = vld [vmem:[#allocation13_spill] sm:$0xff] }
 0x2c2   :  { %v1997_v25 = vadd.f32 %v1996_v37, %v1995_v45  ;;  %v1937_v37 = vmul.f32 %v1873_v4, %v1873_v4  ;;  %v6059_v4 = vld [vmem:[#allocation12_spill] sm:$0xff] }
 0x2c4   :  { %v1999_v7 = vadd.f32 %v1998_v26, %v1997_v25  ;;  %v2010_v25 = vsel %vm1717_vm0, %v1935_v58, 0.0  ;;  %v1876_v26 = vsub.f32 %v6056_v3, %v4631_v34  ;;  %v2014_v61 = vsel %vm1717_vm0, %v1937_v37, 0.0 }
 0x2c5   :  { %v1879_v58 = vsub.f32 %v6059_v4, %v4631_v34 }
 0x2c6   :  { %v2001_v18 = vadd.f32 %v2000_v15, %v1999_v7  ;;  %v1938_v7 = vmul.f32 %v1874_v62, %v1874_v62  ;;  %v6057_v15 = vld [vmem:[#allocation10_spill] sm:$0xff]  ;;  %v1940_v30 = vmul.f32 %v1876_v26, %v1876_v26 }
 0x2c7   :  { %v1943_v26 = vmul.f32 %v1879_v58, %v1879_v58 }
 0x2c8   :  { %v2003_v44 = vadd.f32 %v2002_v28, %v2001_v18  ;;  %v1877_v18 = vsub.f32 %v6057_v15, %v4631_v34  ;;  %v2020_v41 = vsel %vm1717_vm0, %v1940_v30, 0.0 }
 0x2c9   :  { %v2026_v30 = vsel %vm1717_vm0, %v1943_v26, 0.0 }
 0x2ca   :  { %v2005_v43 = vadd.f32 %v2004_v23, %v2003_v44  ;;  %v6058_v44 = vld [vmem:[#allocation11_spill] sm:$0xff]  ;;  %v2016_v23 = vsel %vm1717_vm0, %v1938_v7, 0.0 }
 0x2cb   :  { %v1878_v27 = vsub.f32 %v6058_v44, %v4631_v34 }
 0x2cc   :  { %v2007_v33 = vadd.f32 %v2006_v19, %v2005_v43  ;;  %v1941_v19 = vmul.f32 %v1877_v18, %v1877_v18 }
 0x2ce   :  { %v2009_v45 = vadd.f32 %v2008_v38, %v2007_v33  ;;  %v2018_v33 = vsel %vm1717_vm0, %v1939_v11, 0.0  ;;  %v1880_v38 = vsub.f32 %v6060_v31, %v4631_v34  ;;  %v2022_v7 = vsel %vm1717_vm0, %v1941_v19, 0.0 }
 0x2d0   :  { %v2011_v32 = vadd.f32 %v2010_v25, %v2009_v45  ;;  %v1942_v45 = vmul.f32 %v1878_v27, %v1878_v27  ;;  %v6061_v25 = vld [vmem:[#allocation14_spill] sm:$0xff] }
 0x2d2   :  { %v2013_v51 = vadd.f32 %v2012_v49, %v2011_v32  ;;  %v1881_v32 = vsub.f32 %v6061_v25, %v4631_v34  ;;  %v2024_v11 = vsel %vm1717_vm0, %v1942_v45, 0.0 }
 0x2d4   :  { %v2015_v28 = vadd.f32 %v2014_v61, %v2013_v51  ;;  %v6062_v51 = vld [vmem:[#allocation15_spill] sm:$0xff]  ;;  %v1944_v61 = vmul.f32 %v1880_v38, %v1880_v38 }
 0x2d5   :  { %v1882_v18 = vsub.f32 %v6062_v51, %v4631_v34 }
 0x2d6   :  { %v2017_v43 = vadd.f32 %v2016_v23, %v2015_v28  ;;  %v6063_v23 = vld [vmem:[#allocation16_spill] sm:$0xff]  ;;  %v2028_v19 = vsel %vm1717_vm0, %v1944_v61, 0.0 }
 0x2d7   :  { %v1883_v27 = vsub.f32 %v6063_v23, %v4631_v34 }
 0x2d8   :  { %v2019_v62 = vadd.f32 %v2018_v33, %v2017_v43  ;;  %v1945_v43 = vmul.f32 %v1881_v32, %v1881_v32 }
 0x2d9   :  { %v1947_v51 = vmul.f32 %v1883_v27, %v1883_v27 }
 0x2da   :  { %v2021_v37 = vadd.f32 %v2020_v41, %v2019_v62  ;;  %v6064_v62 = vld [vmem:[#allocation17_spill] sm:$0xff]  ;;  %v1946_v41 = vmul.f32 %v1882_v18, %v1882_v18  ;;  %v2030_v45 = vsel %vm1717_vm0, %v1945_v43, 0.0 }
 0x2db   :  { %v1884_v58 = vsub.f32 %v6064_v62, %v4631_v34  ;;  %v2034_v61 = vsel %vm1717_vm0, %v1947_v51, 0.0 }
 0x2dc   :  { %v2023_v49 = vadd.f32 %v2022_v7, %v2021_v37  ;;  %v6065_v7 = vld [vmem:[#allocation18_spill] sm:$0xff]  ;;  %v2032_v26 = vsel %vm1717_vm0, %v1946_v41, 0.0 }
 0x2dd   :  { %v1885_v38 = vsub.f32 %v6065_v7, %v4631_v34  ;;  %v1948_v23 = vmul.f32 %v1884_v58, %v1884_v58 }
 0x2de   :  { %v2025_v28 = vadd.f32 %v2024_v11, %v2023_v49  ;;  %v6066_v11 = vld [vmem:[#allocation19_spill] sm:$0xff] }
 0x2df   :  { %v1886_v32 = vsub.f32 %v6066_v11, %v4631_v34  ;;  %v1949_v62 = vmul.f32 %v1885_v38, %v1885_v38  ;;  %v2036_v43 = vsel %vm1717_vm0, %v1948_v23, 0.0 }
 0x2e0   :  { %v2027_v33 = vadd.f32 %v2026_v30, %v2025_v28  ;;  %v6067_v30 = vld [vmem:[#allocation20_spill] sm:$0xff] }
 0x2e1   :  { %v1887_v18 = vsub.f32 %v6067_v30, %v4631_v34  ;;  %v1950_v7 = vmul.f32 %v1886_v32, %v1886_v32  ;;  %v2038_v41 = vsel %vm1717_vm0, %v1949_v62, 0.0 }
 0x2e2   :  { %v2029_v37 = vadd.f32 %v2028_v19, %v2027_v33  ;;  %v6068_v19 = vld [vmem:[#allocation21_spill] sm:$0xff] }
 0x2e3   :  { %v1888_v27 = vsub.f32 %v6068_v19, %v4631_v34  ;;  %v1951_v11 = vmul.f32 %v1887_v18, %v1887_v18  ;;  %v2040_v51 = vsel %vm1717_vm0, %v1950_v7, 0.0 }
 0x2e4   :  { %v2031_v49 = vadd.f32 %v2030_v45, %v2029_v37  ;;  %v6069_v45 = vld [vmem:[#allocation22_spill] sm:$0xff] }
 0x2e5   :  { %v1889_v58 = vsub.f32 %v6069_v45, %v4631_v34  ;;  %v1952_v30 = vmul.f32 %v1888_v27, %v1888_v27  ;;  %v2042_v23 = vsel %vm1717_vm0, %v1951_v11, 0.0 }
 0x2e6   :  { %v2033_v28 = vadd.f32 %v2032_v26, %v2031_v49  ;;  %v6070_v26 = vld [vmem:[#allocation23_spill] sm:$0xff] }
 0x2e7   :  { %v1890_v38 = vsub.f32 %v6070_v26, %v4631_v34  ;;  %v1953_v19 = vmul.f32 %v1889_v58, %v1889_v58  ;;  %v2044_v62 = vsel %vm1717_vm0, %v1952_v30, 0.0 }
 0x2e8   :  { %v2035_v33 = vadd.f32 %v2034_v61, %v2033_v28  ;;  %v6071_v61 = vld [vmem:[#allocation24_spill] sm:$0xff] }
 0x2e9   :  { %v1891_v32 = vsub.f32 %v6071_v61, %v4631_v34  ;;  %v1954_v45 = vmul.f32 %v1890_v38, %v1890_v38  ;;  %v2046_v7 = vsel %vm1717_vm0, %v1953_v19, 0.0 }
 0x2ea   :  { %v2037_v37 = vadd.f32 %v2036_v43, %v2035_v33  ;;  %v6072_v43 = vld [vmem:[#allocation25_spill] sm:$0xff] }
 0x2eb   :  { %v1892_v18 = vsub.f32 %v6072_v43, %v4631_v34  ;;  %v1955_v26 = vmul.f32 %v1891_v32, %v1891_v32  ;;  %v2048_v11 = vsel %vm1717_vm0, %v1954_v45, 0.0 }
 0x2ec   :  { %v2039_v49 = vadd.f32 %v2038_v41, %v2037_v37  ;;  %v6073_v41 = vld [vmem:[#allocation26_spill] sm:$0xff] }
 0x2ed   :  { %v1893_v27 = vsub.f32 %v6073_v41, %v4631_v34  ;;  %v1956_v61 = vmul.f32 %v1892_v18, %v1892_v18  ;;  %v2050_v30 = vsel %vm1717_vm0, %v1955_v26, 0.0 }
 0x2ee   :  { %v2041_v28 = vadd.f32 %v2040_v51, %v2039_v49  ;;  %v6074_v51 = vld [vmem:[#allocation27_spill] sm:$0xff] }
 0x2ef   :  { %v1894_v58 = vsub.f32 %v6074_v51, %v4631_v34  ;;  %v1957_v43 = vmul.f32 %v1893_v27, %v1893_v27  ;;  %v2052_v19 = vsel %vm1717_vm0, %v1956_v61, 0.0 }
 0x2f0   :  { %v2043_v33 = vadd.f32 %v2042_v23, %v2041_v28  ;;  %v6075_v23 = vld [vmem:[#allocation28_spill] sm:$0xff] }
 0x2f1   :  { %v1895_v38 = vsub.f32 %v6075_v23, %v4631_v34  ;;  %v1958_v41 = vmul.f32 %v1894_v58, %v1894_v58  ;;  %v2054_v45 = vsel %vm1717_vm0, %v1957_v43, 0.0 }
 0x2f2   :  { %v2045_v37 = vadd.f32 %v2044_v62, %v2043_v33  ;;  %v6076_v62 = vld [vmem:[#allocation29_spill] sm:$0xff] }
 0x2f3   :  { %v1896_v32 = vsub.f32 %v6076_v62, %v4631_v34  ;;  %v1959_v51 = vmul.f32 %v1895_v38, %v1895_v38  ;;  %v2056_v26 = vsel %vm1717_vm0, %v1958_v41, 0.0 }
 0x2f4   :  { %v2047_v49 = vadd.f32 %v2046_v7, %v2045_v37  ;;  %v6077_v7 = vld [vmem:[#allocation30_spill] sm:$0xff] }
 0x2f5   :  { %v1897_v18 = vsub.f32 %v6077_v7, %v4631_v34  ;;  %v1960_v23 = vmul.f32 %v1896_v32, %v1896_v32  ;;  %v2058_v61 = vsel %vm1717_vm0, %v1959_v51, 0.0 }
 0x2f6   :  { %v2049_v28 = vadd.f32 %v2048_v11, %v2047_v49  ;;  %v6078_v11 = vld [vmem:[#allocation31_spill] sm:$0xff] }
 0x2f7   :  { %v1898_v27 = vsub.f32 %v6078_v11, %v4631_v34  ;;  %v1961_v62 = vmul.f32 %v1897_v18, %v1897_v18  ;;  %v2060_v43 = vsel %vm1717_vm0, %v1960_v23, 0.0  ;;  %v1902_v18 = vsub.f32 %v6043_v52, %v4631_v34 }
 0x2f8   :  { %v2051_v33 = vadd.f32 %v2050_v30, %v2049_v28  ;;  %v6079_v30 = vld [vmem:[#allocation32_spill] sm:$0xff] }
 0x2f9   :  { %v1899_v58 = vsub.f32 %v6079_v30, %v4631_v34  ;;  %v1962_v7 = vmul.f32 %v1898_v27, %v1898_v27  ;;  %v2062_v41 = vsel %vm1717_vm0, %v1961_v62, 0.0  ;;  %v1903_v27 = vsub.f32 %v6044_v24, %v4631_v34 }
 0x2fa   :  { %v2053_v37 = vadd.f32 %v2052_v19, %v2051_v33  ;;  %v6080_v19 = vld [vmem:[#allocation33_spill] sm:$0xff] }
 0x2fb   :  { %v1900_v38 = vsub.f32 %v6080_v19, %v4631_v34  ;;  %v1963_v11 = vmul.f32 %v1899_v58, %v1899_v58  ;;  %v2064_v51 = vsel %vm1717_vm0, %v1962_v7, 0.0  ;;  %v1904_v58 = vsub.f32 %v4381_v17, %v4631_v34 }
 0x2fc   :  { %v2055_v49 = vadd.f32 %v2054_v45, %v2053_v37  ;;  %v6081_v45 = vld [vmem:[#allocation34_spill] sm:$0xff]  ;;  %v1967_v52 = vmul.f32 %v1903_v27, %v1903_v27  ;;  %v1908_v27 = vsub.f32 %v4397_v48, %v4631_v34 }
 0x2fd   :  { %v1901_v32 = vsub.f32 %v6081_v45, %v4631_v34  ;;  %v2066_v23 = vsel %vm1717_vm0, %v1963_v11, 0.0  ;;  %v1968_v24 = vmul.f32 %v1904_v58, %v1904_v58  ;;  %v1909_v58 = vsub.f32 %v4407_v13, %v4631_v34 }
 0x2fe   :  { %v2057_v28 = vadd.f32 %v2056_v26, %v2055_v49  ;;  %v1964_v26 = vmul.f32 %v1900_v38, %v1900_v38 }
 0x300   :  { %v2059_v33 = vadd.f32 %v2058_v61, %v2057_v28  ;;  %v1965_v61 = vmul.f32 %v1901_v32, %v1901_v32  ;;  %v2068_v62 = vsel %vm1717_vm0, %v1964_v26, 0.0  ;;  %v2074_v26 = vsel %vm1717_vm0, %v1967_v52, 0.0 }
 0x302   :  { %v2061_v37 = vadd.f32 %v2060_v43, %v2059_v33  ;;  %v1966_v43 = vmul.f32 %v1902_v18, %v1902_v18  ;;  %v2070_v7 = vsel %vm1717_vm0, %v1965_v61, 0.0  ;;  %v2076_v61 = vsel %vm1717_vm0, %v1968_v24, 0.0 }
 0x304   :  { %v2063_v49 = vadd.f32 %v2062_v41, %v2061_v37  ;;  %v6082_v41 = vld [vmem:[#allocation38_spill] sm:$0xff]  ;;  %v2072_v11 = vsel %vm1717_vm0, %v1966_v43, 0.0 }
 0x305   :  { %v1905_v38 = vsub.f32 %v6082_v41, %v4631_v34 }
 0x306   :  { %v2065_v28 = vadd.f32 %v2064_v51, %v2063_v49  ;;  %v6083_v51 = vld [vmem:[#allocation39_spill] sm:$0xff] }
 0x307   :  { %v1906_v32 = vsub.f32 %v6083_v51, %v4631_v34  ;;  %v1969_v17 = vmul.f32 %v1905_v38, %v1905_v38  ;;  %v1910_v38 = vsub.f32 %v4417_v5, %v4631_v34 }
 0x308   :  { %v2067_v33 = vadd.f32 %v2066_v23, %v2065_v28  ;;  %v6084_v23 = vld [vmem:[#allocation40_spill] sm:$0xff] }
 0x309   :  { %v1907_v18 = vsub.f32 %v6084_v23, %v4631_v34  ;;  %v2078_v43 = vsel %vm1717_vm0, %v1969_v17, 0.0 }
 0x30a   :  { %v2069_v37 = vadd.f32 %v2068_v62, %v2067_v33  ;;  %v1970_v62 = vmul.f32 %v1906_v32, %v1906_v32  ;;  %v1911_v32 = vsub.f32 %v4431_v39, %v4631_v34 }
 0x30c   :  { %v2071_v49 = vadd.f32 %v2070_v7, %v2069_v37  ;;  %v1971_v7 = vmul.f32 %v1907_v18, %v1907_v18  ;;  %v2080_v52 = vsel %vm1717_vm0, %v1970_v62, 0.0  ;;  %v1912_v18 = vsub.f32 %v4566_v63, %v4631_v34 }
 0x30e   :  { %v2073_v28 = vadd.f32 %v2072_v11, %v2071_v49  ;;  %v1972_v11 = vmul.f32 %v1908_v27, %v1908_v27  ;;  %v2082_v24 = vsel %vm1717_vm0, %v1971_v7, 0.0  ;;  %v1913_v27 = vsub.f32 %v4573_v1, %v4631_v34 }
 0x310   :  { %v2075_v33 = vadd.f32 %v2074_v26, %v2073_v28  ;;  %v1973_v26 = vmul.f32 %v1909_v58, %v1909_v58  ;;  %v2084_v17 = vsel %vm1717_vm0, %v1972_v11, 0.0  ;;  %v1914_v58 = vsub.f32 %v4582_v14, %v4631_v34 }
 0x312   :  { %v2077_v37 = vadd.f32 %v2076_v61, %v2075_v33  ;;  %v1974_v61 = vmul.f32 %v1910_v38, %v1910_v38  ;;  %v2086_v62 = vsel %vm1717_vm0, %v1973_v26, 0.0  ;;  %v1915_v38 = vsub.f32 %v4586_v46, %v4631_v34 }
 0x314   :  { %v2079_v49 = vadd.f32 %v2078_v43, %v2077_v37  ;;  %v1975_v43 = vmul.f32 %v1911_v32, %v1911_v32  ;;  %v2088_v7 = vsel %vm1717_vm0, %v1974_v61, 0.0  ;;  %v1916_v32 = vsub.f32 %v4595_v6, %v4631_v34 }
 0x316   :  { %v2081_v28 = vadd.f32 %v2080_v52, %v2079_v49  ;;  %v1976_v52 = vmul.f32 %v1912_v18, %v1912_v18  ;;  %v2090_v11 = vsel %vm1717_vm0, %v1975_v43, 0.0  ;;  %v1917_v18 = vsub.f32 %v4600_v53, %v4631_v34 }
 0x318   :  { %v2083_v33 = vadd.f32 %v2082_v24, %v2081_v28  ;;  %v1977_v24 = vmul.f32 %v1913_v27, %v1913_v27  ;;  %v2092_v26 = vsel %vm1717_vm0, %v1976_v52, 0.0  ;;  %v1918_v27 = vsub.f32 %v4605_v16, %v4631_v34 }
 0x31a   :  { %v2085_v37 = vadd.f32 %v2084_v17, %v2083_v33  ;;  %v1978_v17 = vmul.f32 %v1914_v58, %v1914_v58  ;;  %v2094_v61 = vsel %vm1717_vm0, %v1977_v24, 0.0  ;;  %v1919_v58 = vsub.f32 %v4610_v54, %v4631_v34 }
 0x31c   :  { %v2087_v49 = vadd.f32 %v2086_v62, %v2085_v37  ;;  %v1979_v62 = vmul.f32 %v1915_v38, %v1915_v38  ;;  %v2096_v43 = vsel %vm1717_vm0, %v1978_v17, 0.0  ;;  %v1920_v38 = vsub.f32 %v4614_v12, %v4631_v34 }
 0x31e   :  { %v2089_v28 = vadd.f32 %v2088_v7, %v2087_v49  ;;  %v1980_v7 = vmul.f32 %v1916_v32, %v1916_v32  ;;  %v2098_v52 = vsel %vm1717_vm0, %v1979_v62, 0.0  ;;  %v1921_v32 = vsub.f32 %v4618_v59, %v4631_v34 }
 0x320   :  { %v2091_v33 = vadd.f32 %v2090_v11, %v2089_v28  ;;  %v1981_v11 = vmul.f32 %v1917_v18, %v1917_v18  ;;  %v2100_v24 = vsel %vm1717_vm0, %v1980_v7, 0.0  ;;  %v1922_v18 = vsub.f32 %v4622_v8, %v4631_v34 }
 0x322   :  { %v2093_v37 = vadd.f32 %v2092_v26, %v2091_v33  ;;  %v1982_v26 = vmul.f32 %v1918_v27, %v1918_v27  ;;  %v2102_v17 = vsel %vm1717_vm0, %v1981_v11, 0.0  ;;  %v1986_v7 = vmul.f32 %v1922_v18, %v1922_v18 }
 0x324   :  { %v2095_v49 = vadd.f32 %v2094_v61, %v2093_v37  ;;  %v1983_v61 = vmul.f32 %v1919_v58, %v1919_v58  ;;  %v2104_v62 = vsel %vm1717_vm0, %v1982_v26, 0.0  ;;  %v2112_v11 = vsel %vm1717_vm0, %v1986_v7, 0.0 }
 0x326   :  { %v2097_v28 = vadd.f32 %v2096_v43, %v2095_v49  ;;  %v1984_v43 = vmul.f32 %v1920_v38, %v1920_v38  ;;  %v2106_v27 = vsel %vm1717_vm0, %v1983_v61, 0.0 }
 0x328   :  { %v2099_v33 = vadd.f32 %v2098_v52, %v2097_v28  ;;  %v1985_v52 = vmul.f32 %v1921_v32, %v1921_v32 }
 0x32a   :  { %v2101_v37 = vadd.f32 %v2100_v24, %v2099_v33  ;;  %v2108_v33 = vsel %vm1717_vm0, %v1984_v43, 0.0  ;;  %v2110_v58 = vsel %vm1717_vm0, %v1985_v52, 0.0 }
 0x32c   :  { %v2103_v49 = vadd.f32 %v2102_v17, %v2101_v37 }
 0x32e   :  { %v2105_v28 = vadd.f32 %v2104_v62, %v2103_v49 }
 0x330   :  { %v2107_v12 = vadd.f32 %v2106_v27, %v2105_v28 }
 0x332   :  { %v2109_v24 = vadd.f32 %v2108_v33, %v2107_v12 }
 0x334   :  { %v2111_v59 = vadd.f32 %v2110_v58, %v2109_v24 }
 0x336   :  { %v2113_v37 = vadd.f32 %v2112_v11, %v2111_v59 }
 0x338   :  { %v2114_v17 = vrot.slane %v2113_v37, 4 }
 0x33a   :  { %v2115_v54 = vadd.f32 %v2114_v17, %v2113_v37 }
 0x33c   :  { %v2116_v38 = vrot.slane %v2115_v54, 2 }
 0x33e   :  { %v2117_v16 = vadd.f32 %v2116_v38, %v2115_v54  ;;  %v2132_v54 = vld [vmem:[%s5906_s2] sm:$0x1] }
 0x340   :  { %v2118_v26 = vrot.slane %v2117_v16, 1 }
 0x342   :  { %v2119_v49 = vadd.f32 %v2118_v26, %v2117_v16  ;;  %v6086_v26 = vld [vmem:[#allocation15_spill] sm:$0xff] }
 0x344   :  { %v2120_v32 = vmul.f32 %v2119_v49, %v4628_v60  ;;  %v2134_v60 = vld [vmem:[%s5907_s3] sm:$0x1]  ;;  %v6087_v49 = vld [vmem:[#allocation16_spill] sm:$0xff] }
 0x346   :  { %v2121_v61 = vadd.f32 1e-05, %v2120_v32  ;;  %v6088_v32 = vld [vmem:[#allocation17_spill] sm:$0xff] }
 0x348   :  { %3399 = vrsqrt.f32 %v2121_v61  ;;  %vm2128_vm3 = vweird.f32 %v2121_v61 }
 0x34e   :  { %v3400_v18 = vpop.eup %3399 }
 0x34f   :  { %v2123_v62 = vmul.f32 %v3400_v18, %v2121_v61  ;;  %vm2129_vm2 = vweird.f32 %v3400_v18  ;;  %v6089_v61 = vld [vmem:[#allocation18_spill] sm:$0xff] }
 0x350   :  { %vm2130_vm4 = vmor %vm2128_vm3, %vm2129_vm2 }
 0x351   :  { %v2124_v43 = vmul.f32 %v3400_v18, %v2123_v62  ;;  %v6091_v62 = vld [vmem:[#allocation20_spill] sm:$0xff] }
 0x353   :  { %v2125_v12 = vmul.f32 0.5, %v2124_v43 }
 0x355   :  { %v2126_v28 = vsub.f32 1.5, %v2125_v12  ;;  %v6092_v12 = vld [vmem:[#allocation21_spill] sm:$0xff] }
 0x357   :  { %v2127_v52 = vmul.f32 %v3400_v18, %v2126_v28 }
 0x359   :  { %v2131_v59 = vsel %vm2130_vm4, %v3400_v18, %v2127_v52  ;;  %v6090_v18 = vld [vmem:[#allocation19_spill] sm:$0xff]  ;;  %v6093_v52 = vld [vmem:[#allocation22_spill] sm:$0xff] }
 0x35a   :  { %v2133_v27 = vmul.f32 %v2132_v54, %v2131_v59  ;;  %v6094_v54 = vld [vmem:[#allocation23_spill] sm:$0xff] }
 0x35c   :  { %v2135_v16 = vmul.f32 %v2133_v27, %v4631_v34  ;;  %v4833_v33 = vperm.slane %v2133_v27, 0 }
 0x35e   :  { %v2136_v7 = vsub.f32 %v2134_v60, %v2135_v16  ;;  %v2203_v58 = vmul.f32 %v4833_v33, %v4622_v8  ;;  %v4844_v37 = vmul.f32 %v4833_v33, %v3739_v21  ;;  %v4848_v34 = vmul.f32 %v4833_v33, %v3765_v40  ;;  %v6095_v16 = vld [vmem:[#allocation24_spill] sm:$0xff] }
 0x35f   :  { %v4852_v17 = vmul.f32 %v4833_v33, %v3767_v47  ;;  %v4856_v38 = vmul.f32 %v4833_v33, %v3793_v2  ;;  %v4860_v8 = vmul.f32 %v4833_v33, %v3795_v9  ;;  %v4864_v21 = vmul.f32 %v4833_v33, %v3821_v29 }
 0x360   :  { %v4835_v24 = vperm.slane %v2136_v7, 0  ;;  %v4868_v40 = vmul.f32 %v4833_v33, %v3823_v36  ;;  %v4872_v47 = vmul.f32 %v4833_v33, %v3849_v57  ;;  %v4876_v2 = vmul.f32 %v4833_v33, %v3851_v0  ;;  %v6096_v7 = vld [vmem:[#allocation25_spill] sm:$0xff] }
 0x361   :  { %v4880_v9 = vmul.f32 %v4833_v33, %v3877_v22  ;;  %v4884_v29 = vmul.f32 %v4833_v33, %v6049_v55  ;;  %v4888_v36 = vmul.f32 %v4833_v33, %v6050_v42  ;;  %v4892_v57 = vmul.f32 %v4833_v33, %v6051_v50 }
 0x362   :  { %v4840_v11 = vadd.f32 %v4835_v24, %v2203_v58  ;;  %v4896_v0 = vmul.f32 %v4833_v33, %v6052_v20  ;;  %v4900_v22 = vmul.f32 %v4833_v33, %v6053_v56  ;;  %v4904_v55 = vmul.f32 %v4833_v33, %v6054_v10 }
 0x363   :  { %v4908_v42 = vmul.f32 %v4833_v33, %v6055_v35  ;;  %v4912_v50 = vmul.f32 %v4833_v33, %v6056_v3  ;;  %v4916_v20 = vmul.f32 %v4833_v33, %v6057_v15  ;;  %v4920_v56 = vmul.f32 %v4833_v33, %v6058_v44 }
 0x364   :  { %6085 = vst [vmem:[#allocation2_spill] sm:$0xff] %v4840_v11  ;;  %v4924_v10 = vmul.f32 %v4833_v33, %v6059_v4  ;;  %v4928_v35 = vmul.f32 %v4833_v33, %v6060_v31  ;;  %v4932_v3 = vmul.f32 %v4833_v33, %v6061_v25  ;;  %v4936_v15 = vmul.f32 %v4833_v33, %v6086_v26  ;;  %v6097_v26 = vld [vmem:[#allocation26_spill] sm:$0xff]  ;;  %v6105_v11 = vld [vmem:[#allocation35_spill] sm:$0xff] }
 0x365   :  { %v4940_v44 = vmul.f32 %v4833_v33, %v6087_v49  ;;  %v4944_v4 = vmul.f32 %v4833_v33, %v6088_v32  ;;  %v4948_v31 = vmul.f32 %v4833_v33, %v6089_v61  ;;  %v4952_v25 = vmul.f32 %v4833_v33, %v6090_v18  ;;  %v6098_v32 = vld [vmem:[#allocation27_spill] sm:$0xff]  ;;  %v6099_v18 = vld [vmem:[#allocation28_spill] sm:$0xff] }
 0x366   :  { %v4956_v43 = vmul.f32 %v4833_v33, %v6091_v62  ;;  %v4960_v28 = vmul.f32 %v4833_v33, %v6092_v12  ;;  %v4964_v59 = vmul.f32 %v4833_v33, %v6093_v52  ;;  %v4968_v27 = vmul.f32 %v4833_v33, %v6094_v54  ;;  %v6100_v12 = vld [vmem:[#allocation29_spill] sm:$0xff]  ;;  %v6101_v54 = vld [vmem:[#allocation30_spill] sm:$0xff] }
 0x367   :  { %v4972_v60 = vmul.f32 %v4833_v33, %v6095_v16  ;;  %v4976_v58 = vmul.f32 %v4833_v33, %v6096_v7  ;;  %v4980_v49 = vmul.f32 %v4833_v33, %v6097_v26  ;;  %v4984_v61 = vmul.f32 %v4833_v33, %v6098_v32  ;;  %v6103_v7 = vld [vmem:[#allocation31_spill] sm:$0xff] }
 0x368   :  { %v4988_v62 = vmul.f32 %v4833_v33, %v6099_v18  ;;  %v4992_v52 = vmul.f32 %v4833_v33, %v6100_v12  ;;  %v4996_v16 = vmul.f32 %v4833_v33, %v6101_v54  ;;  %v5000_v26 = vmul.f32 %v4833_v33, %v6103_v7 }
 0x369   :  { %v5004_v32 = vmul.f32 %v4833_v33, %v6079_v30  ;;  %v5008_v18 = vmul.f32 %v4833_v33, %v6080_v19  ;;  %v5012_v12 = vmul.f32 %v4833_v33, %v6081_v45  ;;  %v5016_v54 = vmul.f32 %v4833_v33, %v6105_v11 }
 0x36a   :  { %6102 = vst [vmem:[#allocation3_spill] sm:$0xff] %v4996_v16  ;;  %v6106_v16 = vld [vmem:[#allocation36_spill] sm:$0xff]  ;;  %v5028_v19 = vmul.f32 %v4833_v33, %v6082_v41  ;;  %v5032_v45 = vmul.f32 %v4833_v33, %v6083_v51  ;;  %v5036_v11 = vmul.f32 %v4833_v33, %v6084_v23  ;;  %v5048_v41 = vmul.f32 %v4833_v33, %v4417_v5 }
 0x36b   :  { %6104 = vst [vmem:[#allocation4_spill] sm:$0xff] %v5000_v26  ;;  %v5020_v7 = vmul.f32 %v4833_v33, %v6106_v16  ;;  %v6107_v26 = vld [vmem:[#allocation37_spill] sm:$0xff]  ;;  %v5040_v16 = vmul.f32 %v4833_v33, %v4397_v48  ;;  %v5052_v51 = vmul.f32 %v4833_v33, %v4431_v39  ;;  %v5056_v23 = vmul.f32 %v4833_v33, %v4566_v63 }
 0x36c   :  { %v5024_v30 = vmul.f32 %v4833_v33, %v6107_v26  ;;  %v5044_v26 = vmul.f32 %v4833_v33, %v4407_v13  ;;  %v5060_v48 = vmul.f32 %v4833_v33, %v4573_v1  ;;  %v5064_v13 = vmul.f32 %v4833_v33, %v4582_v14 }
 0x36d   :  { %6108 = vst [vmem:[#allocation5_spill] sm:$0xff] %v5056_v23  ;;  %v5068_v5 = vmul.f32 %v4833_v33, %v4586_v46  ;;  %v5072_v39 = vmul.f32 %v4833_v33, %v4595_v6  ;;  %v5076_v63 = vmul.f32 %v4833_v33, %v4600_v53  ;;  %v6112_v23 = vld [vmem:[#allocation41_spill] sm:$0xff]  ;;  %v5096_v53 = vadd.f32 %v4835_v24, %v4844_v37 }
 0x36e   :  { %6109 = vst [vmem:[#allocation6_spill] sm:$0xff] %v5060_v48  ;;  %v5080_v1 = vmul.f32 %v4833_v33, %v6112_v23  ;;  %v6113_v48 = vld [vmem:[#allocation42_spill] sm:$0xff]  ;;  %v5100_v23 = vadd.f32 %v4835_v24, %v4848_v34  ;;  %v5116_v37 = vadd.f32 %v4835_v24, %v4864_v21  ;;  %v5120_v34 = vadd.f32 %v4835_v24, %v4868_v40 }
 0x36f   :  { %6110 = vst [vmem:[#allocation7_spill] sm:$0xff] %v5064_v13  ;;  %v5084_v14 = vmul.f32 %v4833_v33, %v6113_v48  ;;  %v6114_v13 = vld [vmem:[#allocation43_spill] sm:$0xff]  ;;  %v5104_v48 = vadd.f32 %v4835_v24, %v4852_v17  ;;  %v5124_v17 = vadd.f32 %v4835_v24, %v4872_v47  ;;  %v5136_v21 = vadd.f32 %v4835_v24, %v4884_v29 }
 0x370   :  { %6111 = vst [vmem:[#allocation8_spill] sm:$0xff] %v5068_v5  ;;  %v5088_v46 = vmul.f32 %v4833_v33, %v6114_v13  ;;  %v6115_v5 = vld [vmem:[#allocation44_spill] sm:$0xff]  ;;  %v5108_v13 = vadd.f32 %v4835_v24, %v4856_v38  ;;  %v5128_v38 = vadd.f32 %v4835_v24, %v4876_v2  ;;  %v5140_v40 = vadd.f32 %v4835_v24, %v4888_v36 }
 0x371   :  { %v5092_v6 = vmul.f32 %v4833_v33, %v6115_v5  ;;  %v5112_v33 = vadd.f32 %v4835_v24, %v4860_v8  ;;  %v5132_v8 = vadd.f32 %v4835_v24, %v4880_v9  ;;  %v5144_v47 = vadd.f32 %v4835_v24, %v4892_v57  ;;  %v6117_v5 = vld [vmem:[#allocation3_spill] sm:$0xff] }
 0x372   :  { %v5148_v2 = vadd.f32 %v4835_v24, %v4896_v0  ;;  %v5152_v9 = vadd.f32 %v4835_v24, %v4900_v22  ;;  %v5156_v29 = vadd.f32 %v4835_v24, %v4904_v55  ;;  %v5160_v36 = vadd.f32 %v4835_v24, %v4908_v42 }
 0x373   :  { %v5164_v57 = vadd.f32 %v4835_v24, %v4912_v50  ;;  %v5168_v0 = vadd.f32 %v4835_v24, %v4916_v20  ;;  %v5172_v22 = vadd.f32 %v4835_v24, %v4920_v56  ;;  %v5176_v55 = vadd.f32 %v4835_v24, %v4924_v10 }
 0x374   :  { %v5180_v42 = vadd.f32 %v4835_v24, %v4928_v35  ;;  %v5184_v50 = vadd.f32 %v4835_v24, %v4932_v3  ;;  %v5188_v20 = vadd.f32 %v4835_v24, %v4936_v15  ;;  %v5192_v56 = vadd.f32 %v4835_v24, %v4940_v44 }
 0x375   :  { %v5196_v10 = vadd.f32 %v4835_v24, %v4944_v4  ;;  %v5200_v35 = vadd.f32 %v4835_v24, %v4948_v31  ;;  %v5204_v3 = vadd.f32 %v4835_v24, %v4952_v25  ;;  %v5208_v15 = vadd.f32 %v4835_v24, %v4956_v43 }
 0x376   :  { %v5212_v44 = vadd.f32 %v4835_v24, %v4960_v28  ;;  %v5216_v4 = vadd.f32 %v4835_v24, %v4964_v59  ;;  %v5220_v31 = vadd.f32 %v4835_v24, %v4968_v27  ;;  %v5224_v25 = vadd.f32 %v4835_v24, %v4972_v60 }
 0x377   :  { %v5228_v43 = vadd.f32 %v4835_v24, %v4976_v58  ;;  %v5232_v28 = vadd.f32 %v4835_v24, %v4980_v49  ;;  %v5236_v59 = vadd.f32 %v4835_v24, %v4984_v61  ;;  %v5240_v27 = vadd.f32 %v4835_v24, %v4988_v62 }
 0x378   :  { %v5244_v60 = vadd.f32 %v4835_v24, %v4992_v52  ;;  %v5248_v58 = vadd.f32 %v4835_v24, %v6117_v5  ;;  %v5256_v61 = vadd.f32 %v4835_v24, %v5004_v32  ;;  %v5260_v62 = vadd.f32 %v4835_v24, %v5008_v18 }
 0x379   :  { %6116 = vst [vmem:[#allocation9_spill] sm:$0xff] %v5228_v43  ;;  %v6118_v43 = vld [vmem:[#allocation4_spill] sm:$0xff]  ;;  %v5264_v52 = vadd.f32 %v4835_v24, %v5012_v12  ;;  %v5268_v5 = vadd.f32 %v4835_v24, %v5016_v54  ;;  %v5276_v32 = vadd.f32 %v4835_v24, %v5024_v30  ;;  %v5280_v18 = vadd.f32 %v4835_v24, %v5028_v19 }
 0x37a   :  { %v5252_v49 = vadd.f32 %v4835_v24, %v6118_v43  ;;  %v5272_v43 = vadd.f32 %v4835_v24, %v5020_v7  ;;  %v5284_v12 = vadd.f32 %v4835_v24, %v5032_v45  ;;  %v5288_v54 = vadd.f32 %v4835_v24, %v5036_v11 }
 0x37b   :  { %v5292_v7 = vadd.f32 %v4835_v24, %v5040_v16  ;;  %v5296_v30 = vadd.f32 %v4835_v24, %v5044_v26  ;;  %v5300_v19 = vadd.f32 %v4835_v24, %v5048_v41  ;;  %v5304_v45 = vadd.f32 %v4835_v24, %v5052_v51  ;;  %v6126_v26 = vld [vmem:[#allocation7_spill] sm:$0xff]  ;;  %v6127_v41 = vld [vmem:[#allocation8_spill] sm:$0xff] }
 0x37c   :  { %6119 = vst [vmem:[#allocation10_spill] sm:$0xff] %v5284_v12  ;;  %v6124_v12 = vld [vmem:[#allocation5_spill] sm:$0xff]  ;;  %vm2271_vm5 = vcmp.gt.f32.partialorder %v5096_v53, 0.0  ;;  %v2336_v51 = vmul.f32 0.2, %v5100_v23  ;;  %vm2272_vm6 = vcmp.gt.f32.partialorder %v5100_v23, 0.0 }
 0x37d   :  { %6120 = vst [vmem:[#allocation11_spill] sm:$0xff] %v5288_v54  ;;  %v5308_v11 = vadd.f32 %v4835_v24, %v6124_v12  ;;  %v6125_v54 = vld [vmem:[#allocation6_spill] sm:$0xff]  ;;  %v5327_v12 = vadd.f32 %v4835_v24, %v5072_v39  ;;  %vm2273_vm7 = vcmp.gt.f32.partialorder %v5104_v48, 0.0  ;;  %v2338_v39 = vmul.f32 0.2, %v5108_v13 }
 0x37e   :  { %6121 = vst [vmem:[#allocation12_spill] sm:$0xff] %v5292_v7  ;;  %v5312_v16 = vadd.f32 %v4835_v24, %v6125_v54  ;;  %v2335_v7 = vmul.f32 0.2, %v5096_v53  ;;  %v5331_v54 = vadd.f32 %v4835_v24, %v5076_v63  ;;  %v5347_v63 = vadd.f32 %v4835_v24, %v5088_v46 }
 0x37f   :  { %6122 = vst [vmem:[#allocation13_spill] sm:$0xff] %v5296_v30  ;;  %v5317_v30 = vadd.f32 %v4835_v24, %v6126_v26  ;;  %v2337_v26 = vmul.f32 0.2, %v5104_v48  ;;  %vm2274_vm8 = vcmp.gt.f32.partialorder %v5108_v13, 0.0  ;;  %vm2275_vm9 = vcmp.gt.f32.partialorder %v5112_v33, 0.0 }
 0x380   :  { %6123 = vst [vmem:[#allocation14_spill] sm:$0xff] %v5300_v19  ;;  %v5321_v19 = vadd.f32 %v4835_v24, %v6127_v41  ;;  %v5337_v41 = vadd.f32 %v4835_v24, %v5080_v1  ;;  %v5354_v1 = vadd.f32 %v4835_v24, %v5092_v6  ;;  %vm2276_vm10 = vcmp.gt.f32.partialorder %v5116_v37, 0.0 }
 0x381   :  { %6129 = vst [vmem:[#allocation33_spill] sm:$0xff] %v5327_v12  ;;  %v2399_v12 = vsel %vm2271_vm5, %v5096_v53, %v2335_v7  ;;  %vm2277_vm11 = vcmp.gt.f32.partialorder %v5120_v34, 0.0  ;;  %v2341_v46 = vmul.f32 0.2, %v5120_v34  ;;  %vm2278_vm12 = vcmp.gt.f32.partialorder %v5124_v17, 0.0 }
 0x382   :  { %6128 = vst [vmem:[#allocation32_spill] sm:$0xff] %v5321_v19  ;;  %v5341_v19 = vadd.f32 %v4835_v24, %v5084_v14  ;;  %v2340_v14 = vmul.f32 0.2, %v5116_v37  ;;  %v2342_v53 = vmul.f32 0.2, %v5124_v17  ;;  %v2402_v24 = vsel %vm2274_vm8, %v5108_v13, %v2338_v39 }
 0x383   :  { %6130 = vst [vmem:[#allocation34_spill] sm:$0xff] %v5331_v54  ;;  %v2339_v54 = vmul.f32 0.2, %v5112_v33  ;;  %v2463_v6 = vpack.c.bf16 %v2399_v12, %v2399_v12  ;;  %vm2279_vm13 = vcmp.gt.f32.partialorder %v5128_v38, 0.0  ;;  %v2343_v7 = vmul.f32 0.2, %v5128_v38 }
 0x384   :  { %6131 = vst [vmem:[#allocation38_spill] sm:$0xff] %v5337_v41  ;;  %vm2280_vm14 = vcmp.gt.f32.partialorder %v5132_v8, 0.0  ;;  %v2345_v41 = vmul.f32 0.2, %v5136_v21  ;;  %v2405_v13 = vsel %vm2277_vm11, %v5120_v34, %v2341_v46  ;;  %v2466_v12 = vpack.c.bf16 %v2402_v24, %v2402_v24 }
 0x385   :  { %6132 = vst [vmem:[#allocation39_spill] sm:$0xff] %v5341_v19  ;;  %v2400_v19 = vsel %vm2272_vm6, %v5100_v23, %v2336_v51  ;;  %v2403_v23 = vsel %vm2275_vm9, %v5112_v33, %v2339_v54  ;;  %vm2281_vm0 = vcmp.gt.f32.partialorder %v5136_v21, 0.0  ;;  %v2346_v33 = vmul.f32 0.2, %v5140_v40 }
 0x386   :  { %6133 = vst [vmem:[#allocation40_spill] sm:$0xff] %v5347_v63  ;;  %v2401_v63 = vsel %vm2273_vm7, %v5104_v48, %v2337_v26  ;;  %v2464_v51 = vpack.c.bf16 %v2400_v19, %v2400_v19  ;;  %v2404_v48 = vsel %vm2276_vm10, %v5116_v37, %v2340_v14  ;;  %v2406_v19 = vsel %vm2278_vm12, %v5124_v17, %v2342_v53 }
 0x387   :  { %6134 = vst [vmem:[#allocation15_spill] sm:$0xff] %v5354_v1  ;;  %v2344_v1 = vmul.f32 0.2, %v5132_v8  ;;  %v2465_v26 = vpack.c.bf16 %v2401_v63, %v2401_v63  ;;  %v2467_v54 = vpack.c.bf16 %v2403_v23, %v2403_v23  ;;  %vm2282_vm1 = vcmp.gt.f32.partialorder %v5140_v40, 0.0 }
 0x388   :  { %2528 = vst.msk [vmem:[%s5908_s4] sm:$0xf] %vm2527_vm15, %v2463_v6  ;;  %v2347_v37 = vmul.f32 0.2, %v5144_v47  ;;  %v2407_v34 = vsel %vm2279_vm13, %v5128_v38, %v2343_v7  ;;  %v2468_v39 = vpack.c.bf16 %v2404_v48, %v2404_v48  ;;  %vm2283_vm2 = vcmp.gt.f32.partialorder %v5144_v47, 0.0 }
 0x389   :  { %2529 = vst.msk [vmem:[%s5908_s4 + $0x4] sm:$0xf] %vm2527_vm15, %v2464_v51  ;;  %v2348_v17 = vmul.f32 0.2, %v5148_v2  ;;  %v2408_v63 = vsel %vm2280_vm14, %v5132_v8, %v2344_v1  ;;  %v2469_v14 = vpack.c.bf16 %v2405_v13, %v2405_v13  ;;  %vm2284_vm3 = vcmp.gt.f32.partialorder %v5148_v2, 0.0 }
 0x38a   :  { %2530 = vst.msk [vmem:[%s5908_s4 + $0x8] sm:$0xf] %vm2527_vm15, %v2465_v26  ;;  %v2349_v38 = vmul.f32 0.2, %v5152_v9  ;;  %v2409_v46 = vsel %vm2281_vm0, %v5136_v21, %v2345_v41  ;;  %v2470_v53 = vpack.c.bf16 %v2406_v19, %v2406_v19  ;;  %vm2285_vm4 = vcmp.gt.f32.partialorder %v5152_v9, 0.0 }
 0x38b   :  { %2531 = vst.msk [vmem:[%s5908_s4 + $0xc] sm:$0xf] %vm2527_vm15, %v2466_v12  ;;  %v2350_v8 = vmul.f32 0.2, %v5156_v29  ;;  %v2410_v1 = vsel %vm2282_vm1, %v5140_v40, %v2346_v33  ;;  %v2471_v24 = vpack.c.bf16 %v2407_v34, %v2407_v34  ;;  %vm2286_vm5 = vcmp.gt.f32.partialorder %v5156_v29, 0.0 }
 0x38c   :  { %2532 = vst.msk [vmem:[%s5908_s4 + $0x10] sm:$0xf] %vm2527_vm15, %v2467_v54  ;;  %v2351_v21 = vmul.f32 0.2, %v5160_v36  ;;  %v2411_v41 = vsel %vm2283_vm2, %v5144_v47, %v2347_v37  ;;  %v2472_v6 = vpack.c.bf16 %v2408_v63, %v2408_v63  ;;  %vm2287_vm6 = vcmp.gt.f32.partialorder %v5160_v36, 0.0 }
 0x38d   :  { %2533 = vst.msk [vmem:[%s5908_s4 + $0x14] sm:$0xf] %vm2527_vm15, %v2468_v39  ;;  %v2352_v40 = vmul.f32 0.2, %v5164_v57  ;;  %v2412_v7 = vsel %vm2284_vm3, %v5148_v2, %v2348_v17  ;;  %v2473_v23 = vpack.c.bf16 %v2409_v46, %v2409_v46  ;;  %vm2288_vm7 = vcmp.gt.f32.partialorder %v5164_v57, 0.0 }
 0x38e   :  { %2534 = vst.msk [vmem:[%s5908_s4 + $0x18] sm:$0xf] %vm2527_vm15, %v2469_v14  ;;  %v2353_v47 = vmul.f32 0.2, %v5168_v0  ;;  %v2413_v51 = vsel %vm2285_vm4, %v5152_v9, %v2349_v38  ;;  %v2474_v48 = vpack.c.bf16 %v2410_v1, %v2410_v1  ;;  %vm2289_vm8 = vcmp.gt.f32.partialorder %v5168_v0, 0.0 }
 0x38f   :  { %2535 = vst.msk [vmem:[%s5908_s4 + $0x1c] sm:$0xf] %vm2527_vm15, %v2470_v53  ;;  %v2354_v2 = vmul.f32 0.2, %v5172_v22  ;;  %v2414_v26 = vsel %vm2286_vm5, %v5156_v29, %v2350_v8  ;;  %v2475_v13 = vpack.c.bf16 %v2411_v41, %v2411_v41  ;;  %vm2290_vm9 = vcmp.gt.f32.partialorder %v5172_v22, 0.0 }
 0x390   :  { %2536 = vst.msk [vmem:[%s5908_s4 + $0x20] sm:$0xf] %vm2527_vm15, %v2471_v24  ;;  %v2355_v9 = vmul.f32 0.2, %v5176_v55  ;;  %v2415_v12 = vsel %vm2287_vm6, %v5160_v36, %v2351_v21  ;;  %v2476_v33 = vpack.c.bf16 %v2412_v7, %v2412_v7  ;;  %vm2291_vm10 = vcmp.gt.f32.partialorder %v5176_v55, 0.0 }
 0x391   :  { %2537 = vst.msk [vmem:[%s5908_s4 + $0x24] sm:$0xf] %vm2527_vm15, %v2472_v6  ;;  %v2356_v29 = vmul.f32 0.2, %v5180_v42  ;;  %v2416_v19 = vsel %vm2288_vm7, %v5164_v57, %v2352_v40  ;;  %v2477_v54 = vpack.c.bf16 %v2413_v51, %v2413_v51  ;;  %vm2292_vm11 = vcmp.gt.f32.partialorder %v5180_v42, 0.0 }
 0x392   :  { %2538 = vst.msk [vmem:[%s5908_s4 + $0x28] sm:$0xf] %vm2527_vm15, %v2473_v23  ;;  %v2357_v36 = vmul.f32 0.2, %v5184_v50  ;;  %v2417_v37 = vsel %vm2289_vm8, %v5168_v0, %v2353_v47  ;;  %v2478_v34 = vpack.c.bf16 %v2414_v26, %v2414_v26  ;;  %vm2293_vm12 = vcmp.gt.f32.partialorder %v5184_v50, 0.0 }
 0x393   :  { %2539 = vst.msk [vmem:[%s5908_s4 + $0x2c] sm:$0xf] %vm2527_vm15, %v2474_v48  ;;  %v2358_v57 = vmul.f32 0.2, %v5188_v20  ;;  %v2418_v39 = vsel %vm2290_vm9, %v5172_v22, %v2354_v2  ;;  %v2479_v17 = vpack.c.bf16 %v2415_v12, %v2415_v12  ;;  %vm2294_vm13 = vcmp.gt.f32.partialorder %v5188_v20, 0.0 }
 0x394   :  { %2540 = vst.msk [vmem:[%s5908_s4 + $0x30] sm:$0xf] %vm2527_vm15, %v2475_v13  ;;  %v2359_v0 = vmul.f32 0.2, %v5192_v56  ;;  %v2419_v63 = vsel %vm2291_vm10, %v5176_v55, %v2355_v9  ;;  %v2480_v14 = vpack.c.bf16 %v2416_v19, %v2416_v19  ;;  %vm2295_vm14 = vcmp.gt.f32.partialorder %v5192_v56, 0.0 }
 0x395   :  { %2541 = vst.msk [vmem:[%s5908_s4 + $0x34] sm:$0xf] %vm2527_vm15, %v2476_v33  ;;  %v2360_v22 = vmul.f32 0.2, %v5196_v10  ;;  %v2420_v38 = vsel %vm2292_vm11, %v5180_v42, %v2356_v29  ;;  %v2481_v46 = vpack.c.bf16 %v2417_v37, %v2417_v37  ;;  %vm2296_vm0 = vcmp.gt.f32.partialorder %v5196_v10, 0.0 }
 0x396   :  { %2542 = vst.msk [vmem:[%s5908_s4 + $0x38] sm:$0xf] %vm2527_vm15, %v2477_v54  ;;  %v2361_v55 = vmul.f32 0.2, %v5200_v35  ;;  %v2421_v53 = vsel %vm2293_vm12, %v5184_v50, %v2357_v36  ;;  %v2482_v8 = vpack.c.bf16 %v2418_v39, %v2418_v39  ;;  %vm2297_vm1 = vcmp.gt.f32.partialorder %v5200_v35, 0.0 }
 0x397   :  { %2543 = vst.msk [vmem:[%s5908_s4 + $0x3c] sm:$0xf] %vm2527_vm15, %v2478_v34  ;;  %v2362_v42 = vmul.f32 0.2, %v5204_v3  ;;  %v2422_v1 = vsel %vm2294_vm13, %v5188_v20, %v2358_v57  ;;  %v2483_v24 = vpack.c.bf16 %v2419_v63, %v2419_v63  ;;  %vm2298_vm2 = vcmp.gt.f32.partialorder %v5204_v3, 0.0 }
 0x398   :  { %2544 = vst.msk [vmem:[%s5908_s4 + $0x40] sm:$0xf] %vm2527_vm15, %v2479_v17  ;;  %v2363_v50 = vmul.f32 0.2, %v5208_v15  ;;  %v2423_v21 = vsel %vm2295_vm14, %v5192_v56, %v2359_v0  ;;  %v2484_v41 = vpack.c.bf16 %v2420_v38, %v2420_v38  ;;  %vm2299_vm3 = vcmp.gt.f32.partialorder %v5208_v15, 0.0 }
 0x399   :  { %2545 = vst.msk [vmem:[%s5908_s4 + $0x44] sm:$0xf] %vm2527_vm15, %v2480_v14  ;;  %v2364_v20 = vmul.f32 0.2, %v5212_v44  ;;  %v2424_v6 = vsel %vm2296_vm0, %v5196_v10, %v2360_v22  ;;  %v2485_v40 = vpack.c.bf16 %v2421_v53, %v2421_v53  ;;  %vm2300_vm4 = vcmp.gt.f32.partialorder %v5212_v44, 0.0 }
 0x39a   :  { %2546 = vst.msk [vmem:[%s5908_s4 + $0x48] sm:$0xf] %vm2527_vm15, %v2481_v46  ;;  %v2365_v56 = vmul.f32 0.2, %v5216_v4  ;;  %v2425_v7 = vsel %vm2297_vm1, %v5200_v35, %v2361_v55  ;;  %v2486_v23 = vpack.c.bf16 %v2422_v1, %v2422_v1  ;;  %vm2301_vm5 = vcmp.gt.f32.partialorder %v5216_v4, 0.0 }
 0x39b   :  { %2547 = vst.msk [vmem:[%s5908_s4 + $0x4c] sm:$0xf] %vm2527_vm15, %v2482_v8  ;;  %v2366_v10 = vmul.f32 0.2, %v5220_v31  ;;  %v2426_v47 = vsel %vm2298_vm2, %v5204_v3, %v2362_v42  ;;  %v2487_v51 = vpack.c.bf16 %v2423_v21, %v2423_v21  ;;  %vm2302_vm6 = vcmp.gt.f32.partialorder %v5220_v31, 0.0  ;;  %v6135_v3 = vld [vmem:[#allocation9_spill] sm:$0xff] }
 0x39c   :  { %2548 = vst.msk [vmem:[%s5908_s4 + $0x50] sm:$0xf] %vm2527_vm15, %v2483_v24  ;;  %v2367_v35 = vmul.f32 0.2, %v5224_v25  ;;  %v2427_v48 = vsel %vm2299_vm3, %v5208_v15, %v2363_v50  ;;  %v2488_v2 = vpack.c.bf16 %v2424_v6, %v2424_v6  ;;  %vm2303_vm7 = vcmp.gt.f32.partialorder %v5224_v25, 0.0 }
 0x39d   :  { %2549 = vst.msk [vmem:[%s5908_s4 + $0x54] sm:$0xf] %vm2527_vm15, %v2484_v41  ;;  %v2368_v26 = vmul.f32 0.2, %v6135_v3  ;;  %v2428_v13 = vsel %vm2300_vm4, %v5212_v44, %v2364_v20  ;;  %v2489_v9 = vpack.c.bf16 %v2425_v7, %v2425_v7  ;;  %vm2304_vm8 = vcmp.gt.f32.partialorder %v6135_v3, 0.0 }
 0x39e   :  { %2550 = vst.msk [vmem:[%s5908_s4 + $0x58] sm:$0xf] %vm2527_vm15, %v2485_v40  ;;  %v2369_v15 = vmul.f32 0.2, %v5232_v28  ;;  %v2429_v12 = vsel %vm2301_vm5, %v5216_v4, %v2365_v56  ;;  %v2490_v33 = vpack.c.bf16 %v2426_v47, %v2426_v47  ;;  %vm2305_vm9 = vcmp.gt.f32.partialorder %v5232_v28, 0.0 }
 0x39f   :  { %2551 = vst.msk [vmem:[%s5908_s4 + $0x5c] sm:$0xf] %vm2527_vm15, %v2486_v23  ;;  %v2370_v44 = vmul.f32 0.2, %v5236_v59  ;;  %v2430_v29 = vsel %vm2302_vm6, %v5220_v31, %v2366_v10  ;;  %v2491_v19 = vpack.c.bf16 %v2427_v48, %v2427_v48  ;;  %vm2306_vm10 = vcmp.gt.f32.partialorder %v5236_v59, 0.0 }
 0x3a0   :  { %2552 = vst.msk [vmem:[%s5908_s4 + $0x60] sm:$0xf] %vm2527_vm15, %v2487_v51  ;;  %v2371_v4 = vmul.f32 0.2, %v5240_v27  ;;  %v2431_v54 = vsel %vm2303_vm7, %v5224_v25, %v2367_v35  ;;  %v2492_v36 = vpack.c.bf16 %v2428_v13, %v2428_v13  ;;  %vm2307_vm11 = vcmp.gt.f32.partialorder %v5240_v27, 0.0 }
 0x3a1   :  { %2553 = vst.msk [vmem:[%s5908_s4 + $0x64] sm:$0xf] %vm2527_vm15, %v2488_v2  ;;  %v2372_v31 = vmul.f32 0.2, %v5244_v60  ;;  %v2432_v37 = vsel %vm2304_vm8, %v6135_v3, %v2368_v26  ;;  %v2493_v34 = vpack.c.bf16 %v2429_v12, %v2429_v12  ;;  %vm2308_vm12 = vcmp.gt.f32.partialorder %v5244_v60, 0.0 }
 0x3a2   :  { %2554 = vst.msk [vmem:[%s5908_s4 + $0x68] sm:$0xf] %vm2527_vm15, %v2489_v9  ;;  %v2373_v25 = vmul.f32 0.2, %v5248_v58  ;;  %v2433_v57 = vsel %vm2305_vm9, %v5232_v28, %v2369_v15  ;;  %v2494_v39 = vpack.c.bf16 %v2430_v29, %v2430_v29  ;;  %vm2309_vm13 = vcmp.gt.f32.partialorder %v5248_v58, 0.0 }
 0x3a3   :  { %2555 = vst.msk [vmem:[%s5908_s4 + $0x6c] sm:$0xf] %vm2527_vm15, %v2490_v33  ;;  %v2374_v17 = vmul.f32 0.2, %v5252_v49  ;;  %v2434_v0 = vsel %vm2306_vm10, %v5236_v59, %v2370_v44  ;;  %v2495_v63 = vpack.c.bf16 %v2431_v54, %v2431_v54  ;;  %vm2310_vm14 = vcmp.gt.f32.partialorder %v5252_v49, 0.0 }
 0x3a4   :  { %2556 = vst.msk [vmem:[%s5908_s4 + $0x70] sm:$0xf] %vm2527_vm15, %v2491_v19  ;;  %v2375_v28 = vmul.f32 0.2, %v5256_v61  ;;  %v2435_v14 = vsel %vm2307_vm11, %v5240_v27, %v2371_v4  ;;  %v2496_v22 = vpack.c.bf16 %v2432_v37, %v2432_v37  ;;  %vm2311_vm0 = vcmp.gt.f32.partialorder %v5256_v61, 0.0 }
 0x3a5   :  { %2557 = vst.msk [vmem:[%s5908_s4 + $0x74] sm:$0xf] %vm2527_vm15, %v2492_v36  ;;  %v2376_v59 = vmul.f32 0.2, %v5260_v62  ;;  %v2436_v38 = vsel %vm2308_vm12, %v5244_v60, %v2372_v31  ;;  %v2497_v46 = vpack.c.bf16 %v2433_v57, %v2433_v57  ;;  %vm2312_vm1 = vcmp.gt.f32.partialorder %v5260_v62, 0.0 }
 0x3a6   :  { %2558 = vst.msk [vmem:[%s5908_s4 + $0x78] sm:$0xf] %vm2527_vm15, %v2493_v34  ;;  %v2377_v27 = vmul.f32 0.2, %v5264_v52  ;;  %v2437_v55 = vsel %vm2309_vm13, %v5248_v58, %v2373_v25  ;;  %v2498_v53 = vpack.c.bf16 %v2434_v0, %v2434_v0  ;;  %vm2313_vm2 = vcmp.gt.f32.partialorder %v5264_v52, 0.0  ;;  %v6141_v34 = vld [vmem:[#allocation32_spill] sm:$0xff] }
 0x3a7   :  { %2559 = vst.msk [vmem:[%s5908_s4 + $0x7c] sm:$0xf] %vm2527_vm15, %v2494_v39  ;;  %v2378_v60 = vmul.f32 0.2, %v5268_v5  ;;  %v2438_v8 = vsel %vm2310_vm14, %v5252_v49, %v2374_v17  ;;  %v2499_v42 = vpack.c.bf16 %v2435_v14, %v2435_v14  ;;  %vm2314_vm3 = vcmp.gt.f32.partialorder %v5268_v5, 0.0  ;;  %v6142_v17 = vld [vmem:[#allocation33_spill] sm:$0xff] }
 0x3a8   :  { %2560 = vst.msk [vmem:[%s5908_s4 + $0x80] sm:$0xf] %vm2527_vm15, %v2495_v63  ;;  %v2379_v58 = vmul.f32 0.2, %v5272_v43  ;;  %v2439_v1 = vsel %vm2311_vm0, %v5256_v61, %v2375_v28  ;;  %v2500_v24 = vpack.c.bf16 %v2436_v38, %v2436_v38  ;;  %vm2315_vm4 = vcmp.gt.f32.partialorder %v5272_v43, 0.0 }
 0x3a9   :  { %2561 = vst.msk [vmem:[%s5908_s4 + $0x84] sm:$0xf] %vm2527_vm15, %v2496_v22  ;;  %v2380_v49 = vmul.f32 0.2, %v5276_v32  ;;  %v2440_v50 = vsel %vm2312_vm1, %v5260_v62, %v2376_v59  ;;  %v2501_v21 = vpack.c.bf16 %v2437_v55, %v2437_v55  ;;  %vm2316_vm5 = vcmp.gt.f32.partialorder %v5276_v32, 0.0  ;;  %v6136_v62 = vld [vmem:[#allocation10_spill] sm:$0xff] }
 0x3aa   :  { %2562 = vst.msk [vmem:[%s5908_s4 + $0x88] sm:$0xf] %vm2527_vm15, %v2497_v46  ;;  %v2381_v61 = vmul.f32 0.2, %v5280_v18  ;;  %v2441_v41 = vsel %vm2313_vm2, %v5264_v52, %v2377_v27  ;;  %v2502_v20 = vpack.c.bf16 %v2438_v8, %v2438_v8  ;;  %vm2317_vm6 = vcmp.gt.f32.partialorder %v5280_v18, 0.0  ;;  %v6137_v52 = vld [vmem:[#allocation11_spill] sm:$0xff] }
 0x3ab   :  { %2563 = vst.msk [vmem:[%s5908_s4 + $0x8c] sm:$0xf] %vm2527_vm15, %v2498_v53  ;;  %v2382_v6 = vmul.f32 0.2, %v6136_v62  ;;  %v2442_v40 = vsel %vm2314_vm3, %v5268_v5, %v2378_v60  ;;  %v2503_v56 = vpack.c.bf16 %v2439_v1, %v2439_v1  ;;  %vm2318_vm7 = vcmp.gt.f32.partialorder %v6136_v62, 0.0  ;;  %v6138_v5 = vld [vmem:[#allocation12_spill] sm:$0xff] }
 0x3ac   :  { %2564 = vst.msk [vmem:[%s5908_s4 + $0x90] sm:$0xf] %vm2527_vm15, %v2499_v42  ;;  %v2383_v7 = vmul.f32 0.2, %v6137_v52  ;;  %v2443_v23 = vsel %vm2315_vm4, %v5272_v43, %v2379_v58  ;;  %v2504_v10 = vpack.c.bf16 %v2440_v50, %v2440_v50  ;;  %vm2319_vm8 = vcmp.gt.f32.partialorder %v6137_v52, 0.0  ;;  %v6139_v43 = vld [vmem:[#allocation13_spill] sm:$0xff] }
 0x3ad   :  { %2565 = vst.msk [vmem:[%s5908_s4 + $0x94] sm:$0xf] %vm2527_vm15, %v2500_v24  ;;  %v2384_v47 = vmul.f32 0.2, %v6138_v5  ;;  %v2444_v51 = vsel %vm2316_vm5, %v5276_v32, %v2380_v49  ;;  %v2505_v35 = vpack.c.bf16 %v2441_v41, %v2441_v41  ;;  %vm2320_vm9 = vcmp.gt.f32.partialorder %v6138_v5, 0.0  ;;  %v6140_v32 = vld [vmem:[#allocation14_spill] sm:$0xff] }
 0x3ae   :  { %2566 = vst.msk [vmem:[%s5908_s4 + $0x98] sm:$0xf] %vm2527_vm15, %v2501_v21  ;;  %v2385_v48 = vmul.f32 0.2, %v6139_v43  ;;  %v2445_v2 = vsel %vm2317_vm6, %v5280_v18, %v2381_v61  ;;  %v2506_v3 = vpack.c.bf16 %v2442_v40, %v2442_v40  ;;  %vm2321_vm10 = vcmp.gt.f32.partialorder %v6139_v43, 0.0  ;;  %v6147_v1 = vld [vmem:[#allocation15_spill] sm:$0xff] }
 0x3af   :  { %2567 = vst.msk [vmem:[%s5908_s4 + $0x9c] sm:$0xf] %vm2527_vm15, %v2502_v20  ;;  %v2386_v26 = vmul.f32 0.2, %v6140_v32  ;;  %v2446_v13 = vsel %vm2318_vm7, %v6136_v62, %v2382_v6  ;;  %v2507_v9 = vpack.c.bf16 %v2443_v23, %v2443_v23  ;;  %vm2322_vm11 = vcmp.gt.f32.partialorder %v6140_v32, 0.0  ;;  %v6148_v21 = vld [vmem:[#allocation2_spill] sm:$0xff] }
 0x3b0   :  { %2568 = vst.msk [vmem:[%s5908_s4 + $0xa0] sm:$0xf] %vm2527_vm15, %v2503_v56  ;;  %v2387_v18 = vmul.f32 0.2, %v5304_v45  ;;  %v2447_v15 = vsel %vm2319_vm8, %v6137_v52, %v2383_v7  ;;  %v2508_v12 = vpack.c.bf16 %v2444_v51, %v2444_v51  ;;  %vm2323_vm12 = vcmp.gt.f32.partialorder %v5304_v45, 0.0 }
 0x3b1   :  { %2569 = vst.msk [vmem:[%s5908_s4 + $0xa4] sm:$0xf] %vm2527_vm15, %v2504_v10  ;;  %v2388_v33 = vmul.f32 0.2, %v5308_v11  ;;  %v2448_v44 = vsel %vm2320_vm9, %v6138_v5, %v2384_v47  ;;  %v2509_v29 = vpack.c.bf16 %v2445_v2, %v2445_v2  ;;  %vm2324_vm13 = vcmp.gt.f32.partialorder %v5308_v11, 0.0 }
 0x3b2   :  { %2570 = vst.msk [vmem:[%s5908_s4 + $0xa8] sm:$0xf] %vm2527_vm15, %v2505_v35  ;;  %v2389_v19 = vmul.f32 0.2, %v5312_v16  ;;  %v2449_v4 = vsel %vm2321_vm10, %v6139_v43, %v2385_v48  ;;  %v2510_v54 = vpack.c.bf16 %v2446_v13, %v2446_v13  ;;  %vm2325_vm14 = vcmp.gt.f32.partialorder %v5312_v16, 0.0 }
 0x3b3   :  { %2571 = vst.msk [vmem:[%s5908_s4 + $0xac] sm:$0xf] %vm2527_vm15, %v2506_v3  ;;  %v2390_v36 = vmul.f32 0.2, %v5317_v30  ;;  %v2450_v31 = vsel %vm2322_vm11, %v6140_v32, %v2386_v26  ;;  %v2511_v37 = vpack.c.bf16 %v2447_v15, %v2447_v15  ;;  %vm2326_vm0 = vcmp.gt.f32.partialorder %v5317_v30, 0.0 }
 0x3b4   :  { %2572 = vst.msk [vmem:[%s5908_s4 + $0xb0] sm:$0xf] %vm2527_vm15, %v2507_v9  ;;  %v2391_v25 = vmul.f32 0.2, %v6141_v34  ;;  %v2451_v57 = vsel %vm2323_vm12, %v5304_v45, %v2387_v18  ;;  %v2512_v39 = vpack.c.bf16 %v2448_v44, %v2448_v44  ;;  %vm2327_vm1 = vcmp.gt.f32.partialorder %v6141_v34, 0.0  ;;  %v6143_v45 = vld [vmem:[#allocation34_spill] sm:$0xff] }
 0x3b5   :  { %2573 = vst.msk [vmem:[%s5908_s4 + $0xb4] sm:$0xf] %vm2527_vm15, %v2508_v12  ;;  %v2392_v0 = vmul.f32 0.2, %v6142_v17  ;;  %v2452_v63 = vsel %vm2324_vm13, %v5308_v11, %v2388_v33  ;;  %v2513_v28 = vpack.c.bf16 %v2449_v4, %v2449_v4  ;;  %vm2328_vm2 = vcmp.gt.f32.partialorder %v6142_v17, 0.0  ;;  %v6144_v11 = vld [vmem:[#allocation38_spill] sm:$0xff] }
 0x3b6   :  { %2574 = vst.msk [vmem:[%s5908_s4 + $0xb8] sm:$0xf] %vm2527_vm15, %v2509_v29  ;;  %v2393_v14 = vmul.f32 0.2, %v6143_v45  ;;  %v2453_v22 = vsel %vm2325_vm14, %v5312_v16, %v2389_v19  ;;  %v2514_v59 = vpack.c.bf16 %v2450_v31, %v2450_v31  ;;  %vm2329_vm3 = vcmp.gt.f32.partialorder %v6143_v45, 0.0  ;;  %v6145_v16 = vld [vmem:[#allocation39_spill] sm:$0xff] }
 0x3b7   :  { %2575 = vst.msk [vmem:[%s5908_s4 + $0xbc] sm:$0xf] %vm2527_vm15, %v2510_v54  ;;  %v2394_v38 = vmul.f32 0.2, %v6144_v11  ;;  %v2454_v46 = vsel %vm2326_vm0, %v5317_v30, %v2390_v36  ;;  %v2515_v27 = vpack.c.bf16 %v2451_v57, %v2451_v57  ;;  %vm2330_vm4 = vcmp.gt.f32.partialorder %v6144_v11, 0.0  ;;  %v6146_v30 = vld [vmem:[#allocation40_spill] sm:$0xff] }
 0x3b8   :  { %2576 = vst.msk [vmem:[%s5908_s4 + $0xc0] sm:$0xf] %vm2527_vm15, %v2511_v37  ;;  %v2395_v55 = vmul.f32 0.2, %v6145_v16  ;;  %v2455_v53 = vsel %vm2327_vm1, %v6141_v34, %v2391_v25  ;;  %v2516_v60 = vpack.c.bf16 %v2452_v63, %v2452_v63  ;;  %vm2331_vm5 = vcmp.gt.f32.partialorder %v6145_v16, 0.0 }
 0x3b9   :  { %2577 = vst.msk [vmem:[%s5908_s4 + $0xc4] sm:$0xf] %vm2527_vm15, %v2512_v39  ;;  %v2396_v8 = vmul.f32 0.2, %v6146_v30  ;;  %v2456_v42 = vsel %vm2328_vm2, %v6142_v17, %v2392_v0  ;;  %v2517_v58 = vpack.c.bf16 %v2453_v22, %v2453_v22  ;;  %vm2332_vm6 = vcmp.gt.f32.partialorder %v6146_v30, 0.0 }
 0x3ba   :  { %2578 = vst.msk [vmem:[%s5908_s4 + $0xc8] sm:$0xf] %vm2527_vm15, %v2513_v28  ;;  %v2397_v24 = vmul.f32 0.2, %v6147_v1  ;;  %v2457_v49 = vsel %vm2329_vm3, %v6143_v45, %v2393_v14  ;;  %v2518_v50 = vpack.c.bf16 %v2454_v46, %v2454_v46  ;;  %vm2333_vm7 = vcmp.gt.f32.partialorder %v6147_v1, 0.0 }
 0x3bb   :  { %2579 = vst.msk [vmem:[%s5908_s4 + $0xcc] sm:$0xf] %vm2527_vm15, %v2514_v59  ;;  %v2398_v61 = vmul.f32 0.2, %v6148_v21  ;;  %v2458_v41 = vsel %vm2330_vm4, %v6144_v11, %v2394_v38  ;;  %v2519_v20 = vpack.c.bf16 %v2455_v53, %v2455_v53  ;;  %vm2334_vm8 = vcmp.gt.f32.partialorder %v6148_v21, 0.0 }
 0x3bc   :  { %2580 = vst.msk [vmem:[%s5908_s4 + $0xd0] sm:$0xf] %vm2527_vm15, %v2515_v27  ;;  %v2459_v62 = vsel %vm2331_vm5, %v6145_v16, %v2395_v55  ;;  %v2520_v6 = vpack.c.bf16 %v2456_v42, %v2456_v42  ;;  %v2460_v40 = vsel %vm2332_vm6, %v6146_v30, %v2396_v8  ;;  %v2521_v56 = vpack.c.bf16 %v2457_v49, %v2457_v49 }
 0x3bd   :  { %2581 = vst.msk [vmem:[%s5908_s4 + $0xd4] sm:$0xf] %vm2527_vm15, %v2516_v60  ;;  %v2461_v52 = vsel %vm2333_vm7, %v6147_v1, %v2397_v24  ;;  %v2522_v7 = vpack.c.bf16 %v2458_v41, %v2458_v41  ;;  %v2462_v23 = vsel %vm2334_vm8, %v6148_v21, %v2398_v61  ;;  %v2523_v10 = vpack.c.bf16 %v2459_v62, %v2459_v62 }
 0x3be   :  { %2582 = vst.msk [vmem:[%s5908_s4 + $0xd8] sm:$0xf] %vm2527_vm15, %v2517_v58  ;;  %v2524_v5 = vpack.c.bf16 %v2460_v40, %v2460_v40  ;;  %v2525_v47 = vpack.c.bf16 %v2461_v52, %v2461_v52  ;;  %v2526_v51 = vpack.c.bf16 %v2462_v23, %v2462_v23 }
 0x3bf   :  { %2583 = vst.msk [vmem:[%s5908_s4 + $0xdc] sm:$0xf] %vm2527_vm15, %v2518_v50 }
 0x3c0   :  { %2584 = vst.msk [vmem:[%s5908_s4 + $0xe0] sm:$0xf] %vm2527_vm15, %v2519_v20 }
 0x3c1   :  { %2585 = vst.msk [vmem:[%s5908_s4 + $0xe4] sm:$0xf] %vm2527_vm15, %v2520_v6 }
 0x3c2   :  { %2586 = vst.msk [vmem:[%s5908_s4 + $0xe8] sm:$0xf] %vm2527_vm15, %v2521_v56 }
 0x3c3   :  { %2587 = vst.msk [vmem:[%s5908_s4 + $0xec] sm:$0xf] %vm2527_vm15, %v2522_v7 }
 0x3c4   :  { %2588 = vst.msk [vmem:[%s5908_s4 + $0xf0] sm:$0xf] %vm2527_vm15, %v2523_v10 }
 0x3c5   :  { %2589 = vst.msk [vmem:[%s5908_s4 + $0xf4] sm:$0xf] %vm2527_vm15, %v2524_v5 }
 0x3c6   :  { %2590 = vst.msk [vmem:[%s5908_s4 + $0xf8] sm:$0xf] %vm2527_vm15, %v2525_v47 }
 0x3c7   :  { %2591 = vst.msk [vmem:[%s5908_s4 + $0xfc] sm:$0xf] %vm2527_vm15, %v2526_v51 }

// kernel: discriminator_forward.7
= control target key start
LH: loop header
LB: loop body
LE: loop exit
PB: predicated region body
PF: predicated region fallthrough
CT: control target
= control target key end

     0   :  { %vm661_vm0 = vcmask 261120   ;;  %vm895_vm5 = vcmask 257024   ;;  %s1779_s1 = inlined_call_operand.vmem [shape: bf16[512,32], index: 1, kind: input, shape index: {}]   ;;  %s1780_s0 = inlined_call_operand.vmem [shape: bf16[128,512], index: 0, kind: input, shape index: {}]   ;;  %s1781_s2 = inlined_call_operand.vmem [shape: f32[1,32], index: 2, kind: input, shape index: {}]   ;;  %s1782_s3 = inlined_call_operand.vmem [shape: f32[1,32], index: 3, kind: input, shape index: {}]   ;;  %s1783_s4 = inlined_call_operand.vmem [shape: bf16[128,32], index: 4, kind: output, shape index: {}]  }
   0x1   :  { %v1211_v0 = vld [vmem:[%s1779_s1 + $0x38] sm:$0xff]  ;;  %v1210_v4 = vld [vmem:[%s1779_s1 + $0x30] sm:$0xff]  ;;  %v1209_v8 = vld [vmem:[%s1779_s1 + $0x28] sm:$0xff] }
   0x2   :  { %v1219_v1 = vld [vmem:[%s1779_s1 + $0x78] sm:$0xff]  ;;  %465 = vmatpush.bf16.msra.mxu0 %v1211_v0  ;;  %v1218_v5 = vld [vmem:[%s1779_s1 + $0x70] sm:$0xff]  ;;  %v1217_v9 = vld [vmem:[%s1779_s1 + $0x68] sm:$0xff] }
   0x3   :  { %v1227_v2 = vld [vmem:[%s1779_s1 + $0xb8] sm:$0xff]  ;;  %514 = vmatpush.bf16.msra.mxu1 %v1219_v1  ;;  %v1226_v6 = vld [vmem:[%s1779_s1 + $0xb0] sm:$0xff]  ;;  %v1225_v10 = vld [vmem:[%s1779_s1 + $0xa8] sm:$0xff] }
   0x4   :  { %v1235_v3 = vld [vmem:[%s1779_s1 + $0xf8] sm:$0xff]  ;;  %563 = vmatpush.bf16.msra.mxu2 %v1227_v2  ;;  %v1234_v7 = vld [vmem:[%s1779_s1 + $0xf0] sm:$0xff]  ;;  %v1233_v11 = vld [vmem:[%s1779_s1 + $0xe8] sm:$0xff] }
   0x5   :  { %612 = vmatpush.bf16.msra.mxu3 %v1235_v3  ;;  %v1208_v12 = vld [vmem:[%s1779_s1 + $0x20] sm:$0xff]  ;;  %v1207_v16 = vld [vmem:[%s1779_s1 + $0x18] sm:$0xff]  ;;  %v1206_v20 = vld [vmem:[%s1779_s1 + $0x10] sm:$0xff] }
   0x6   :  { %466 = vmatpush.bf16.msra.mxu0 %v1210_v4  ;;  %v1216_v13 = vld [vmem:[%s1779_s1 + $0x60] sm:$0xff]  ;;  %v1215_v17 = vld [vmem:[%s1779_s1 + $0x58] sm:$0xff]  ;;  %v1214_v21 = vld [vmem:[%s1779_s1 + $0x50] sm:$0xff] }
   0x7   :  { %515 = vmatpush.bf16.msra.mxu1 %v1218_v5  ;;  %v1224_v14 = vld [vmem:[%s1779_s1 + $0xa0] sm:$0xff]  ;;  %v1223_v18 = vld [vmem:[%s1779_s1 + $0x98] sm:$0xff]  ;;  %v1222_v22 = vld [vmem:[%s1779_s1 + $0x90] sm:$0xff] }
   0x8   :  { %564 = vmatpush.bf16.msra.mxu2 %v1226_v6  ;;  %v1232_v15 = vld [vmem:[%s1779_s1 + $0xe0] sm:$0xff]  ;;  %v1231_v19 = vld [vmem:[%s1779_s1 + $0xd8] sm:$0xff]  ;;  %v1230_v23 = vld [vmem:[%s1779_s1 + $0xd0] sm:$0xff] }
   0x9   :  { %613 = vmatpush.bf16.msra.mxu3 %v1234_v7  ;;  %v1205_v24 = vld [vmem:[%s1779_s1 + $0x8] sm:$0xff]  ;;  %v1204_v28 = vld [vmem:[%s1779_s1] sm:$0xff]  ;;  %v1174_v33 = vld [vmem:[%s1780_s0 + $0xc] sm:$0xf0] }
   0xa   :  { %467 = vmatpush.bf16.msra.mxu0 %v1209_v8  ;;  %v1213_v25 = vld [vmem:[%s1779_s1 + $0x48] sm:$0xff]  ;;  %v1212_v29 = vld [vmem:[%s1779_s1 + $0x40] sm:$0xff]  ;;  %v920_v35 = vld [vmem:[%s1780_s0 + $0x10] sm:$0xf0] }
   0xb   :  { %516 = vmatpush.bf16.msra.mxu1 %v1217_v9  ;;  %v1221_v26 = vld [vmem:[%s1779_s1 + $0x88] sm:$0xff]  ;;  %v1220_v30 = vld [vmem:[%s1779_s1 + $0x80] sm:$0xff]  ;;  %v1175_v37 = vld [vmem:[%s1780_s0 + $0x14] sm:$0xf0] }
   0xc   :  { %565 = vmatpush.bf16.msra.mxu2 %v1225_v10  ;;  %v1229_v27 = vld [vmem:[%s1779_s1 + $0xc8] sm:$0xff]  ;;  %v1228_v31 = vld [vmem:[%s1779_s1 + $0xc0] sm:$0xff]  ;;  %v928_v39 = vld [vmem:[%s1780_s0 + $0x18] sm:$0xf0] }
   0xd   :  { %614 = vmatpush.bf16.msra.mxu3 %v1233_v11  ;;  %v918_v32 = vld [vmem:[%s1780_s0] sm:$0xf]  ;;  %v1172_v34 = vld [vmem:[%s1780_s0 + $0x4] sm:$0xf]  ;;  %v926_v36 = vld [vmem:[%s1780_s0 + $0x8] sm:$0xf] }
   0xe   :  { %468 = vmatpush.bf16.msra.mxu0 %v1208_v12  ;;  %v1173_v38 = vld [vmem:[%s1780_s0 + $0xc] sm:$0xf]  ;;  %v919_v40 = vor.u32 %v1174_v33, %v918_v32  ;;  %v923_v41 = vor.u32 %v1172_v34, %v920_v35  ;;  %v927_v42 = vor.u32 %v1175_v37, %v926_v36  ;;  %v934_v44 = vld [vmem:[%s1780_s0 + $0x20] sm:$0xf]  ;;  %v1178_v45 = vld [vmem:[%s1780_s0 + $0x2c] sm:$0xf0] }
   0xf   :  { %517 = vmatpush.bf16.msra.mxu1 %v1216_v13  ;;  %v931_v43 = vor.u32 %v1173_v38, %v928_v39  ;;  %v1176_v46 = vld [vmem:[%s1780_s0 + $0x24] sm:$0xf]  ;;  %v936_v47 = vld [vmem:[%s1780_s0 + $0x30] sm:$0xf0]  ;;  %v942_v48 = vld [vmem:[%s1780_s0 + $0x28] sm:$0xf]  ;;  %v935_v52 = vor.u32 %v1178_v45, %v934_v44 }
  0x10   :  { %566 = vmatpush.bf16.msra.mxu2 %v1224_v14  ;;  %v1179_v49 = vld [vmem:[%s1780_s0 + $0x34] sm:$0xf0]  ;;  %v1177_v50 = vld [vmem:[%s1780_s0 + $0x2c] sm:$0xf]  ;;  %v944_v51 = vld [vmem:[%s1780_s0 + $0x38] sm:$0xf0]  ;;  %v939_v53 = vor.u32 %v1176_v46, %v936_v47 }
  0x11   :  { %615 = vmatpush.bf16.msra.mxu3 %v1232_v15  ;;  %v943_v54 = vor.u32 %v1179_v49, %v942_v48  ;;  %v947_v55 = vor.u32 %v1177_v50, %v944_v51  ;;  %v950_v56 = vld [vmem:[%s1780_s0 + $0x40] sm:$0xf]  ;;  %v1182_v57 = vld [vmem:[%s1780_s0 + $0x4c] sm:$0xf0]  ;;  %v1180_v58 = vld [vmem:[%s1780_s0 + $0x44] sm:$0xf] }
  0x12   :  { %469 = vmatpush.bf16.msra.mxu0 %v1207_v16  ;;  %v952_v59 = vld [vmem:[%s1780_s0 + $0x50] sm:$0xf0]  ;;  %v958_v60 = vld [vmem:[%s1780_s0 + $0x48] sm:$0xf]  ;;  %v1183_v61 = vld [vmem:[%s1780_s0 + $0x54] sm:$0xf0]  ;;  %v951_v0 = vor.u32 %v1182_v57, %v950_v56 }
  0x13   :  { %518 = vmatpush.bf16.msra.mxu1 %v1215_v17  ;;  %v1181_v62 = vld [vmem:[%s1780_s0 + $0x4c] sm:$0xf]  ;;  %v960_v63 = vld [vmem:[%s1780_s0 + $0x58] sm:$0xf0]  ;;  %v955_v1 = vor.u32 %v1180_v58, %v952_v59  ;;  %v959_v2 = vor.u32 %v1183_v61, %v958_v60  ;;  %v966_v4 = vld [vmem:[%s1780_s0 + $0x60] sm:$0xf] }
  0x14   :  { %567 = vmatpush.bf16.msra.mxu2 %v1223_v18  ;;  %v963_v3 = vor.u32 %v1181_v62, %v960_v63  ;;  %v1186_v5 = vld [vmem:[%s1780_s0 + $0x6c] sm:$0xf0]  ;;  %v1184_v6 = vld [vmem:[%s1780_s0 + $0x64] sm:$0xf]  ;;  %v968_v7 = vld [vmem:[%s1780_s0 + $0x70] sm:$0xf0] }
  0x15   :  { %616 = vmatpush.bf16.msra.mxu3 %v1231_v19  ;;  %v974_v8 = vld [vmem:[%s1780_s0 + $0x68] sm:$0xf]  ;;  %v1187_v9 = vld [vmem:[%s1780_s0 + $0x74] sm:$0xf0]  ;;  %v1185_v10 = vld [vmem:[%s1780_s0 + $0x6c] sm:$0xf]  ;;  %v967_v12 = vor.u32 %v1186_v5, %v966_v4  ;;  %v971_v13 = vor.u32 %v1184_v6, %v968_v7 }
  0x16   :  { %470 = vmatpush.bf16.msra.mxu0 %v1206_v20  ;;  %v976_v11 = vld [vmem:[%s1780_s0 + $0x78] sm:$0xf0]  ;;  %v975_v14 = vor.u32 %v1187_v9, %v974_v8  ;;  %v982_v16 = vld [vmem:[%s1780_s0 + $0x80] sm:$0xf]  ;;  %v1190_v17 = vld [vmem:[%s1780_s0 + $0x8c] sm:$0xf0] }
  0x17   :  { %519 = vmatpush.bf16.msra.mxu1 %v1214_v21  ;;  %v979_v15 = vor.u32 %v1185_v10, %v976_v11  ;;  %v1188_v18 = vld [vmem:[%s1780_s0 + $0x84] sm:$0xf]  ;;  %v984_v19 = vld [vmem:[%s1780_s0 + $0x90] sm:$0xf0]  ;;  %v990_v20 = vld [vmem:[%s1780_s0 + $0x88] sm:$0xf] }
  0x18   :  { %568 = vmatpush.bf16.msra.mxu2 %v1222_v22  ;;  %v1191_v21 = vld [vmem:[%s1780_s0 + $0x94] sm:$0xf0]  ;;  %v1189_v22 = vld [vmem:[%s1780_s0 + $0x8c] sm:$0xf]  ;;  %v1006_v32 = vld [vmem:[%s1780_s0 + $0xa8] sm:$0xf] }
  0x19   :  { %617 = vmatpush.bf16.msra.mxu3 %v1230_v23  ;;  %v992_v23 = vld [vmem:[%s1780_s0 + $0x98] sm:$0xf0]  ;;  %v1195_v33 = vld [vmem:[%s1780_s0 + $0xb4] sm:$0xf0]  ;;  %v1193_v34 = vld [vmem:[%s1780_s0 + $0xac] sm:$0xf] }
  0x1a   :  { %471 = vmatpush.bf16.msra.mxu0 %v1205_v24  ;;  %v983_v24 = vor.u32 %v1190_v17, %v982_v16  ;;  %v1008_v35 = vld [vmem:[%s1780_s0 + $0xb8] sm:$0xf0]  ;;  %v1007_v38 = vor.u32 %v1195_v33, %v1006_v32  ;;  %v1022_v44 = vld [vmem:[%s1780_s0 + $0xc8] sm:$0xf]  ;;  %v1199_v45 = vld [vmem:[%s1780_s0 + $0xd4] sm:$0xf0] }
  0x1b   :  { %520 = vmatpush.bf16.msra.mxu1 %v1213_v25  ;;  %v987_v25 = vor.u32 %v1188_v18, %v984_v19  ;;  %v1011_v39 = vor.u32 %v1193_v34, %v1008_v35  ;;  %v1197_v46 = vld [vmem:[%s1780_s0 + $0xcc] sm:$0xf]  ;;  %v1024_v47 = vld [vmem:[%s1780_s0 + $0xd8] sm:$0xf0]  ;;  %v1023_v50 = vor.u32 %v1199_v45, %v1022_v44  ;;  %v1038_v56 = vld [vmem:[%s1780_s0 + $0xe8] sm:$0xf] }
  0x1c   :  { %569 = vmatpush.bf16.msra.mxu2 %v1221_v26  ;;  %v991_v26 = vor.u32 %v1191_v21, %v990_v20  ;;  %v1027_v51 = vor.u32 %v1197_v46, %v1024_v47  ;;  %v1203_v57 = vld [vmem:[%s1780_s0 + $0xf4] sm:$0xf0]  ;;  %v1201_v58 = vld [vmem:[%s1780_s0 + $0xec] sm:$0xf]  ;;  %v1040_v59 = vld [vmem:[%s1780_s0 + $0xf8] sm:$0xf0] }
  0x1d   :  { %618 = vmatpush.bf16.msra.mxu3 %v1229_v27  ;;  %v995_v27 = vor.u32 %v1189_v22, %v992_v23  ;;  %v1039_v62 = vor.u32 %v1203_v57, %v1038_v56  ;;  %v1043_v63 = vor.u32 %v1201_v58, %v1040_v59 }
  0x1e   :  { %472 = vmatpush.bf16.msra.mxu0 %v1204_v28  ;;  %v998_v28 = vld [vmem:[%s1780_s0 + $0xa0] sm:$0xf] }
  0x1f   :  { %521 = vmatpush.bf16.msra.mxu1 %v1212_v29  ;;  %v1194_v29 = vld [vmem:[%s1780_s0 + $0xac] sm:$0xf0] }
  0x20   :  { %570 = vmatpush.bf16.msra.mxu2 %v1220_v30  ;;  %v1192_v30 = vld [vmem:[%s1780_s0 + $0xa4] sm:$0xf]  ;;  %v999_v36 = vor.u32 %v1194_v29, %v998_v28 }
  0x21   :  { %619 = vmatpush.bf16.msra.mxu3 %v1228_v31  ;;  %473 = vmatmul.bf16.vlgmr.msra.gmra.mxu0 %v919_v40  ;;  %v1000_v31 = vld [vmem:[%s1780_s0 + $0xb0] sm:$0xf0]  ;;  %v1014_v40 = vld [vmem:[%s1780_s0 + $0xc0] sm:$0xf] }
  0x22   :  { %522 = vmatmul.bf16.vlgmr.msra.gmra.mxu1 %v923_v41  ;;  %v1003_v37 = vor.u32 %v1192_v30, %v1000_v31  ;;  %v1198_v41 = vld [vmem:[%s1780_s0 + $0xcc] sm:$0xf0] }
  0x23   :  { %571 = vmatmul.bf16.vlgmr.msra.gmra.mxu2 %v927_v42  ;;  %v1196_v42 = vld [vmem:[%s1780_s0 + $0xc4] sm:$0xf]  ;;  %v1015_v48 = vor.u32 %v1198_v41, %v1014_v40 }
  0x24   :  { %620 = vmatmul.bf16.vlgmr.msra.gmra.mxu3 %v931_v43  ;;  %v1016_v43 = vld [vmem:[%s1780_s0 + $0xd0] sm:$0xf0] }
  0x25   :  { %v1019_v49 = vor.u32 %v1196_v42, %v1016_v43 }
  0x31   :  { %478 = vmatmul.bf16.gmra.mxu0 %v935_v52  ;;  %v1030_v52 = vld [vmem:[%s1780_s0 + $0xe0] sm:$0xf] }
  0x32   :  { %527 = vmatmul.bf16.gmra.mxu1 %v939_v53  ;;  %v1202_v53 = vld [vmem:[%s1780_s0 + $0xec] sm:$0xf0] }
  0x33   :  { %576 = vmatmul.bf16.gmra.mxu2 %v943_v54  ;;  %v1200_v54 = vld [vmem:[%s1780_s0 + $0xe4] sm:$0xf]  ;;  %v1031_v60 = vor.u32 %v1202_v53, %v1030_v52 }
  0x34   :  { %625 = vmatmul.bf16.gmra.mxu3 %v947_v55  ;;  %v1032_v55 = vld [vmem:[%s1780_s0 + $0xf0] sm:$0xf0] }
  0x35   :  { %v1035_v61 = vor.u32 %v1200_v54, %v1032_v55 }
  0x41   :  { %483 = vmatmul.bf16.gmra.mxu0 %v951_v0 }
  0x42   :  { %532 = vmatmul.bf16.gmra.mxu1 %v955_v1 }
  0x43   :  { %581 = vmatmul.bf16.gmra.mxu2 %v959_v2 }
  0x44   :  { %630 = vmatmul.bf16.gmra.mxu3 %v963_v3 }
  0x51   :  { %488 = vmatmul.bf16.gmra.mxu0 %v967_v12 }
  0x52   :  { %537 = vmatmul.bf16.gmra.mxu1 %v971_v13 }
  0x53   :  { %586 = vmatmul.bf16.gmra.mxu2 %v975_v14 }
  0x54   :  { %635 = vmatmul.bf16.gmra.mxu3 %v979_v15 }
  0x61   :  { %493 = vmatmul.bf16.gmra.mxu0 %v983_v24 }
  0x62   :  { %542 = vmatmul.bf16.gmra.mxu1 %v987_v25 }
  0x63   :  { %591 = vmatmul.bf16.gmra.mxu2 %v991_v26 }
  0x64   :  { %640 = vmatmul.bf16.gmra.mxu3 %v995_v27 }
  0x71   :  { %498 = vmatmul.bf16.gmra.mxu0 %v999_v36 }
  0x72   :  { %547 = vmatmul.bf16.gmra.mxu1 %v1003_v37 }
  0x73   :  { %596 = vmatmul.bf16.gmra.mxu2 %v1007_v38 }
  0x74   :  { %645 = vmatmul.bf16.gmra.mxu3 %v1011_v39 }
  0x81   :  { %503 = vmatmul.bf16.gmra.mxu0 %v1015_v48 }
  0x82   :  { %552 = vmatmul.bf16.gmra.mxu1 %v1019_v49 }
  0x83   :  { %601 = vmatmul.bf16.gmra.mxu2 %v1023_v50 }
  0x84   :  { %650 = vmatmul.bf16.gmra.mxu3 %v1027_v51 }
  0x91   :  { %508 = vmatmul.bf16.gmra.mxu0 %v1031_v60 }
  0x92   :  { %557 = vmatmul.bf16.gmra.mxu1 %v1035_v61 }
  0x93   :  { %606 = vmatmul.bf16.gmra.mxu2 %v1039_v62 }
  0x94   :  { %655 = vmatmul.bf16.gmra.mxu3 %v1043_v63 }
  0x9e   :  { %v474_v0 = vpop.f32.mrf.mxu0 }
  0x9f   :  { %v523_v1 = vpop.f32.mrf.mxu1 }
  0xa0   :  { %v524_v2 = vadd.f32 %v523_v1, %v474_v0 }
  0xa6   :  { %v572_v3 = vpop.f32.mrf.mxu2  ;;  %v476_v6 = vpop.f32.mrf.mxu0 }
  0xa7   :  { %v621_v4 = vpop.f32.mrf.mxu3  ;;  %v573_v5 = vadd.f32 %v572_v3, %v524_v2  ;;  %v525_v7 = vpop.f32.mrf.mxu1 }
  0xa8   :  { %v526_v8 = vadd.f32 %v525_v7, %v476_v6 }
  0xa9   :  { %v1555_v9 = vadd.f32 %v621_v4, %v573_v5 }
  0xae   :  { %v574_v10 = vpop.f32.mrf.mxu2  ;;  %v479_v13 = vpop.f32.mrf.mxu0 }
  0xaf   :  { %v623_v11 = vpop.f32.mrf.mxu3  ;;  %v575_v12 = vadd.f32 %v574_v10, %v526_v8  ;;  %v528_v14 = vpop.f32.mrf.mxu1  ;;  %v662_v8 = vsel %vm661_vm0, %v1555_v9, 0.0 }
  0xb0   :  { %v529_v15 = vadd.f32 %v528_v14, %v479_v13 }
  0xb1   :  { %v1557_v16 = vadd.f32 %v623_v11, %v575_v12 }
  0xb3   :  { %v663_v3 = vsel %vm661_vm0, %v1557_v16, 0.0 }
  0xb6   :  { %v577_v17 = vpop.f32.mrf.mxu2  ;;  %v481_v20 = vpop.f32.mrf.mxu0 }
  0xb7   :  { %v626_v18 = vpop.f32.mrf.mxu3  ;;  %v578_v19 = vadd.f32 %v577_v17, %v529_v15  ;;  %v530_v21 = vpop.f32.mrf.mxu1  ;;  %v664_v15 = vadd.f32 %v663_v3, %v662_v8 }
  0xb8   :  { %v531_v22 = vadd.f32 %v530_v21, %v481_v20 }
  0xb9   :  { %v1559_v23 = vadd.f32 %v626_v18, %v578_v19 }
  0xbb   :  { %v665_v10 = vsel %vm661_vm0, %v1559_v23, 0.0 }
  0xbc   :  { %v666_v20 = vadd.f32 %v665_v10, %v664_v15 }
  0xbe   :  { %v579_v24 = vpop.f32.mrf.mxu2  ;;  %v484_v27 = vpop.f32.mrf.mxu0 }
  0xbf   :  { %v628_v25 = vpop.f32.mrf.mxu3  ;;  %v580_v26 = vadd.f32 %v579_v24, %v531_v22  ;;  %v533_v28 = vpop.f32.mrf.mxu1 }
  0xc0   :  { %v534_v29 = vadd.f32 %v533_v28, %v484_v27 }
  0xc1   :  { %v1561_v30 = vadd.f32 %v628_v25, %v580_v26 }
  0xc3   :  { %v667_v17 = vsel %vm661_vm0, %v1561_v30, 0.0 }
  0xc4   :  { %v668_v27 = vadd.f32 %v667_v17, %v666_v20 }
  0xc6   :  { %v582_v31 = vpop.f32.mrf.mxu2  ;;  %v486_v34 = vpop.f32.mrf.mxu0 }
  0xc7   :  { %v631_v32 = vpop.f32.mrf.mxu3  ;;  %v583_v33 = vadd.f32 %v582_v31, %v534_v29  ;;  %v535_v35 = vpop.f32.mrf.mxu1 }
  0xc8   :  { %v536_v1 = vadd.f32 %v535_v35, %v486_v34 }
  0xc9   :  { %v1563_v36 = vadd.f32 %v631_v32, %v583_v33 }
  0xcb   :  { %v669_v24 = vsel %vm661_vm0, %v1563_v36, 0.0 }
  0xcc   :  { %v670_v32 = vadd.f32 %v669_v24, %v668_v27 }
  0xce   :  { %v584_v37 = vpop.f32.mrf.mxu2  ;;  %v489_v39 = vpop.f32.mrf.mxu0 }
  0xcf   :  { %v633_v38 = vpop.f32.mrf.mxu3  ;;  %v538_v40 = vpop.f32.mrf.mxu1  ;;  %v585_v4 = vadd.f32 %v584_v37, %v536_v1 }
  0xd0   :  { %v539_v2 = vadd.f32 %v538_v40, %v489_v39 }
  0xd1   :  { %v1573_v18 = vadd.f32 %v633_v38, %v585_v4 }
  0xd3   :  { %v671_v28 = vsel %vm661_vm0, %v1573_v18, 0.0 }
  0xd6   :  { %v587_v41 = vpop.f32.mrf.mxu2  ;;  %v491_v43 = vpop.f32.mrf.mxu0 }
  0xd7   :  { %v636_v42 = vpop.f32.mrf.mxu3  ;;  %v540_v44 = vpop.f32.mrf.mxu1  ;;  %v588_v11 = vadd.f32 %v587_v41, %v539_v2  ;;  %v672_v41 = vadd.f32 %v671_v28, %v670_v32 }
  0xd8   :  { %v541_v12 = vadd.f32 %v540_v44, %v491_v43 }
  0xd9   :  { %v1577_v25 = vadd.f32 %v636_v42, %v588_v11 }
  0xdb   :  { %v673_v38 = vsel %vm661_vm0, %v1577_v25, 0.0 }
  0xde   :  { %v589_v45 = vpop.f32.mrf.mxu2  ;;  %v494_v47 = vpop.f32.mrf.mxu0 }
  0xdf   :  { %v638_v46 = vpop.f32.mrf.mxu3  ;;  %v543_v48 = vpop.f32.mrf.mxu1  ;;  %v590_v19 = vadd.f32 %v589_v45, %v541_v12 }
  0xe0   :  { %v544_v5 = vadd.f32 %v543_v48, %v494_v47  ;;  %v674_v47 = vadd.f32 %v673_v38, %v672_v41 }
  0xe1   :  { %v1581_v29 = vadd.f32 %v638_v46, %v590_v19 }
  0xe3   :  { %v675_v44 = vsel %vm661_vm0, %v1581_v29, 0.0 }
  0xe6   :  { %v592_v49 = vpop.f32.mrf.mxu2  ;;  %v496_v51 = vpop.f32.mrf.mxu0 }
  0xe7   :  { %v641_v50 = vpop.f32.mrf.mxu3  ;;  %v545_v52 = vpop.f32.mrf.mxu1  ;;  %v593_v21 = vadd.f32 %v592_v49, %v544_v5 }
  0xe8   :  { %v546_v26 = vadd.f32 %v545_v52, %v496_v51 }
  0xe9   :  { %v1583_v33 = vadd.f32 %v641_v50, %v593_v21 }
  0xeb   :  { %v677_v48 = vsel %vm661_vm0, %v1583_v33, 0.0 }
  0xee   :  { %v594_v53 = vpop.f32.mrf.mxu2  ;;  %v499_v55 = vpop.f32.mrf.mxu0 }
  0xef   :  { %v643_v54 = vpop.f32.mrf.mxu3  ;;  %v548_v56 = vpop.f32.mrf.mxu1  ;;  %v595_v31 = vadd.f32 %v594_v53, %v546_v26  ;;  %v676_v53 = vadd.f32 %v675_v44, %v674_v47 }
  0xf0   :  { %v549_v22 = vadd.f32 %v548_v56, %v499_v55 }
  0xf1   :  { %v1589_v45 = vadd.f32 %v643_v54, %v595_v31 }
  0xf3   :  { %v679_v55 = vsel %vm661_vm0, %v1589_v45, 0.0 }
  0xf6   :  { %v597_v57 = vpop.f32.mrf.mxu2  ;;  %v501_v59 = vpop.f32.mrf.mxu0 }
  0xf7   :  { %v646_v58 = vpop.f32.mrf.mxu3  ;;  %v550_v60 = vpop.f32.mrf.mxu1  ;;  %v598_v34 = vadd.f32 %v597_v57, %v549_v22 }
  0xf8   :  { %v551_v39 = vadd.f32 %v550_v60, %v501_v59  ;;  %v678_v59 = vadd.f32 %v677_v48, %v676_v53 }
  0xf9   :  { %v1593_v49 = vadd.f32 %v646_v58, %v598_v34 }
  0xfa   :  { %v680_v1 = vadd.f32 %v679_v55, %v678_v59 }
  0xfe   :  { %v599_v61 = vpop.f32.mrf.mxu2  ;;  %v504_v63 = vpop.f32.mrf.mxu0 }
  0xff   :  { %v648_v62 = vpop.f32.mrf.mxu3  ;;  %v553_v0 = vpop.f32.mrf.mxu1  ;;  %v600_v46 = vadd.f32 %v599_v61, %v551_v39  ;;  %v1241_v61 = vmov 128.0  }
 0x100   :  { %v554_v40 = vadd.f32 %v553_v0, %v504_v63  ;;  %1237 = vrcp.f32 %v1241_v61  ;;  %v681_v63 = vsel %vm661_vm0, %v1593_v49, 0.0 }
 0x101   :  { %v1597_v56 = vadd.f32 %v648_v62, %v600_v46  ;;  %v682_v62 = vadd.f32 %v681_v63, %v680_v1 }
 0x103   :  { %v683_v2 = vsel %vm661_vm0, %v1597_v56, 0.0 }
 0x104   :  { %v684_v11 = vadd.f32 %v683_v2, %v682_v62 }
 0x106   :  { %v602_v6 = vpop.f32.mrf.mxu2  ;;  %v506_v13 = vpop.f32.mrf.mxu0 }
 0x107   :  { %v651_v7 = vpop.f32.mrf.mxu3  ;;  %v555_v14 = vpop.f32.mrf.mxu1  ;;  %v603_v50 = vadd.f32 %v602_v6, %v554_v40 }
 0x108   :  { %v556_v51 = vadd.f32 %v555_v14, %v506_v13  ;;  %v1238_v10 = vpop.eup %1237 }
 0x109   :  { %v1601_v58 = vadd.f32 %v651_v7, %v603_v50  ;;  %v700_v19 = vmul.f32 128.0, %v1238_v10  ;;  %vm704_vm1 = vweird.f32 %v1238_v10 }
 0x10b   :  { %v685_v6 = vsel %vm661_vm0, %v1601_v58, 0.0  ;;  %v701_v27 = vsub.f32 1.0, %v700_v19 }
 0x10c   :  { %v686_v13 = vadd.f32 %v685_v6, %v684_v11 }
 0x10d   :  { %v702_v32 = vmul.f32 %v1238_v10, %v701_v27 }
 0x10e   :  { %v604_v35 = vpop.f32.mrf.mxu2  ;;  %v509_v42 = vpop.f32.mrf.mxu0 }
 0x10f   :  { %v653_v37 = vpop.f32.mrf.mxu3  ;;  %v558_v43 = vpop.f32.mrf.mxu1  ;;  %v605_v57 = vadd.f32 %v604_v35, %v556_v51 }
 0x110   :  { %v559_v52 = vadd.f32 %v558_v43, %v509_v42 }
 0x111   :  { %v1605_v3 = vadd.f32 %v653_v37, %v605_v57  ;;  %v703_v37 = vadd.f32 %v1238_v10, %v702_v32 }
 0x113   :  { %v687_v7 = vsel %vm661_vm0, %v1605_v3, 0.0  ;;  %v1619_v40 = vsel %vm704_vm1, %v1238_v10, %v703_v37 }
 0x114   :  { %v688_v20 = vadd.f32 %v687_v7, %v686_v13 }
 0x116   :  { %v607_v54 = vpop.f32.mrf.mxu2  ;;  %v511_v4 = vpop.f32.mrf.mxu0 }
 0x117   :  { %v656_v60 = vpop.f32.mrf.mxu3  ;;  %v608_v0 = vadd.f32 %v607_v54, %v559_v52  ;;  %v560_v5 = vpop.f32.mrf.mxu1 }
 0x118   :  { %v561_v12 = vadd.f32 %v560_v5, %v511_v4 }
 0x119   :  { %v1609_v8 = vadd.f32 %v656_v60, %v608_v0 }
 0x11b   :  { %v689_v15 = vsel %vm661_vm0, %v1609_v8, 0.0 }
 0x11c   :  { %v690_v24 = vadd.f32 %v689_v15, %v688_v20 }
 0x11e   :  { %v609_v14 = vpop.f32.mrf.mxu2 }
 0x11f   :  { %v610_v17 = vadd.f32 %v609_v14, %v561_v12  ;;  %v658_v21 = vpop.f32.mrf.mxu3 }
 0x121   :  { %v1615_v22 = vadd.f32 %v658_v21, %v610_v17 }
 0x123   :  { %v691_v26 = vsel %vm661_vm0, %v1615_v22, 0.0 }
 0x124   :  { %v692_v28 = vadd.f32 %v691_v26, %v690_v24 }
 0x126   :  { %v693_v31 = vrot.slane %v692_v28, 4 }
 0x128   :  { %v694_v34 = vadd.f32 %v693_v31, %v692_v28 }
 0x12a   :  { %v695_v35 = vrot.slane %v694_v34, 2 }
 0x12c   :  { %v696_v38 = vadd.f32 %v695_v35, %v694_v34 }
 0x12e   :  { %v697_v39 = vrot.slane %v696_v38, 1 }
 0x130   :  { %v698_v41 = vadd.f32 %v697_v39, %v696_v38 }
 0x132   :  { %v1622_v42 = vmul.f32 %v1619_v40, %v698_v41 }
 0x134   :  { %v707_v43 = vsub.f32 %v1555_v9, %v1622_v42  ;;  %v708_v44 = vsub.f32 %v1557_v16, %v1622_v42  ;;  %v709_v46 = vsub.f32 %v1559_v23, %v1622_v42  ;;  %v710_v47 = vsub.f32 %v1561_v30, %v1622_v42 }
 0x135   :  { %v711_v51 = vsub.f32 %v1563_v36, %v1622_v42  ;;  %v712_v53 = vsub.f32 %v1573_v18, %v1622_v42  ;;  %v713_v60 = vsub.f32 %v1577_v25, %v1622_v42  ;;  %v714_v1 = vsub.f32 %v1581_v29, %v1622_v42 }
 0x136   :  { %v723_v48 = vmul.f32 %v707_v43, %v707_v43  ;;  %v724_v50 = vmul.f32 %v708_v44, %v708_v44  ;;  %v725_v52 = vmul.f32 %v709_v46, %v709_v46  ;;  %v726_v55 = vmul.f32 %v710_v47, %v710_v47 }
 0x137   :  { %v727_v61 = vmul.f32 %v711_v51, %v711_v51  ;;  %v728_v2 = vmul.f32 %v712_v53, %v712_v53  ;;  %v715_v5 = vsub.f32 %v1583_v33, %v1622_v42  ;;  %v729_v6 = vmul.f32 %v713_v60, %v713_v60 }
 0x138   :  { %v739_v57 = vsel %vm661_vm0, %v723_v48, 0.0  ;;  %v740_v59 = vsel %vm661_vm0, %v724_v50, 0.0  ;;  %v742_v63 = vsel %vm661_vm0, %v725_v52, 0.0  ;;  %v744_v62 = vsel %vm661_vm0, %v726_v55, 0.0 }
 0x139   :  { %v741_v54 = vadd.f32 %v740_v59, %v739_v57  ;;  %v746_v10 = vsel %vm661_vm0, %v727_v61, 0.0  ;;  %v716_v7 = vsub.f32 %v1589_v45, %v1622_v42  ;;  %v730_v12 = vmul.f32 %v714_v1, %v714_v1 }
 0x13a   :  { %v748_v13 = vsel %vm661_vm0, %v728_v2, 0.0  ;;  %v717_v15 = vsub.f32 %v1593_v49, %v1622_v42  ;;  %v731_v17 = vmul.f32 %v715_v5, %v715_v5  ;;  %v750_v19 = vsel %vm661_vm0, %v729_v6, 0.0 }
 0x13b   :  { %v743_v0 = vadd.f32 %v742_v63, %v741_v54  ;;  %v718_v21 = vsub.f32 %v1597_v56, %v1622_v42  ;;  %v732_v24 = vmul.f32 %v716_v7, %v716_v7  ;;  %v752_v26 = vsel %vm661_vm0, %v730_v12, 0.0 }
 0x13c   :  { %v719_v28 = vsub.f32 %v1601_v58, %v1622_v42  ;;  %v733_v31 = vmul.f32 %v717_v15, %v717_v15  ;;  %v754_v32 = vsel %vm661_vm0, %v731_v17, 0.0  ;;  %v720_v35 = vsub.f32 %v1605_v3, %v1622_v42 }
 0x13d   :  { %v745_v4 = vadd.f32 %v744_v62, %v743_v0  ;;  %v734_v37 = vmul.f32 %v718_v21, %v718_v21  ;;  %v756_v38 = vsel %vm661_vm0, %v732_v24, 0.0  ;;  %v721_v41 = vsub.f32 %v1609_v8, %v1622_v42 }
 0x13e   :  { %v735_v43 = vmul.f32 %v719_v28, %v719_v28  ;;  %v758_v44 = vsel %vm661_vm0, %v733_v31, 0.0  ;;  %v722_v47 = vsub.f32 %v1615_v22, %v1622_v42  ;;  %v736_v48 = vmul.f32 %v720_v35, %v720_v35 }
 0x13f   :  { %v747_v11 = vadd.f32 %v746_v10, %v745_v4  ;;  %v760_v50 = vsel %vm661_vm0, %v734_v37, 0.0  ;;  %v737_v52 = vmul.f32 %v721_v41, %v721_v41 }
 0x140   :  { %v762_v53 = vsel %vm661_vm0, %v735_v43, 0.0  ;;  %v738_v57 = vmul.f32 %v722_v47, %v722_v47  ;;  %v764_v59 = vsel %vm661_vm0, %v736_v48, 0.0 }
 0x141   :  { %v749_v14 = vadd.f32 %v748_v13, %v747_v11  ;;  %v766_v60 = vsel %vm661_vm0, %v737_v52, 0.0 }
 0x142   :  { %v768_v63 = vsel %vm661_vm0, %v738_v57, 0.0 }
 0x143   :  { %v751_v20 = vadd.f32 %v750_v19, %v749_v14  ;;  %v788_v19 = vld [vmem:[%s1781_s2] sm:$0x1] }
 0x145   :  { %v753_v27 = vadd.f32 %v752_v26, %v751_v20 }
 0x147   :  { %v755_v34 = vadd.f32 %v754_v32, %v753_v27 }
 0x149   :  { %v757_v39 = vadd.f32 %v756_v38, %v755_v34 }
 0x14b   :  { %v759_v46 = vadd.f32 %v758_v44, %v757_v39 }
 0x14d   :  { %v761_v51 = vadd.f32 %v760_v50, %v759_v46 }
 0x14f   :  { %v763_v55 = vadd.f32 %v762_v53, %v761_v51 }
 0x151   :  { %v765_v54 = vadd.f32 %v764_v59, %v763_v55 }
 0x153   :  { %v767_v61 = vadd.f32 %v766_v60, %v765_v54 }
 0x155   :  { %v769_v0 = vadd.f32 %v768_v63, %v767_v61 }
 0x157   :  { %v770_v1 = vrot.slane %v769_v0, 4 }
 0x159   :  { %v771_v2 = vadd.f32 %v770_v1, %v769_v0 }
 0x15b   :  { %v772_v62 = vrot.slane %v771_v2, 2 }
 0x15d   :  { %v773_v4 = vadd.f32 %v772_v62, %v771_v2 }
 0x15f   :  { %v774_v5 = vrot.slane %v773_v4, 1 }
 0x161   :  { %v775_v6 = vadd.f32 %v774_v5, %v773_v4 }
 0x163   :  { %v776_v10 = vmul.f32 %v775_v6, %v1619_v40  ;;  %v790_v40 = vld [vmem:[%s1782_s3] sm:$0x1] }
 0x165   :  { %v777_v11 = vadd.f32 1e-05, %v776_v10 }
 0x167   :  { %1239 = vrsqrt.f32 %v777_v11  ;;  %vm784_vm3 = vweird.f32 %v777_v11 }
 0x16d   :  { %v1240_v7 = vpop.eup %1239 }
 0x16e   :  { %v779_v12 = vmul.f32 %v1240_v7, %v777_v11  ;;  %vm785_vm2 = vweird.f32 %v1240_v7 }
 0x16f   :  { %vm786_vm4 = vmor %vm784_vm3, %vm785_vm2 }
 0x170   :  { %v780_v13 = vmul.f32 %v1240_v7, %v779_v12 }
 0x172   :  { %v781_v14 = vmul.f32 0.5, %v780_v13 }
 0x174   :  { %v782_v15 = vsub.f32 1.5, %v781_v14 }
 0x176   :  { %v783_v17 = vmul.f32 %v1240_v7, %v782_v15 }
 0x178   :  { %v787_v20 = vsel %vm786_vm4, %v1240_v7, %v783_v17 }
 0x179   :  { %v789_v21 = vmul.f32 %v788_v19, %v787_v20 }
 0x17b   :  { %v791_v24 = vmul.f32 %v789_v21, %v1622_v42  ;;  %v794_v27 = vperm.slane %v789_v21, 0 }
 0x17d   :  { %v792_v26 = vsub.f32 %v790_v40, %v791_v24  ;;  %v796_v31 = vmul.f32 %v794_v27, %v1555_v9  ;;  %v797_v32 = vmul.f32 %v794_v27, %v1557_v16  ;;  %v798_v34 = vmul.f32 %v794_v27, %v1559_v23 }
 0x17e   :  { %v799_v35 = vmul.f32 %v794_v27, %v1561_v30  ;;  %v800_v37 = vmul.f32 %v794_v27, %v1563_v36  ;;  %v801_v38 = vmul.f32 %v794_v27, %v1573_v18  ;;  %v802_v42 = vmul.f32 %v794_v27, %v1577_v25 }
 0x17f   :  { %v813_v28 = vperm.slane %v792_v26, 0  ;;  %v803_v39 = vmul.f32 %v794_v27, %v1581_v29  ;;  %v804_v41 = vmul.f32 %v794_v27, %v1583_v33  ;;  %v805_v43 = vmul.f32 %v794_v27, %v1589_v45 }
 0x180   :  { %v806_v9 = vmul.f32 %v794_v27, %v1593_v49  ;;  %v807_v16 = vmul.f32 %v794_v27, %v1597_v56  ;;  %v808_v23 = vmul.f32 %v794_v27, %v1601_v58  ;;  %v809_v30 = vmul.f32 %v794_v27, %v1605_v3 }
 0x181   :  { %v815_v44 = vadd.f32 %v813_v28, %v796_v31  ;;  %v816_v36 = vadd.f32 %v813_v28, %v797_v32  ;;  %v810_v18 = vmul.f32 %v794_v27, %v1609_v8  ;;  %v811_v25 = vmul.f32 %v794_v27, %v1615_v22 }
 0x182   :  { %v817_v46 = vadd.f32 %v813_v28, %v798_v34  ;;  %v818_v29 = vadd.f32 %v813_v28, %v799_v35  ;;  %v819_v47 = vadd.f32 %v813_v28, %v800_v37  ;;  %v820_v33 = vadd.f32 %v813_v28, %v801_v38 }
 0x183   :  { %v821_v48 = vadd.f32 %v813_v28, %v802_v42  ;;  %v822_v45 = vadd.f32 %v813_v28, %v803_v39  ;;  %v823_v49 = vadd.f32 %v813_v28, %v804_v41  ;;  %v824_v50 = vadd.f32 %v813_v28, %v805_v43 }
 0x184   :  { %v825_v56 = vadd.f32 %v813_v28, %v806_v9  ;;  %v826_v51 = vadd.f32 %v813_v28, %v807_v16  ;;  %v1696_v58 = vadd.f32 %v813_v28, %v808_v23  ;;  %v1698_v3 = vadd.f32 %v813_v28, %v809_v30 }
 0x185   :  { %v847_v52 = vmul.f32 0.2, %v815_v44  ;;  %v848_v53 = vmul.f32 0.2, %v816_v36  ;;  %vm831_vm6 = vcmp.gt.f32.partialorder %v815_v44, 0.0  ;;  %vm832_vm7 = vcmp.gt.f32.partialorder %v816_v36, 0.0 }
 0x186   :  { %v849_v8 = vmul.f32 0.2, %v817_v46  ;;  %v850_v22 = vmul.f32 0.2, %v818_v29  ;;  %v829_v55 = vadd.f32 %v813_v28, %v810_v18  ;;  %vm833_vm8 = vcmp.gt.f32.partialorder %v817_v46, 0.0 }
 0x187   :  { %vm834_vm9 = vcmp.gt.f32.partialorder %v818_v29, 0.0  ;;  %v851_v57 = vmul.f32 0.2, %v819_v47  ;;  %v830_v59 = vadd.f32 %v813_v28, %v811_v25  ;;  %vm835_vm10 = vcmp.gt.f32.partialorder %v819_v47, 0.0 }
 0x188   :  { %vm836_vm11 = vcmp.gt.f32.partialorder %v820_v33, 0.0  ;;  %v852_v54 = vmul.f32 0.2, %v820_v33  ;;  %vm837_vm12 = vcmp.gt.f32.partialorder %v821_v48, 0.0  ;;  %v853_v60 = vmul.f32 0.2, %v821_v48 }
 0x189   :  { %v863_v61 = vsel %vm831_vm6, %v815_v44, %v847_v52  ;;  %v864_v63 = vsel %vm832_vm7, %v816_v36, %v848_v53  ;;  %vm838_vm13 = vcmp.gt.f32.partialorder %v822_v45, 0.0  ;;  %v854_v0 = vmul.f32 0.2, %v822_v45 }
 0x18a   :  { %v865_v1 = vsel %vm833_vm8, %v817_v46, %v849_v8  ;;  %v866_v2 = vsel %vm834_vm9, %v818_v29, %v850_v22  ;;  %vm839_vm14 = vcmp.gt.f32.partialorder %v823_v49, 0.0  ;;  %vm840_vm15 = vcmp.gt.f32.partialorder %v824_v50, 0.0 }
 0x18b   :  { %v855_v62 = vmul.f32 0.2, %v823_v49  ;;  %v867_v4 = vsel %vm835_vm10, %v819_v47, %v851_v57  ;;  %v856_v5 = vmul.f32 0.2, %v824_v50  ;;  %v868_v6 = vsel %vm836_vm11, %v820_v33, %v852_v54 }
 0x18c   :  { %v879_v10 = vpack.c.bf16 %v863_v61, %v863_v61  ;;  %v880_v11 = vpack.c.bf16 %v864_v63, %v864_v63  ;;  %v857_v7 = vmul.f32 0.2, %v825_v56  ;;  %v869_v12 = vsel %vm837_vm12, %v821_v48, %v853_v60 }
 0x18d   :  { %v881_v13 = vpack.c.bf16 %v865_v1, %v865_v1  ;;  %v882_v14 = vpack.c.bf16 %v866_v2, %v866_v2  ;;  %vm841_vm0 = vcmp.gt.f32.partialorder %v825_v56, 0.0  ;;  %v858_v15 = vmul.f32 0.2, %v826_v51 }
 0x18e   :  { %v870_v17 = vsel %vm838_vm13, %v822_v45, %v854_v0  ;;  %v883_v19 = vpack.c.bf16 %v867_v4, %v867_v4  ;;  %896 = vst.msk [vmem:[%s1783_s4] sm:$0xf] %vm895_vm5, %v879_v10  ;;  %vm842_vm1 = vcmp.gt.f32.partialorder %v826_v51, 0.0  ;;  %v859_v20 = vmul.f32 0.2, %v1696_v58 }
 0x18f   :  { %v871_v21 = vsel %vm839_vm14, %v823_v49, %v855_v62  ;;  %v884_v24 = vpack.c.bf16 %v868_v6, %v868_v6  ;;  %897 = vst.msk [vmem:[%s1783_s4 + $0x4] sm:$0xf] %vm895_vm5, %v880_v11  ;;  %vm843_vm2 = vcmp.gt.f32.partialorder %v1696_v58, 0.0  ;;  %v860_v40 = vmul.f32 0.2, %v1698_v3 }
 0x190   :  { %v872_v26 = vsel %vm840_vm15, %v824_v50, %v856_v5  ;;  %v885_v27 = vpack.c.bf16 %v869_v12, %v869_v12  ;;  %898 = vst.msk [vmem:[%s1783_s4 + $0x8] sm:$0xf] %vm895_vm5, %v881_v13  ;;  %vm844_vm3 = vcmp.gt.f32.partialorder %v1698_v3, 0.0  ;;  %v861_v28 = vmul.f32 0.2, %v829_v55 }
 0x191   :  { %v873_v31 = vsel %vm841_vm0, %v825_v56, %v857_v7  ;;  %v886_v32 = vpack.c.bf16 %v870_v17, %v870_v17  ;;  %899 = vst.msk [vmem:[%s1783_s4 + $0xc] sm:$0xf] %vm895_vm5, %v882_v14  ;;  %vm845_vm4 = vcmp.gt.f32.partialorder %v829_v55, 0.0  ;;  %v862_v34 = vmul.f32 0.2, %v830_v59 }
 0x192   :  { %v874_v35 = vsel %vm842_vm1, %v826_v51, %v858_v15  ;;  %v887_v37 = vpack.c.bf16 %v871_v21, %v871_v21  ;;  %900 = vst.msk [vmem:[%s1783_s4 + $0x10] sm:$0xf] %vm895_vm5, %v883_v19  ;;  %vm846_vm6 = vcmp.gt.f32.partialorder %v830_v59, 0.0  ;;  %v875_v38 = vsel %vm843_vm2, %v1696_v58, %v859_v20 }
 0x193   :  { %v888_v42 = vpack.c.bf16 %v872_v26, %v872_v26  ;;  %901 = vst.msk [vmem:[%s1783_s4 + $0x14] sm:$0xf] %vm895_vm5, %v884_v24  ;;  %v876_v39 = vsel %vm844_vm3, %v1698_v3, %v860_v40  ;;  %v889_v41 = vpack.c.bf16 %v873_v31, %v873_v31  ;;  %v877_v43 = vsel %vm845_vm4, %v829_v55, %v861_v28 }
 0x194   :  { %902 = vst.msk [vmem:[%s1783_s4 + $0x18] sm:$0xf] %vm895_vm5, %v885_v27  ;;  %v890_v9 = vpack.c.bf16 %v874_v35, %v874_v35  ;;  %v878_v16 = vsel %vm846_vm6, %v830_v59, %v862_v34  ;;  %v891_v23 = vpack.c.bf16 %v875_v38, %v875_v38  ;;  %v892_v30 = vpack.c.bf16 %v876_v39, %v876_v39 }
 0x195   :  { %903 = vst.msk [vmem:[%s1783_s4 + $0x1c] sm:$0xf] %vm895_vm5, %v886_v32  ;;  %v893_v44 = vpack.c.bf16 %v877_v43, %v877_v43  ;;  %v894_v36 = vpack.c.bf16 %v878_v16, %v878_v16 }
 0x196   :  { %904 = vst.msk [vmem:[%s1783_s4 + $0x20] sm:$0xf] %vm895_vm5, %v887_v37 }
 0x197   :  { %905 = vst.msk [vmem:[%s1783_s4 + $0x24] sm:$0xf] %vm895_vm5, %v888_v42 }
 0x198   :  { %906 = vst.msk [vmem:[%s1783_s4 + $0x28] sm:$0xf] %vm895_vm5, %v889_v41 }
 0x199   :  { %907 = vst.msk [vmem:[%s1783_s4 + $0x2c] sm:$0xf] %vm895_vm5, %v890_v9 }
 0x19a   :  { %908 = vst.msk [vmem:[%s1783_s4 + $0x30] sm:$0xf] %vm895_vm5, %v891_v23 }
 0x19b   :  { %909 = vst.msk [vmem:[%s1783_s4 + $0x34] sm:$0xf] %vm895_vm5, %v892_v30 }
 0x19c   :  { %910 = vst.msk [vmem:[%s1783_s4 + $0x38] sm:$0xf] %vm895_vm5, %v893_v44 }
 0x19d   :  { %911 = vst.msk [vmem:[%s1783_s4 + $0x3c] sm:$0xf] %vm895_vm5, %v894_v36 }

// kernel: discriminator_forward.8
= control target key start
LH: loop header
LB: loop body
LE: loop exit
PB: predicated region body
PF: predicated region fallthrough
CT: control target
= control target key end

     0   :  { %vm397_vm0 = vcmask 261120   ;;  %vm487_vm9 = vcmask 257024   ;;  %s912_s1 = inlined_call_operand.vmem [shape: bf16[512,32], index: 1, kind: input, shape index: {}]   ;;  %s913_s0 = inlined_call_operand.vmem [shape: bf16[32,512], index: 0, kind: input, shape index: {}]   ;;  %s914_s2 = inlined_call_operand.vmem [shape: f32[1,32], index: 2, kind: input, shape index: {}]   ;;  %s915_s3 = inlined_call_operand.vmem [shape: f32[1,32], index: 3, kind: input, shape index: {}]   ;;  %s916_s4 = inlined_call_operand.vmem [shape: bf16[32,32], index: 4, kind: output, shape index: {}]  }
   0x1   :  { %v671_v0 = vld [vmem:[%s912_s1 + $0x38] sm:$0xff]  ;;  %v670_v4 = vld [vmem:[%s912_s1 + $0x30] sm:$0xff]  ;;  %v669_v8 = vld [vmem:[%s912_s1 + $0x28] sm:$0xff] }
   0x2   :  { %v679_v1 = vld [vmem:[%s912_s1 + $0x78] sm:$0xff]  ;;  %321 = vmatpush.bf16.msra.mxu0 %v671_v0  ;;  %v678_v5 = vld [vmem:[%s912_s1 + $0x70] sm:$0xff]  ;;  %v677_v9 = vld [vmem:[%s912_s1 + $0x68] sm:$0xff] }
   0x3   :  { %v687_v2 = vld [vmem:[%s912_s1 + $0xb8] sm:$0xff]  ;;  %340 = vmatpush.bf16.msra.mxu1 %v679_v1  ;;  %v686_v6 = vld [vmem:[%s912_s1 + $0xb0] sm:$0xff]  ;;  %v685_v10 = vld [vmem:[%s912_s1 + $0xa8] sm:$0xff] }
   0x4   :  { %v695_v3 = vld [vmem:[%s912_s1 + $0xf8] sm:$0xff]  ;;  %359 = vmatpush.bf16.msra.mxu2 %v687_v2  ;;  %v694_v7 = vld [vmem:[%s912_s1 + $0xf0] sm:$0xff]  ;;  %v693_v11 = vld [vmem:[%s912_s1 + $0xe8] sm:$0xff] }
   0x5   :  { %378 = vmatpush.bf16.msra.mxu3 %v695_v3  ;;  %v668_v12 = vld [vmem:[%s912_s1 + $0x20] sm:$0xff]  ;;  %v667_v16 = vld [vmem:[%s912_s1 + $0x18] sm:$0xff]  ;;  %v666_v20 = vld [vmem:[%s912_s1 + $0x10] sm:$0xff] }
   0x6   :  { %322 = vmatpush.bf16.msra.mxu0 %v670_v4  ;;  %v676_v13 = vld [vmem:[%s912_s1 + $0x60] sm:$0xff]  ;;  %v675_v17 = vld [vmem:[%s912_s1 + $0x58] sm:$0xff]  ;;  %v674_v21 = vld [vmem:[%s912_s1 + $0x50] sm:$0xff] }
   0x7   :  { %341 = vmatpush.bf16.msra.mxu1 %v678_v5  ;;  %v684_v14 = vld [vmem:[%s912_s1 + $0xa0] sm:$0xff]  ;;  %v683_v18 = vld [vmem:[%s912_s1 + $0x98] sm:$0xff]  ;;  %v682_v22 = vld [vmem:[%s912_s1 + $0x90] sm:$0xff] }
   0x8   :  { %360 = vmatpush.bf16.msra.mxu2 %v686_v6  ;;  %v692_v15 = vld [vmem:[%s912_s1 + $0xe0] sm:$0xff]  ;;  %v691_v19 = vld [vmem:[%s912_s1 + $0xd8] sm:$0xff]  ;;  %v690_v23 = vld [vmem:[%s912_s1 + $0xd0] sm:$0xff] }
   0x9   :  { %379 = vmatpush.bf16.msra.mxu3 %v694_v7  ;;  %v665_v24 = vld [vmem:[%s912_s1 + $0x8] sm:$0xff]  ;;  %v664_v28 = vld [vmem:[%s912_s1] sm:$0xff]  ;;  %v658_v33 = vld [vmem:[%s913_s0 + $0xc] sm:$0xf0] }
   0xa   :  { %323 = vmatpush.bf16.msra.mxu0 %v669_v8  ;;  %v673_v25 = vld [vmem:[%s912_s1 + $0x48] sm:$0xff]  ;;  %v672_v29 = vld [vmem:[%s912_s1 + $0x40] sm:$0xff]  ;;  %v500_v35 = vld [vmem:[%s913_s0 + $0x10] sm:$0xf0]  ;;  %v701_v8 = vmov 32.0  }
   0xb   :  { %342 = vmatpush.bf16.msra.mxu1 %v677_v9  ;;  %v681_v26 = vld [vmem:[%s912_s1 + $0x88] sm:$0xff]  ;;  %v680_v30 = vld [vmem:[%s912_s1 + $0x80] sm:$0xff]  ;;  %v659_v37 = vld [vmem:[%s913_s0 + $0x14] sm:$0xf0]  ;;  %697 = vrcp.f32 %v701_v8 }
   0xc   :  { %361 = vmatpush.bf16.msra.mxu2 %v685_v10  ;;  %v689_v27 = vld [vmem:[%s912_s1 + $0xc8] sm:$0xff]  ;;  %v688_v31 = vld [vmem:[%s912_s1 + $0xc0] sm:$0xff]  ;;  %v508_v39 = vld [vmem:[%s913_s0 + $0x18] sm:$0xf0] }
   0xd   :  { %380 = vmatpush.bf16.msra.mxu3 %v693_v11  ;;  %v498_v32 = vld [vmem:[%s913_s0] sm:$0xf]  ;;  %v656_v34 = vld [vmem:[%s913_s0 + $0x4] sm:$0xf]  ;;  %v506_v36 = vld [vmem:[%s913_s0 + $0x8] sm:$0xf] }
   0xe   :  { %324 = vmatpush.bf16.msra.mxu0 %v668_v12  ;;  %v657_v38 = vld [vmem:[%s913_s0 + $0xc] sm:$0xf]  ;;  %v499_v40 = vor.u32 %v658_v33, %v498_v32  ;;  %v503_v41 = vor.u32 %v656_v34, %v500_v35  ;;  %v507_v42 = vor.u32 %v659_v37, %v506_v36  ;;  %v514_v44 = vld [vmem:[%s913_s0 + $0x20] sm:$0xf]  ;;  %v662_v45 = vld [vmem:[%s913_s0 + $0x2c] sm:$0xf0] }
   0xf   :  { %343 = vmatpush.bf16.msra.mxu1 %v676_v13  ;;  %v511_v43 = vor.u32 %v657_v38, %v508_v39  ;;  %v660_v46 = vld [vmem:[%s913_s0 + $0x24] sm:$0xf]  ;;  %v516_v47 = vld [vmem:[%s913_s0 + $0x30] sm:$0xf0]  ;;  %v522_v48 = vld [vmem:[%s913_s0 + $0x28] sm:$0xf]  ;;  %v515_v52 = vor.u32 %v662_v45, %v514_v44 }
  0x10   :  { %362 = vmatpush.bf16.msra.mxu2 %v684_v14  ;;  %v663_v49 = vld [vmem:[%s913_s0 + $0x34] sm:$0xf0]  ;;  %v661_v50 = vld [vmem:[%s913_s0 + $0x2c] sm:$0xf]  ;;  %v524_v51 = vld [vmem:[%s913_s0 + $0x38] sm:$0xf0]  ;;  %v519_v53 = vor.u32 %v660_v46, %v516_v47 }
  0x11   :  { %381 = vmatpush.bf16.msra.mxu3 %v692_v15  ;;  %v523_v54 = vor.u32 %v663_v49, %v522_v48  ;;  %v527_v55 = vor.u32 %v661_v50, %v524_v51 }
  0x12   :  { %325 = vmatpush.bf16.msra.mxu0 %v667_v16  ;;  %v698_v16 = vpop.eup %697 }
  0x13   :  { %344 = vmatpush.bf16.msra.mxu1 %v675_v17  ;;  %vm416_vm1 = vweird.f32 %v698_v16 }
  0x14   :  { %363 = vmatpush.bf16.msra.mxu2 %v683_v18 }
  0x15   :  { %382 = vmatpush.bf16.msra.mxu3 %v691_v19 }
  0x16   :  { %326 = vmatpush.bf16.msra.mxu0 %v666_v20 }
  0x17   :  { %345 = vmatpush.bf16.msra.mxu1 %v674_v21 }
  0x18   :  { %364 = vmatpush.bf16.msra.mxu2 %v682_v22 }
  0x19   :  { %383 = vmatpush.bf16.msra.mxu3 %v690_v23  ;;  %v412_v23 = vmul.f32 32.0, %v698_v16 }
  0x1a   :  { %327 = vmatpush.bf16.msra.mxu0 %v665_v24 }
  0x1b   :  { %346 = vmatpush.bf16.msra.mxu1 %v673_v25 }
  0x1c   :  { %365 = vmatpush.bf16.msra.mxu2 %v681_v26 }
  0x1d   :  { %384 = vmatpush.bf16.msra.mxu3 %v689_v27 }
  0x1e   :  { %328 = vmatpush.bf16.msra.mxu0 %v664_v28 }
  0x1f   :  { %347 = vmatpush.bf16.msra.mxu1 %v672_v29  ;;  %v413_v29 = vsub.f32 1.0, %v412_v23 }
  0x20   :  { %366 = vmatpush.bf16.msra.mxu2 %v680_v30 }
  0x21   :  { %385 = vmatpush.bf16.msra.mxu3 %v688_v31  ;;  %329 = vmatmul.bf16.vlgmr.msra.gmra.mxu0 %v499_v40  ;;  %v414_v32 = vmul.f32 %v698_v16, %v413_v29 }
  0x22   :  { %348 = vmatmul.bf16.vlgmr.msra.gmra.mxu1 %v503_v41 }
  0x23   :  { %367 = vmatmul.bf16.vlgmr.msra.gmra.mxu2 %v507_v42  ;;  %v415_v35 = vadd.f32 %v698_v16, %v414_v32 }
  0x24   :  { %386 = vmatmul.bf16.vlgmr.msra.gmra.mxu3 %v511_v43 }
  0x25   :  { %v417_v38 = vsel %vm416_vm1, %v698_v16, %v415_v35 }
  0x31   :  { %334 = vmatmul.bf16.gmra.mxu0 %v515_v52 }
  0x32   :  { %353 = vmatmul.bf16.gmra.mxu1 %v519_v53 }
  0x33   :  { %372 = vmatmul.bf16.gmra.mxu2 %v523_v54 }
  0x34   :  { %391 = vmatmul.bf16.gmra.mxu3 %v527_v55 }
  0x9e   :  { %v330_v56 = vpop.f32.mrf.mxu0 }
  0x9f   :  { %v349_v57 = vpop.f32.mrf.mxu1 }
  0xa0   :  { %v350_v2 = vadd.f32 %v349_v57, %v330_v56 }
  0xa6   :  { %v368_v58 = vpop.f32.mrf.mxu2  ;;  %v332_v60 = vpop.f32.mrf.mxu0 }
  0xa7   :  { %v387_v59 = vpop.f32.mrf.mxu3  ;;  %v351_v61 = vpop.f32.mrf.mxu1  ;;  %v369_v9 = vadd.f32 %v368_v58, %v350_v2 }
  0xa8   :  { %v352_v3 = vadd.f32 %v351_v61, %v332_v60 }
  0xa9   :  { %v873_v14 = vadd.f32 %v387_v59, %v369_v9  ;;  %v454_v9 = vld [vmem:[%s915_s3] sm:$0x1] }
  0xab   :  { %v398_v20 = vsel %vm397_vm0, %v873_v14, 0.0 }
  0xae   :  { %v370_v62 = vpop.f32.mrf.mxu2  ;;  %v335_v0 = vpop.f32.mrf.mxu0 }
  0xaf   :  { %v389_v63 = vpop.f32.mrf.mxu3  ;;  %v354_v1 = vpop.f32.mrf.mxu1  ;;  %v371_v5 = vadd.f32 %v370_v62, %v352_v3 }
  0xb0   :  { %v355_v4 = vadd.f32 %v354_v1, %v335_v0 }
  0xb1   :  { %v871_v11 = vadd.f32 %v389_v63, %v371_v5 }
  0xb3   :  { %v399_v17 = vsel %vm397_vm0, %v871_v11, 0.0 }
  0xb4   :  { %v400_v24 = vadd.f32 %v399_v17, %v398_v20 }
  0xb6   :  { %v373_v6 = vpop.f32.mrf.mxu2  ;;  %v337_v12 = vpop.f32.mrf.mxu0 }
  0xb7   :  { %v392_v7 = vpop.f32.mrf.mxu3  ;;  %v374_v10 = vadd.f32 %v373_v6, %v355_v4  ;;  %v356_v13 = vpop.f32.mrf.mxu1  ;;  %v452_v6 = vld [vmem:[%s914_s2] sm:$0x1] }
  0xb8   :  { %v357_v18 = vadd.f32 %v356_v13, %v337_v12 }
  0xb9   :  { %v875_v15 = vadd.f32 %v392_v7, %v374_v10 }
  0xbb   :  { %v401_v21 = vsel %vm397_vm0, %v875_v15, 0.0 }
  0xbc   :  { %v402_v27 = vadd.f32 %v401_v21, %v400_v24 }
  0xbe   :  { %v375_v19 = vpop.f32.mrf.mxu2 }
  0xbf   :  { %v376_v22 = vadd.f32 %v375_v19, %v357_v18  ;;  %v394_v25 = vpop.f32.mrf.mxu3 }
  0xc1   :  { %v395_v26 = vadd.f32 %v394_v25, %v376_v22 }
  0xc3   :  { %v403_v28 = vsel %vm397_vm0, %v395_v26, 0.0 }
  0xc4   :  { %v404_v30 = vadd.f32 %v403_v28, %v402_v27 }
  0xc6   :  { %v405_v31 = vrot.slane %v404_v30, 4 }
  0xc8   :  { %v406_v33 = vadd.f32 %v405_v31, %v404_v30 }
  0xca   :  { %v407_v34 = vrot.slane %v406_v33, 2 }
  0xcc   :  { %v408_v36 = vadd.f32 %v407_v34, %v406_v33 }
  0xce   :  { %v409_v37 = vrot.slane %v408_v36, 1 }
  0xd0   :  { %v410_v39 = vadd.f32 %v409_v37, %v408_v36 }
  0xd2   :  { %v418_v40 = vmul.f32 %v417_v38, %v410_v39 }
  0xd4   :  { %v419_v41 = vsub.f32 %v873_v14, %v418_v40  ;;  %v420_v42 = vsub.f32 %v871_v11, %v418_v40  ;;  %v421_v43 = vsub.f32 %v875_v15, %v418_v40  ;;  %v422_v44 = vsub.f32 %v395_v26, %v418_v40 }
  0xd6   :  { %v423_v45 = vmul.f32 %v419_v41, %v419_v41  ;;  %v424_v46 = vmul.f32 %v420_v42, %v420_v42  ;;  %v425_v47 = vmul.f32 %v421_v43, %v421_v43  ;;  %v426_v48 = vmul.f32 %v422_v44, %v422_v44 }
  0xd8   :  { %v427_v49 = vsel %vm397_vm0, %v423_v45, 0.0  ;;  %v428_v50 = vsel %vm397_vm0, %v424_v46, 0.0  ;;  %v430_v52 = vsel %vm397_vm0, %v425_v47, 0.0  ;;  %v432_v54 = vsel %vm397_vm0, %v426_v48, 0.0 }
  0xd9   :  { %v429_v51 = vadd.f32 %v428_v50, %v427_v49 }
  0xdb   :  { %v431_v53 = vadd.f32 %v430_v52, %v429_v51 }
  0xdd   :  { %v433_v55 = vadd.f32 %v432_v54, %v431_v53 }
  0xdf   :  { %v434_v56 = vrot.slane %v433_v55, 4 }
  0xe1   :  { %v435_v57 = vadd.f32 %v434_v56, %v433_v55 }
  0xe3   :  { %v436_v58 = vrot.slane %v435_v57, 2 }
  0xe5   :  { %v437_v59 = vadd.f32 %v436_v58, %v435_v57 }
  0xe7   :  { %v438_v60 = vrot.slane %v437_v59, 1 }
  0xe9   :  { %v439_v61 = vadd.f32 %v438_v60, %v437_v59 }
  0xeb   :  { %v440_v62 = vmul.f32 %v439_v61, %v417_v38 }
  0xed   :  { %v441_v63 = vadd.f32 1e-05, %v440_v62 }
  0xef   :  { %699 = vrsqrt.f32 %v441_v63  ;;  %vm448_vm3 = vweird.f32 %v441_v63 }
  0xf5   :  { %v700_v0 = vpop.eup %699 }
  0xf6   :  { %v443_v1 = vmul.f32 %v700_v0, %v441_v63  ;;  %vm449_vm2 = vweird.f32 %v700_v0 }
  0xf7   :  { %vm450_vm4 = vmor %vm448_vm3, %vm449_vm2 }
  0xf8   :  { %v444_v2 = vmul.f32 %v700_v0, %v443_v1 }
  0xfa   :  { %v445_v3 = vmul.f32 0.5, %v444_v2 }
  0xfc   :  { %v446_v4 = vsub.f32 1.5, %v445_v3 }
  0xfe   :  { %v447_v5 = vmul.f32 %v700_v0, %v446_v4 }
 0x100   :  { %v451_v7 = vsel %vm450_vm4, %v700_v0, %v447_v5 }
 0x101   :  { %v453_v8 = vmul.f32 %v452_v6, %v451_v7 }
 0x103   :  { %v455_v10 = vmul.f32 %v453_v8, %v418_v40  ;;  %v458_v12 = vperm.slane %v453_v8, 0 }
 0x105   :  { %v456_v13 = vsub.f32 %v454_v9, %v455_v10  ;;  %v460_v16 = vmul.f32 %v458_v12, %v873_v14  ;;  %v461_v17 = vmul.f32 %v458_v12, %v871_v11  ;;  %v462_v18 = vmul.f32 %v458_v12, %v875_v15 }
 0x106   :  { %v463_v19 = vmul.f32 %v458_v12, %v395_v26 }
 0x107   :  { %v465_v20 = vperm.slane %v456_v13, 0 }
 0x109   :  { %v467_v21 = vadd.f32 %v465_v20, %v460_v16  ;;  %v468_v22 = vadd.f32 %v465_v20, %v461_v17  ;;  %v469_v23 = vadd.f32 %v465_v20, %v462_v18  ;;  %v470_v24 = vadd.f32 %v465_v20, %v463_v19 }
 0x10b   :  { %vm471_vm5 = vcmp.gt.f32.partialorder %v467_v21, 0.0  ;;  %vm472_vm6 = vcmp.gt.f32.partialorder %v468_v22, 0.0  ;;  %vm473_vm7 = vcmp.gt.f32.partialorder %v469_v23, 0.0  ;;  %vm474_vm8 = vcmp.gt.f32.partialorder %v470_v24, 0.0 }
 0x10c   :  { %v475_v25 = vmul.f32 0.2, %v467_v21  ;;  %v476_v27 = vmul.f32 0.2, %v468_v22  ;;  %v477_v28 = vmul.f32 0.2, %v469_v23 }
 0x10d   :  { %v478_v29 = vmul.f32 0.2, %v470_v24 }
 0x10e   :  { %v479_v30 = vsel %vm471_vm5, %v467_v21, %v475_v25  ;;  %v480_v14 = vsel %vm472_vm6, %v468_v22, %v476_v27  ;;  %v481_v31 = vsel %vm473_vm7, %v469_v23, %v477_v28 }
 0x10f   :  { %v482_v11 = vsel %vm474_vm8, %v470_v24, %v478_v29  ;;  %v483_v15 = vpack.c.bf16 %v479_v30, %v479_v30  ;;  %v484_v26 = vpack.c.bf16 %v480_v14, %v480_v14  ;;  %v485_v32 = vpack.c.bf16 %v481_v31, %v481_v31 }
 0x110   :  { %v486_v33 = vpack.c.bf16 %v482_v11, %v482_v11 }
 0x111   :  { %488 = vst.msk [vmem:[%s916_s4] sm:$0xf] %vm487_vm9, %v483_v15 }
 0x112   :  { %489 = vst.msk [vmem:[%s916_s4 + $0x4] sm:$0xf] %vm487_vm9, %v484_v26 }
 0x113   :  { %490 = vst.msk [vmem:[%s916_s4 + $0x8] sm:$0xf] %vm487_vm9, %v485_v32 }
 0x114   :  { %491 = vst.msk [vmem:[%s916_s4 + $0xc] sm:$0xf] %vm487_vm9, %v486_v33 }

// kernel: discriminator_forward.9
= control target key start
LH: loop header
LB: loop body
LE: loop exit
PB: predicated region body
PF: predicated region fallthrough
CT: control target
= control target key end

     0   :  { %v627_v42 = vmov 8.0   ;;  %vm347_vm0 = vcmask 261120   ;;  %vm403_vm6 = vcmask 64512   ;;  %vm427_vm7 = vcmask 254976   ;;  %s782_s1 = inlined_call_operand.vmem [shape: bf16[512,32], index: 1, kind: input, shape index: {}]   ;;  %s783_s0 = inlined_call_operand.vmem [shape: bf16[8,512], index: 0, kind: input, shape index: {}]   ;;  %s784_s2 = inlined_call_operand.vmem [shape: f32[1,32], index: 2, kind: input, shape index: {}]   ;;  %s785_s3 = inlined_call_operand.vmem [shape: f32[1,32], index: 3, kind: input, shape index: {}]   ;;  %s786_s4 = inlined_call_operand.vmem [shape: f32[8,32], index: 4, kind: input, shape index: {}]   ;;  %s787_s5 = inlined_call_operand.vmem [shape: f32[2,8], index: 5, kind: input, shape index: {}]   ;;  %s788_s6 = inlined_call_operand.vmem [shape: f32[2,1], index: 6, kind: output, shape index: {}]  }
   0x1   :  { %v593_v0 = vld [vmem:[%s782_s1 + $0x38] sm:$0xff]  ;;  %v592_v4 = vld [vmem:[%s782_s1 + $0x30] sm:$0xff]  ;;  %v591_v8 = vld [vmem:[%s782_s1 + $0x28] sm:$0xff]  ;;  %619 = vrcp.f32 %v627_v42  ;;  %vm450_vm11 = vcmask 1024  }
   0x2   :  { %v601_v1 = vld [vmem:[%s782_s1 + $0x78] sm:$0xff]  ;;  %295 = vmatpush.bf16.msra.mxu0 %v593_v0  ;;  %v600_v5 = vld [vmem:[%s782_s1 + $0x70] sm:$0xff]  ;;  %v599_v9 = vld [vmem:[%s782_s1 + $0x68] sm:$0xff] }
   0x3   :  { %v609_v2 = vld [vmem:[%s782_s1 + $0xb8] sm:$0xff]  ;;  %308 = vmatpush.bf16.msra.mxu1 %v601_v1  ;;  %v608_v6 = vld [vmem:[%s782_s1 + $0xb0] sm:$0xff]  ;;  %v607_v10 = vld [vmem:[%s782_s1 + $0xa8] sm:$0xff] }
   0x4   :  { %v617_v3 = vld [vmem:[%s782_s1 + $0xf8] sm:$0xff]  ;;  %321 = vmatpush.bf16.msra.mxu2 %v609_v2  ;;  %v616_v7 = vld [vmem:[%s782_s1 + $0xf0] sm:$0xff]  ;;  %v615_v11 = vld [vmem:[%s782_s1 + $0xe8] sm:$0xff] }
   0x5   :  { %334 = vmatpush.bf16.msra.mxu3 %v617_v3  ;;  %v590_v12 = vld [vmem:[%s782_s1 + $0x20] sm:$0xff]  ;;  %v589_v16 = vld [vmem:[%s782_s1 + $0x18] sm:$0xff]  ;;  %v588_v20 = vld [vmem:[%s782_s1 + $0x10] sm:$0xff] }
   0x6   :  { %296 = vmatpush.bf16.msra.mxu0 %v592_v4  ;;  %v598_v13 = vld [vmem:[%s782_s1 + $0x60] sm:$0xff]  ;;  %v597_v17 = vld [vmem:[%s782_s1 + $0x58] sm:$0xff]  ;;  %v596_v21 = vld [vmem:[%s782_s1 + $0x50] sm:$0xff] }
   0x7   :  { %309 = vmatpush.bf16.msra.mxu1 %v600_v5  ;;  %v606_v14 = vld [vmem:[%s782_s1 + $0xa0] sm:$0xff]  ;;  %v605_v18 = vld [vmem:[%s782_s1 + $0x98] sm:$0xff]  ;;  %v604_v22 = vld [vmem:[%s782_s1 + $0x90] sm:$0xff]  ;;  %v620_v45 = vpop.eup %619 }
   0x8   :  { %322 = vmatpush.bf16.msra.mxu2 %v608_v6  ;;  %v614_v15 = vld [vmem:[%s782_s1 + $0xe0] sm:$0xff]  ;;  %v613_v19 = vld [vmem:[%s782_s1 + $0xd8] sm:$0xff]  ;;  %v612_v23 = vld [vmem:[%s782_s1 + $0xd0] sm:$0xff]  ;;  %v356_v47 = vmul.f32 8.0, %v620_v45  ;;  %vm360_vm1 = vweird.f32 %v620_v45 }
   0x9   :  { %335 = vmatpush.bf16.msra.mxu3 %v616_v7  ;;  %v587_v24 = vld [vmem:[%s782_s1 + $0x8] sm:$0xff]  ;;  %v23_v26 = vld [vmem:[%s783_s0] sm:$0xff] }
   0xa   :  { %297 = vmatpush.bf16.msra.mxu0 %v591_v8  ;;  %v595_v25 = vld [vmem:[%s782_s1 + $0x48] sm:$0xff]  ;;  %v91_v30 = vunpack.c.l.b16 %v23_v26  ;;  %v92_v31 = vunpack.c.h.b16 %v23_v26  ;;  %v586_v32 = vld [vmem:[%s782_s1] sm:$0xff]  ;;  %v357_v54 = vsub.f32 1.0, %v356_v47 }
   0xb   :  { %310 = vmatpush.bf16.msra.mxu1 %v599_v9  ;;  %v603_v27 = vld [vmem:[%s782_s1 + $0x88] sm:$0xff]  ;;  %v594_v33 = vld [vmem:[%s782_s1 + $0x40] sm:$0xff] }
   0xc   :  { %323 = vmatpush.bf16.msra.mxu2 %v607_v10  ;;  %v611_v28 = vld [vmem:[%s782_s1 + $0xc8] sm:$0xff]  ;;  %v602_v36 = vld [vmem:[%s782_s1 + $0x80] sm:$0xff]  ;;  %v95_v38 = vpack.c.b16 %v91_v30, %v91_v30  ;;  %v96_v39 = vpack.c.b16 %v92_v31, %v92_v31  ;;  %v358_v57 = vmul.f32 %v620_v45, %v357_v54 }
   0xd   :  { %336 = vmatpush.bf16.msra.mxu3 %v615_v11  ;;  %v24_v29 = vld [vmem:[%s783_s0 + $0x8] sm:$0xff]  ;;  %v610_v37 = vld [vmem:[%s782_s1 + $0xc0] sm:$0xff] }
   0xe   :  { %298 = vmatpush.bf16.msra.mxu0 %v590_v12  ;;  %v93_v34 = vunpack.c.l.b16 %v24_v29  ;;  %v94_v35 = vunpack.c.h.b16 %v24_v29  ;;  %v359_v62 = vadd.f32 %v620_v45, %v358_v57 }
   0xf   :  { %311 = vmatpush.bf16.msra.mxu1 %v598_v13 }
  0x10   :  { %324 = vmatpush.bf16.msra.mxu2 %v606_v14  ;;  %v97_v40 = vpack.c.b16 %v93_v34, %v93_v34  ;;  %v98_v41 = vpack.c.b16 %v94_v35, %v94_v35  ;;  %v361_v1 = vsel %vm360_vm1, %v620_v45, %v359_v62  ;;  %v402_v35 = vld [vmem:[%s787_s5] sm:$0x3] }
  0x11   :  { %337 = vmatpush.bf16.msra.mxu3 %v614_v15 }
  0x12   :  { %299 = vmatpush.bf16.msra.mxu0 %v589_v16 }
  0x13   :  { %312 = vmatpush.bf16.msra.mxu1 %v597_v17 }
  0x14   :  { %325 = vmatpush.bf16.msra.mxu2 %v605_v18 }
  0x15   :  { %338 = vmatpush.bf16.msra.mxu3 %v613_v19 }
  0x16   :  { %300 = vmatpush.bf16.msra.mxu0 %v588_v20 }
  0x17   :  { %313 = vmatpush.bf16.msra.mxu1 %v596_v21  ;;  %v384_v21 = vld [vmem:[%s784_s2] sm:$0x1] }
  0x18   :  { %326 = vmatpush.bf16.msra.mxu2 %v604_v22 }
  0x19   :  { %339 = vmatpush.bf16.msra.mxu3 %v612_v23 }
  0x1a   :  { %301 = vmatpush.bf16.msra.mxu0 %v587_v24  ;;  %v386_v24 = vld [vmem:[%s785_s3] sm:$0x1] }
  0x1b   :  { %314 = vmatpush.bf16.msra.mxu1 %v595_v25 }
  0x1c   :  { %327 = vmatpush.bf16.msra.mxu2 %v603_v27 }
  0x1d   :  { %340 = vmatpush.bf16.msra.mxu3 %v611_v28 }
  0x1e   :  { %302 = vmatpush.bf16.msra.mxu0 %v586_v32  ;;  %v400_v32 = vld [vmem:[%s786_s4] sm:$0xff] }
  0x1f   :  { %315 = vmatpush.bf16.msra.mxu1 %v594_v33 }
  0x20   :  { %328 = vmatpush.bf16.msra.mxu2 %v602_v36 }
  0x21   :  { %341 = vmatpush.bf16.msra.mxu3 %v610_v37  ;;  %303 = vmatmul.bf16.vlgmr.msra.gmra.mxu0 %v95_v38 }
  0x22   :  { %316 = vmatmul.bf16.vlgmr.msra.gmra.mxu1 %v96_v39 }
  0x23   :  { %329 = vmatmul.bf16.vlgmr.msra.gmra.mxu2 %v97_v40 }
  0x24   :  { %342 = vmatmul.bf16.vlgmr.msra.gmra.mxu3 %v98_v41 }
  0x9e   :  { %v304_v43 = vpop.f32.mrf.mxu0 }
  0x9f   :  { %v317_v44 = vpop.f32.mrf.mxu1 }
  0xa0   :  { %v318_v46 = vadd.f32 %v317_v44, %v304_v43 }
  0xa6   :  { %v330_v48 = vpop.f32.mrf.mxu2  ;;  %v306_v51 = vpop.f32.mrf.mxu0 }
  0xa7   :  { %v343_v49 = vpop.f32.mrf.mxu3  ;;  %v331_v50 = vadd.f32 %v330_v48, %v318_v46  ;;  %v319_v52 = vpop.f32.mrf.mxu1 }
  0xa9   :  { %v344_v53 = vadd.f32 %v343_v49, %v331_v50 }
  0xab   :  { %v348_v55 = vsel %vm347_vm0, %v344_v53, 0.0 }
  0xac   :  { %v349_v56 = vrot.slane %v348_v55, 4 }
  0xae   :  { %v350_v58 = vadd.f32 %v349_v56, %v348_v55  ;;  %v332_v59 = vpop.f32.mrf.mxu2 }
  0xaf   :  { %v345_v60 = vpop.f32.mrf.mxu3 }
  0xb0   :  { %v351_v61 = vrot.slane %v350_v58, 2 }
  0xb2   :  { %v352_v63 = vadd.f32 %v351_v61, %v350_v58 }
  0xb4   :  { %v353_v0 = vrot.slane %v352_v63, 1 }
  0xb6   :  { %v354_v2 = vadd.f32 %v353_v0, %v352_v63 }
  0xb8   :  { %v362_v3 = vmul.f32 %v361_v1, %v354_v2 }
  0xba   :  { %v363_v4 = vsub.f32 %v344_v53, %v362_v3 }
  0xbc   :  { %v364_v5 = vmul.f32 %v363_v4, %v363_v4 }
  0xbe   :  { %v365_v6 = vsel %vm347_vm0, %v364_v5, 0.0 }
  0xbf   :  { %v366_v7 = vrot.slane %v365_v6, 4 }
  0xc1   :  { %v367_v8 = vadd.f32 %v366_v7, %v365_v6 }
  0xc3   :  { %v368_v9 = vrot.slane %v367_v8, 2 }
  0xc5   :  { %v369_v10 = vadd.f32 %v368_v9, %v367_v8 }
  0xc7   :  { %v370_v11 = vrot.slane %v369_v10, 1 }
  0xc9   :  { %v371_v12 = vadd.f32 %v370_v11, %v369_v10 }
  0xcb   :  { %v372_v13 = vmul.f32 %v371_v12, %v361_v1 }
  0xcd   :  { %v373_v14 = vadd.f32 1e-05, %v372_v13 }
  0xcf   :  { %621 = vrsqrt.f32 %v373_v14  ;;  %vm380_vm3 = vweird.f32 %v373_v14 }
  0xd5   :  { %v622_v15 = vpop.eup %621 }
  0xd6   :  { %v375_v16 = vmul.f32 %v622_v15, %v373_v14  ;;  %vm381_vm2 = vweird.f32 %v622_v15 }
  0xd7   :  { %vm382_vm4 = vmor %vm380_vm3, %vm381_vm2 }
  0xd8   :  { %v376_v17 = vmul.f32 %v622_v15, %v375_v16 }
  0xda   :  { %v377_v18 = vmul.f32 0.5, %v376_v17 }
  0xdc   :  { %v378_v19 = vsub.f32 1.5, %v377_v18 }
  0xde   :  { %v379_v20 = vmul.f32 %v622_v15, %v378_v19 }
  0xe0   :  { %v383_v22 = vsel %vm382_vm4, %v622_v15, %v379_v20 }
  0xe1   :  { %v385_v23 = vmul.f32 %v384_v21, %v383_v22 }
  0xe3   :  { %v387_v25 = vmul.f32 %v385_v23, %v362_v3  ;;  %v390_v26 = vperm.slane %v385_v23, 0 }
  0xe5   :  { %v388_v27 = vsub.f32 %v386_v24, %v387_v25  ;;  %v392_v28 = vmul.f32 %v390_v26, %v344_v53 }
  0xe7   :  { %v394_v29 = vperm.slane %v388_v27, 0 }
  0xe9   :  { %v396_v30 = vadd.f32 %v394_v29, %v392_v28 }
  0xeb   :  { %vm397_vm5 = vcmp.gt.f32.partialorder %v396_v30, 0.0  ;;  %v398_v31 = vmul.f32 0.2, %v396_v30 }
  0xed   :  { %v399_v33 = vsel %vm397_vm5, %v396_v30, %v398_v31 }
  0xee   :  { %v401_v34 = vmul.f32 %v400_v32, %v399_v33 }
  0xf0   :  { %422 = vmatpush.msrb.mxu0 %v401_v34 }
  0xf1   :  { %584 = vmatmul.msk.f32.vlgmr.msrb.gmra.mxu0 %vm403_vm6, %v402_v35 }
 0x16e   :  { %v424_v36 = vpop.f32.mrf.mxu0 }
 0x16f   :  { %v428_v37 = vsel %vm427_vm7, %v424_v36, 0.0 }
 0x170   :  { %429 = vadd.xlane.f32.xlu0 %v428_v37 }
 0x1e3   :  { %v430_v38 = vpop.xlane.xlu0 %429 }
 0x1e4   :  { %v585_v39 = vmul.f32 -1.442695, %v430_v38 }
 0x1e6   :  { %623 = vpow2.f32 %v585_v39 }
 0x1ec   :  { %v624_v40 = vpop.eup %623 }
 0x1ed   :  { %v434_v41 = vadd.f32 1.0, %v624_v40 }
 0x1ef   :  { %625 = vrcp.f32 %v434_v41  ;;  %v446_v45 = vand.u32 2147483648, %v434_v41  ;;  %v444_v47 = vand.u32 2147483647, %v434_v41  ;;  %vm440_vm9 = vweird.f32 %v434_v41 }
 0x1f1   :  { %v447_v49 = vor.u32 1.1754944e-38, %v446_v45  ;;  %vm445_vm12 = vcmp.eq.f32.partialorder %v444_v47, 8.507059e+37 }
 0x1f5   :  { %v626_v42 = vpop.eup %625 }
 0x1f6   :  { %v436_v43 = vmul.f32 %v626_v42, %v434_v41  ;;  %vm441_vm8 = vweird.f32 %v626_v42 }
 0x1f7   :  { %vm442_vm10 = vmor %vm440_vm9, %vm441_vm8 }
 0x1f8   :  { %v437_v44 = vsub.f32 1.0, %v436_v43 }
 0x1fa   :  { %v438_v46 = vmul.f32 %v626_v42, %v437_v44 }
 0x1fc   :  { %v439_v48 = vadd.f32 %v626_v42, %v438_v46 }
 0x1fe   :  { %v443_v50 = vsel %vm442_vm10, %v626_v42, %v439_v48 }
 0x1ff   :  { %v448_v51 = vsel %vm445_vm12, %v447_v49, %v443_v50 }
 0x200   :  { %451 = vst.msk [vmem:[%s788_s6] sm:$0x3] %vm450_vm11, %v448_v51 }

</bundles_post_ra>
